<compile_context>
chip_gen: v6e
topology: v6e:2x2x1
jax: 0.10.0
libtpu: 0.0.40
codegen_flags: <defaults>
</compile_context>

<pallas_src>
import functools

import jax
import jax.numpy as jnp
from jax.experimental import pallas as pl
from jax.experimental.pallas import tpu as pltpu


def _round_up(n, m):
    return ((n + m - 1) // m) * m


def _mish_exact(z):
    # Reference Mish: z * tanh(softplus(z)).
    return z * jnp.tanh(jax.nn.softplus(z))


def _mish_fast(z):
    # One-transcendental Mish:
    #   mish(z) = z * tanh(log(1 + e^z)) = z * ((1+e^z)^2 - 1) / ((1+e^z)^2 + 1)
    # Clamp the exp argument; for z > 20, mish(z) == z to f32 precision.
    zc = jnp.minimum(z, 20.0)
    u = 1.0 + jnp.exp(zc)
    w = u * u
    r = z * (w - 1.0) * pl.reciprocal(w + 1.0, approx=True)
    return jnp.where(z > 20.0, z, r)


def classifier_kernel(p1_ref, p2_ref,
                      w1a_ref, w1b_ref, b1_ref,
                      w2_ref, b2_ref,
                      w3_ref, b3_ref,
                      w4_ref, b4_ref,
                      o_ref):
    """Whole MLP hot path (4 matmuls + Mish + sigmoid) on one batch tile.

    BN scale/shift are pre-folded into w2/b2, w3/b3, w4/b4 by the wrapper, so the
    kernel is pure matmul + bias + Mish chains.
    """
    # fc1 on the two un-concatenated halves (concat folded into a split weight).
    h = jnp.dot(p1_ref[...], w1a_ref[...], preferred_element_type=jnp.float32)
    h = h + jnp.dot(p2_ref[...], w1b_ref[...], preferred_element_type=jnp.float32)
    h = _mish_fast(h + b1_ref[...])

    # fc2 (BN1 folded in) -> Mish
    h = jnp.dot(h.astype(jnp.bfloat16), w2_ref[...],
                preferred_element_type=jnp.float32) + b2_ref[...]
    h = _mish_fast(h)

    # fc3 (BN2 folded in) -> Mish  (output lane-padded to 128; pad columns stay 0)
    h = jnp.dot(h.astype(jnp.bfloat16), w3_ref[...],
                preferred_element_type=jnp.float32) + b3_ref[...]
    h = _mish_fast(h)

    # fc4 (BN3 folded in) -> sigmoid (lane-padded output; pad columns sliced off outside)
    h = jnp.dot(h.astype(jnp.bfloat16), w4_ref[...],
                preferred_element_type=jnp.float32) + b4_ref[...]
    o_ref[...] = jax.nn.sigmoid(h).astype(o_ref.dtype)


def _full_spec(shape):
    # whole array resident in VMEM for every grid step (constant block index)
    return pl.BlockSpec(shape, lambda i: (0,) * len(shape))


@functools.partial(jax.jit, static_argnames=("tile_b",))
def classifier_forward(x, pro1_index, pro2_index, params, tile_b=512):
    """Gather (glue in plain JAX), MLP in a Pallas kernel tiled over the batch."""
    (w1, b1, s1, t1, w2, b2, s2, t2, w3, b3, s3, t3, w4, b4) = params
    D = x.shape[1]
    B = pro1_index.shape[0]
    O = w4.shape[1]

    # ---- glue: gather protein embeddings (bf16 for the matmul/DMA path) ----
    pro1 = jnp.take(x, pro1_index, axis=0).astype(jnp.bfloat16)
    pro2 = jnp.take(x, pro2_index, axis=0).astype(jnp.bfloat16)

    # ---- batch tiling: clamp tile to the (128-rounded) batch, then pad ----
    tile_b = min(tile_b, _round_up(max(B, 1), 128))
    B_pad = _round_up(max(B, 1), tile_b)
    if B_pad != B:
        pad = ((0, B_pad - B), (0, 0))
        pro1 = jnp.pad(pro1, pad)
        pro2 = jnp.pad(pro2, pad)

    # ---- split fc1 weight so the [B, 2D] concat never materializes ----
    w1a = w1[:D].astype(jnp.bfloat16)
    w1b = w1[D:].astype(jnp.bfloat16)

    # ---- fold BN(k) scale/shift into FC(k+1):  W' = diag(s) W,  b' = b + t @ W ----
    w2f = (w2 * s1.reshape(-1, 1)).astype(jnp.bfloat16)
    b2f = b2 + t1 @ w2
    w3f = (w3 * s2.reshape(-1, 1))
    b3f = b3 + t2 @ w3
    w4f = (w4 * s3.reshape(-1, 1))
    b4f = b4 + t3 @ w4

    # ---- lane-pad narrow dims: hidden 64 -> 128, out_features -> multiple of 128 ----
    H3 = w3.shape[1]
    H3p = _round_up(H3, 128)
    Op = _round_up(O, 128)

    w3p = jnp.pad(w3f, ((0, 0), (0, H3p - H3))).astype(jnp.bfloat16)
    b3p = jnp.pad(b3f, ((0, 0), (0, H3p - H3)))
    w4p = jnp.pad(w4f, ((0, H3p - H3), (0, Op - O))).astype(jnp.bfloat16)
    b4p = jnp.pad(b4f, ((0, 0), (0, Op - O)))

    grid = (B_pad // tile_b,)

    in_specs = [
        pl.BlockSpec((tile_b, D), lambda i: (i, 0)),          # pro1: tiled over batch
        pl.BlockSpec((tile_b, D), lambda i: (i, 0)),          # pro2: tiled over batch
        _full_spec(w1a.shape), _full_spec(w1b.shape), _full_spec(b1.shape),
        _full_spec(w2f.shape), _full_spec(b2f.shape),
        _full_spec(w3p.shape), _full_spec(b3p.shape),
        _full_spec(w4p.shape), _full_spec(b4p.shape),
    ]
    out_spec = pl.BlockSpec((tile_b, Op), lambda i: (i, 0))   # lane-dense (>=128) output

    out = pl.pallas_call(
        classifier_kernel,
        out_shape=jax.ShapeDtypeStruct((B_pad, Op), jnp.float32),
        grid=grid,
        in_specs=in_specs,
        out_specs=out_spec,
        compiler_params=pltpu.CompilerParams(dimension_semantics=("parallel",)),
    )(pro1, pro2, w1a, w1b, b1, w2f, b2f, w3p, b3p, w4p, b4p)

    return out[:B, :O]


def init_params(key, in_features, out_features, eps=1e-5):
    """Deterministic parameter init mirroring the nn.Module shapes.

    Linear: weight [in, out] (transposed vs. torch), bias [1, out].
    BatchNorm1d: folded into per-feature scale/shift using running stats.
    """
    dims = [in_features, 512, 256, 64, out_features]
    keys = iter(jax.random.split(key, 17))   # 4 linears * 2 + 3 BNs * 3 = 17 keys

    def linear(kw, kb, fan_in, fan_out):
        bound = 1.0 / jnp.sqrt(jnp.float32(fan_in))
        w = jax.random.uniform(kw, (fan_in, fan_out), jnp.float32, -bound, bound)
        b = jax.random.uniform(kb, (1, fan_out), jnp.float32, -bound, bound)
        return w, b

    def folded_bn(kg, kb, km, n):
        gamma = 1.0 + 0.1 * jax.random.normal(kg, (1, n), jnp.float32)
        beta = 0.1 * jax.random.normal(kb, (1, n), jnp.float32)
        running_mean = 0.05 * jax.random.normal(km, (1, n), jnp.float32)
        running_var = jnp.ones((1, n), jnp.float32)
        scale = gamma / jnp.sqrt(running_var + eps)
        shift = beta - running_mean * scale
        return scale, shift

    w1, b1 = linear(next(keys), next(keys), dims[0], dims[1])
    s1, t1 = folded_bn(next(keys), next(keys), next(keys), dims[1])
    w2, b2 = linear(next(keys), next(keys), dims[1], dims[2])
    s2, t2 = folded_bn(next(keys), next(keys), next(keys), dims[2])
    w3, b3 = linear(next(keys), next(keys), dims[2], dims[3])
    s3, t3 = folded_bn(next(keys), next(keys), next(keys), dims[3])
    w4, b4 = linear(next(keys), next(keys), dims[3], dims[4])

    return (w1, b1, s1, t1, w2, b2, s2, t2, w3, b3, s3, t3, w4, b4)


def reference_forward(x, pro1_index, pro2_index, params):
    """Pure-JAX f32 reference for sanity checking the kernel."""
    (w1, b1, s1, t1, w2, b2, s2, t2, w3, b3, s3, t3, w4, b4) = params
    h = jnp.concatenate([x[pro1_index], x[pro2_index]], axis=1)
    h = _mish_exact(h @ w1 + b1) * s1 + t1
    h = _mish_exact(h @ w2 + b2) * s2 + t2
    h = _mish_exact(h @ w3 + b3) * s3 + t3
    return jax.nn.sigmoid(h @ w4 + b4)


if __name__ == "__main__":
    key = jax.random.PRNGKey(0)
    k_x, k_i1, k_i2, k_p = jax.random.split(key, 4)

    num_proteins = 16
    feat_dim = 64                 # per-protein embedding size
    in_features = 2 * feat_dim    # = 128 after pair concat
    out_features = 8
    batch = 8                     # number of protein pairs

    x = jax.random.normal(k_x, (num_proteins, feat_dim), jnp.float32)
    pro1_index = jax.random.randint(k_i1, (batch,), 0, num_proteins, jnp.int32)
    pro2_index = jax.random.randint(k_i2, (batch,), 0, num_proteins, jnp.int32)

    params = init_params(k_p, in_features, out_features)

    out = classifier_forward(x, pro1_index, pro2_index, params)
    out = jax.block_until_ready(out)

    ref = reference_forward(x, pro1_index, pro2_index, params)
    assert out.shape == (batch, out_features)
    # bf16 matmul operands + approx reciprocal => compare at loose-but-meaningful tolerance
    assert jnp.allclose(out, ref, atol=3e-2, rtol=0.0), "mismatch vs. pure-JAX reference"

    print("KERNEL_OK")
</pallas_src>

<mosaic_0001>
module attributes {stable_mosaic.version = 11 : i64} {
  func.func @classifier_kernel(%arg0: i32, %arg1: memref<128x64xbf16, #tpu.memory_space<vmem>>, %arg2: memref<128x64xbf16, #tpu.memory_space<vmem>>, %arg3: memref<64x512xbf16, #tpu.memory_space<vmem>>, %arg4: memref<64x512xbf16, #tpu.memory_space<vmem>>, %arg5: memref<1x512xf32, #tpu.memory_space<vmem>>, %arg6: memref<512x256xbf16, #tpu.memory_space<vmem>>, %arg7: memref<1x256xf32, #tpu.memory_space<vmem>>, %arg8: memref<256x128xbf16, #tpu.memory_space<vmem>>, %arg9: memref<1x128xf32, #tpu.memory_space<vmem>>, %arg10: memref<128x128xbf16, #tpu.memory_space<vmem>>, %arg11: memref<1x128xf32, #tpu.memory_space<vmem>>, %arg12: memref<128x128xf32, #tpu.memory_space<vmem>>) attributes {dimension_semantics = [#tpu.dimension_semantics<parallel>], iteration_bounds = array<i64: 1>, scalar_prefetch = 0 : i64, scratch_operands = 0 : i64, tpu.core_type = #tpu.core_type<tc>, window_params = [{transform_indices = @transform_0, window_bounds = array<i64: 128, 64>}, {transform_indices = @transform_1, window_bounds = array<i64: 128, 64>}, {pipeline_mode = #tpu.pipeline_mode<synchronous>, transform_indices = @transform_2, window_bounds = array<i64: 64, 512>}, {pipeline_mode = #tpu.pipeline_mode<synchronous>, transform_indices = @transform_3, window_bounds = array<i64: 64, 512>}, {pipeline_mode = #tpu.pipeline_mode<synchronous>, transform_indices = @transform_4, window_bounds = array<i64: 1, 512>}, {pipeline_mode = #tpu.pipeline_mode<synchronous>, transform_indices = @transform_5, window_bounds = array<i64: 512, 256>}, {pipeline_mode = #tpu.pipeline_mode<synchronous>, transform_indices = @transform_6, window_bounds = array<i64: 1, 256>}, {pipeline_mode = #tpu.pipeline_mode<synchronous>, transform_indices = @transform_7, window_bounds = array<i64: 256, 128>}, {pipeline_mode = #tpu.pipeline_mode<synchronous>, transform_indices = @transform_8, window_bounds = array<i64: 1, 128>}, {pipeline_mode = #tpu.pipeline_mode<synchronous>, transform_indices = @transform_9, window_bounds = array<i64: 128, 128>}, {pipeline_mode = #tpu.pipeline_mode<synchronous>, transform_indices = @transform_10, window_bounds = array<i64: 1, 128>}, {transform_indices = @transform_11, window_bounds = array<i64: 128, 128>}]} {
    %c0 = arith.constant 0 : index
    %c0_0 = arith.constant 0 : index
    %0 = vector.load %arg1[%c0, %c0_0] : memref<128x64xbf16, #tpu.memory_space<vmem>>, vector<128x64xbf16>
    %c0_1 = arith.constant 0 : index
    %c0_2 = arith.constant 0 : index
    %1 = vector.load %arg3[%c0_1, %c0_2] : memref<64x512xbf16, #tpu.memory_space<vmem>>, vector<64x512xbf16>
    %cst = arith.constant dense<0.000000e+00> : vector<128x512xf32>
    %2 = tpu.matmul %0, %1, %cst {dimension_numbers = #tpu.dot_dimension_numbers<[1], [0], [0], [1], [0, 0, 1, 1], [], []>} : vector<128x64xbf16>, vector<64x512xbf16>, vector<128x512xf32> -> vector<128x512xf32>
    %c0_3 = arith.constant 0 : index
    %c0_4 = arith.constant 0 : index
    %3 = vector.load %arg2[%c0_3, %c0_4] : memref<128x64xbf16, #tpu.memory_space<vmem>>, vector<128x64xbf16>
    %c0_5 = arith.constant 0 : index
    %c0_6 = arith.constant 0 : index
    %4 = vector.load %arg4[%c0_5, %c0_6] : memref<64x512xbf16, #tpu.memory_space<vmem>>, vector<64x512xbf16>
    %cst_7 = arith.constant dense<0.000000e+00> : vector<128x512xf32>
    %5 = tpu.matmul %3, %4, %cst_7 {dimension_numbers = #tpu.dot_dimension_numbers<[1], [0], [0], [1], [0, 0, 1, 1], [], []>} : vector<128x64xbf16>, vector<64x512xbf16>, vector<128x512xf32> -> vector<128x512xf32>
    %6 = arith.addf %2, %5 : vector<128x512xf32>
    %c0_8 = arith.constant 0 : index
    %c0_9 = arith.constant 0 : index
    %7 = vector.load %arg5[%c0_8, %c0_9] : memref<1x512xf32, #tpu.memory_space<vmem>>, vector<1x512xf32>
    %8 = vector.broadcast %7 : vector<1x512xf32> to vector<128x512xf32>
    %9 = arith.addf %6, %8 : vector<128x512xf32>
    %cst_10 = arith.constant 2.000000e+01 : f32
    %10 = vector.broadcast %cst_10 : f32 to vector<128x512xf32>
    %11 = arith.minimumf %9, %10 : vector<128x512xf32>
    %12 = math.exp %11 : vector<128x512xf32>
    %cst_11 = arith.constant 1.000000e+00 : f32
    %13 = vector.broadcast %cst_11 : f32 to vector<128x512xf32>
    %14 = arith.addf %13, %12 : vector<128x512xf32>
    %15 = arith.mulf %14, %14 : vector<128x512xf32>
    %cst_12 = arith.constant 1.000000e+00 : f32
    %16 = vector.broadcast %cst_12 : f32 to vector<128x512xf32>
    %17 = arith.subf %15, %16 : vector<128x512xf32>
    %18 = arith.mulf %9, %17 : vector<128x512xf32>
    %cst_13 = arith.constant 1.000000e+00 : f32
    %19 = vector.broadcast %cst_13 : f32 to vector<128x512xf32>
    %20 = arith.addf %15, %19 : vector<128x512xf32>
    %21 = tpu.reciprocal %20 {approx = true} : vector<128x512xf32> -> vector<128x512xf32>
    %22 = arith.mulf %18, %21 : vector<128x512xf32>
    %cst_14 = arith.constant 2.000000e+01 : f32
    %23 = vector.broadcast %cst_14 : f32 to vector<128x512xf32>
    %24 = arith.cmpf ogt, %9, %23 : vector<128x512xf32>
    %25 = arith.select %24, %9, %22 : vector<128x512xi1>, vector<128x512xf32>
    %26 = arith.truncf %25 : vector<128x512xf32> to vector<128x512xbf16>
    %c0_15 = arith.constant 0 : index
    %c0_16 = arith.constant 0 : index
    %27 = vector.load %arg6[%c0_15, %c0_16] : memref<512x256xbf16, #tpu.memory_space<vmem>>, vector<512x256xbf16>
    %cst_17 = arith.constant dense<0.000000e+00> : vector<128x256xf32>
    %28 = tpu.matmul %26, %27, %cst_17 {dimension_numbers = #tpu.dot_dimension_numbers<[1], [0], [0], [1], [0, 0, 1, 1], [], []>} : vector<128x512xbf16>, vector<512x256xbf16>, vector<128x256xf32> -> vector<128x256xf32>
    %c0_18 = arith.constant 0 : index
    %c0_19 = arith.constant 0 : index
    %29 = vector.load %arg7[%c0_18, %c0_19] : memref<1x256xf32, #tpu.memory_space<vmem>>, vector<1x256xf32>
    %30 = vector.broadcast %29 : vector<1x256xf32> to vector<128x256xf32>
    %31 = arith.addf %28, %30 : vector<128x256xf32>
    %cst_20 = arith.constant 2.000000e+01 : f32
    %32 = vector.broadcast %cst_20 : f32 to vector<128x256xf32>
    %33 = arith.minimumf %31, %32 : vector<128x256xf32>
    %34 = math.exp %33 : vector<128x256xf32>
    %cst_21 = arith.constant 1.000000e+00 : f32
    %35 = vector.broadcast %cst_21 : f32 to vector<128x256xf32>
    %36 = arith.addf %35, %34 : vector<128x256xf32>
    %37 = arith.mulf %36, %36 : vector<128x256xf32>
    %cst_22 = arith.constant 1.000000e+00 : f32
    %38 = vector.broadcast %cst_22 : f32 to vector<128x256xf32>
    %39 = arith.subf %37, %38 : vector<128x256xf32>
    %40 = arith.mulf %31, %39 : vector<128x256xf32>
    %cst_23 = arith.constant 1.000000e+00 : f32
    %41 = vector.broadcast %cst_23 : f32 to vector<128x256xf32>
    %42 = arith.addf %37, %41 : vector<128x256xf32>
    %43 = tpu.reciprocal %42 {approx = true} : vector<128x256xf32> -> vector<128x256xf32>
    %44 = arith.mulf %40, %43 : vector<128x256xf32>
    %cst_24 = arith.constant 2.000000e+01 : f32
    %45 = vector.broadcast %cst_24 : f32 to vector<128x256xf32>
    %46 = arith.cmpf ogt, %31, %45 : vector<128x256xf32>
    %47 = arith.select %46, %31, %44 : vector<128x256xi1>, vector<128x256xf32>
    %48 = arith.truncf %47 : vector<128x256xf32> to vector<128x256xbf16>
    %c0_25 = arith.constant 0 : index
    %c0_26 = arith.constant 0 : index
    %49 = vector.load %arg8[%c0_25, %c0_26] : memref<256x128xbf16, #tpu.memory_space<vmem>>, vector<256x128xbf16>
    %cst_27 = arith.constant dense<0.000000e+00> : vector<128x128xf32>
    %50 = tpu.matmul %48, %49, %cst_27 {dimension_numbers = #tpu.dot_dimension_numbers<[1], [0], [0], [1], [0, 0, 1, 1], [], []>} : vector<128x256xbf16>, vector<256x128xbf16>, vector<128x128xf32> -> vector<128x128xf32>
    %c0_28 = arith.constant 0 : index
    %c0_29 = arith.constant 0 : index
    %51 = vector.load %arg9[%c0_28, %c0_29] : memref<1x128xf32, #tpu.memory_space<vmem>>, vector<1x128xf32>
    %52 = vector.broadcast %51 : vector<1x128xf32> to vector<128x128xf32>
    %53 = arith.addf %50, %52 : vector<128x128xf32>
    %cst_30 = arith.constant 2.000000e+01 : f32
    %54 = vector.broadcast %cst_30 : f32 to vector<128x128xf32>
    %55 = arith.minimumf %53, %54 : vector<128x128xf32>
    %56 = math.exp %55 : vector<128x128xf32>
    %cst_31 = arith.constant 1.000000e+00 : f32
    %57 = vector.broadcast %cst_31 : f32 to vector<128x128xf32>
    %58 = arith.addf %57, %56 : vector<128x128xf32>
    %59 = arith.mulf %58, %58 : vector<128x128xf32>
    %cst_32 = arith.constant 1.000000e+00 : f32
    %60 = vector.broadcast %cst_32 : f32 to vector<128x128xf32>
    %61 = arith.subf %59, %60 : vector<128x128xf32>
    %62 = arith.mulf %53, %61 : vector<128x128xf32>
    %cst_33 = arith.constant 1.000000e+00 : f32
    %63 = vector.broadcast %cst_33 : f32 to vector<128x128xf32>
    %64 = arith.addf %59, %63 : vector<128x128xf32>
    %65 = tpu.reciprocal %64 {approx = true} : vector<128x128xf32> -> vector<128x128xf32>
    %66 = arith.mulf %62, %65 : vector<128x128xf32>
    %cst_34 = arith.constant 2.000000e+01 : f32
    %67 = vector.broadcast %cst_34 : f32 to vector<128x128xf32>
    %68 = arith.cmpf ogt, %53, %67 : vector<128x128xf32>
    %69 = arith.select %68, %53, %66 : vector<128x128xi1>, vector<128x128xf32>
    %70 = arith.truncf %69 : vector<128x128xf32> to vector<128x128xbf16>
    %c0_35 = arith.constant 0 : index
    %c0_36 = arith.constant 0 : index
    %71 = vector.load %arg10[%c0_35, %c0_36] : memref<128x128xbf16, #tpu.memory_space<vmem>>, vector<128x128xbf16>
    %cst_37 = arith.constant dense<0.000000e+00> : vector<128x128xf32>
    %72 = tpu.matmul %70, %71, %cst_37 {dimension_numbers = #tpu.dot_dimension_numbers<[1], [0], [0], [1], [0, 0, 1, 1], [], []>} : vector<128x128xbf16>, vector<128x128xbf16>, vector<128x128xf32> -> vector<128x128xf32>
    %c0_38 = arith.constant 0 : index
    %c0_39 = arith.constant 0 : index
    %73 = vector.load %arg11[%c0_38, %c0_39] : memref<1x128xf32, #tpu.memory_space<vmem>>, vector<1x128xf32>
    %74 = vector.broadcast %73 : vector<1x128xf32> to vector<128x128xf32>
    %75 = arith.addf %72, %74 : vector<128x128xf32>
    %76 = arith.negf %75 : vector<128x128xf32>
    %77 = math.exp %76 : vector<128x128xf32>
    %cst_40 = arith.constant 1.000000e+00 : f32
    %78 = vector.broadcast %cst_40 : f32 to vector<128x128xf32>
    %79 = arith.addf %78, %77 : vector<128x128xf32>
    %80 = arith.divf %78, %79 : vector<128x128xf32>
    %c0_41 = arith.constant 0 : index
    %c0_42 = arith.constant 0 : index
    %81 = vector.load %arg12[%c0_41, %c0_42] : memref<128x128xf32, #tpu.memory_space<vmem>>, vector<128x128xf32>
    tpu.vector_store %arg12[%c0_41, %c0_42], %80 {strides = array<i32>} : memref<128x128xf32, #tpu.memory_space<vmem>>, vector<128x128xf32>,
    return
  }
  func.func @transform_0(%arg0: i32) -> (i32, i32) {
    %c0_i32 = arith.constant 0 : i32
    %c0_i32_0 = arith.constant 0 : i32
    return %arg0, %c0_i32 : i32, i32
  }
  func.func @transform_1(%arg0: i32) -> (i32, i32) {
    %c0_i32 = arith.constant 0 : i32
    %c0_i32_0 = arith.constant 0 : i32
    return %arg0, %c0_i32 : i32, i32
  }
  func.func @transform_2(%arg0: i32) -> (i32, i32) {
    %c0_i32 = arith.constant 0 : i32
    %c0_i32_0 = arith.constant 0 : i32
    %c0_i32_1 = arith.constant 0 : i32
    return %c0_i32, %c0_i32_0 : i32, i32
  }
  func.func @transform_3(%arg0: i32) -> (i32, i32) {
    %c0_i32 = arith.constant 0 : i32
    %c0_i32_0 = arith.constant 0 : i32
    %c0_i32_1 = arith.constant 0 : i32
    return %c0_i32, %c0_i32_0 : i32, i32
  }
  func.func @transform_4(%arg0: i32) -> (i32, i32) {
    %c0_i32 = arith.constant 0 : i32
    %c0_i32_0 = arith.constant 0 : i32
    %c0_i32_1 = arith.constant 0 : i32
    return %c0_i32, %c0_i32_0 : i32, i32
  }
  func.func @transform_5(%arg0: i32) -> (i32, i32) {
    %c0_i32 = arith.constant 0 : i32
    %c0_i32_0 = arith.constant 0 : i32
    %c0_i32_1 = arith.constant 0 : i32
    return %c0_i32, %c0_i32_0 : i32, i32
  }
  func.func @transform_6(%arg0: i32) -> (i32, i32) {
    %c0_i32 = arith.constant 0 : i32
    %c0_i32_0 = arith.constant 0 : i32
    %c0_i32_1 = arith.constant 0 : i32
    return %c0_i32, %c0_i32_0 : i32, i32
  }
  func.func @transform_7(%arg0: i32) -> (i32, i32) {
    %c0_i32 = arith.constant 0 : i32
    %c0_i32_0 = arith.constant 0 : i32
    %c0_i32_1 = arith.constant 0 : i32
    return %c0_i32, %c0_i32_0 : i32, i32
  }
  func.func @transform_8(%arg0: i32) -> (i32, i32) {
    %c0_i32 = arith.constant 0 : i32
    %c0_i32_0 = arith.constant 0 : i32
    %c0_i32_1 = arith.constant 0 : i32
    return %c0_i32, %c0_i32_0 : i32, i32
  }
  func.func @transform_9(%arg0: i32) -> (i32, i32) {
    %c0_i32 = arith.constant 0 : i32
    %c0_i32_0 = arith.constant 0 : i32
    %c0_i32_1 = arith.constant 0 : i32
    return %c0_i32, %c0_i32_0 : i32, i32
  }
  func.func @transform_10(%arg0: i32) -> (i32, i32) {
    %c0_i32 = arith.constant 0 : i32
    %c0_i32_0 = arith.constant 0 : i32
    %c0_i32_1 = arith.constant 0 : i32
    return %c0_i32, %c0_i32_0 : i32, i32
  }
  func.func @transform_11(%arg0: i32) -> (i32, i32) {
    %c0_i32 = arith.constant 0 : i32
    %c0_i32_0 = arith.constant 0 : i32
    return %arg0, %c0_i32 : i32, i32
  }
}

</mosaic_0001>

<bundles_post_ra>
// kernel: classifier_forward.1
= control target key start
LH: loop header
LB: loop body
LE: loop exit
PB: predicated region body
PF: predicated region fallthrough
CT: control target
= control target key end

     0   :  { %v4583_v1 = vmov 0   ;;  %vm223_vm0 = vcmask 523264   ;;  %s6928_s3 = inlined_call_operand.vmem [shape: bf16[64,512], index: 3, kind: input, shape index: {}]   ;;  %s6929_s1 = inlined_call_operand.vmem [shape: bf16[128,64], index: 1, kind: input, shape index: {}]   ;;  %s6930_s2 = inlined_call_operand.vmem [shape: bf16[64,512], index: 2, kind: input, shape index: {}]   ;;  %s6931_s0 = inlined_call_operand.vmem [shape: bf16[128,64], index: 0, kind: input, shape index: {}]   ;;  %s6932_s5 = inlined_call_operand.vmem [shape: bf16[512,256], index: 5, kind: input, shape index: {}]   ;;  %s6933_s4 = inlined_call_operand.vmem [shape: f32[1,512], index: 4, kind: input, shape index: {}]   ;;  %s6934_s7 = inlined_call_operand.vmem [shape: bf16[256,128], index: 7, kind: input, shape index: {}]   ;;  %s6935_s6 = inlined_call_operand.vmem [shape: f32[1,256], index: 6, kind: input, shape index: {}]   ;;  %s6936_s9 = inlined_call_operand.vmem [shape: bf16[128,128], index: 9, kind: input, shape index: {}]   ;;  %s6937_s8 = inlined_call_operand.vmem [shape: f32[1,128], index: 8, kind: input, shape index: {}]   ;;  %s6938_s10 = inlined_call_operand.vmem [shape: f32[1,128], index: 10, kind: input, shape index: {}]   ;;  %s6939_s11 = inlined_call_operand.vmem [shape: f32[128,128], index: 11, kind: output, shape index: {}]  }
   0x1   :  { %v3887_v0 = vld [vmem:[%s6928_s3 + $0x64] ss:$16 sps:$4 sm:$0xff]   ;;  %280 = vmatprep.mubr.bf16.mxu0 %v4583_v1  ;;  %340 = vmatprep.mubr.bf16.mxu1 %v4583_v1  ;;  %v3889_v2 = vld [vmem:[%s6928_s3 + $0x60] ss:$16 sps:$4 sm:$0xff]   ;;  %v3903_v9 = vld [vmem:[%s6928_s3 + $0x6c] ss:$16 sps:$4 sm:$0xff]  }
   0x2   :  { %256 = vmatprep.subr.bf16.mxu0 %v3887_v0  ;;  %3878 = vmatprep.subr.bf16.mxu1 %v3887_v0  ;;  %v3890_v3 = vld [vmem:[%s6928_s3 + $0x44] ss:$16 sps:$4 sm:$0xff]   ;;  %v3892_v4 = vld [vmem:[%s6928_s3 + $0x40] ss:$16 sps:$4 sm:$0xff]   ;;  %v3901_v12 = vld [vmem:[%s6928_s3 + $0x68] ss:$16 sps:$4 sm:$0xff]  }
   0x3   :  { %257 = vmatpush1.bf16.msra.mxu0 %v3889_v2  ;;  %3882 = vmatpush1.bf16.msra.mxu1 %v3889_v2  ;;  %v3893_v5 = vld [vmem:[%s6928_s3 + $0x24] ss:$16 sps:$4 sm:$0xff]   ;;  %v3895_v6 = vld [vmem:[%s6928_s3 + $0x20] ss:$16 sps:$4 sm:$0xff]   ;;  %v3906_v13 = vld [vmem:[%s6928_s3 + $0x4c] ss:$16 sps:$4 sm:$0xff]  }
   0x4   :  { %258 = vmatprep.subr.bf16.mxu0 %v3890_v3  ;;  %3879 = vmatprep.subr.bf16.mxu1 %v3890_v3  ;;  %v3896_v7 = vld [vmem:[%s6928_s3 + $0x4] ss:$16 sps:$4 sm:$0xff]   ;;  %v3898_v8 = vld [vmem:[%s6928_s3] ss:$16 sps:$4 sm:$0xff]   ;;  %v3904_v14 = vld [vmem:[%s6928_s3 + $0x48] ss:$16 sps:$4 sm:$0xff]  }
   0x5   :  { %v3899_v10 = vld [vmem:[%s6929_s1] sm:$0xff]   ;;  %v4679_v11 = vld [vmem:[%s6929_s1 + $0x30] sm:$0xff]   ;;  %v3911_v17 = vld [vmem:[%s6928_s3 + $0x2c] ss:$16 sps:$4 sm:$0xff]  }
   0x6   :  { %v3920_v15 = vld [vmem:[%s6930_s2 + $0x60] ss:$16 sps:$4 sm:$0xff]   ;;  %v3922_v16 = vld [vmem:[%s6930_s2 + $0x64] ss:$16 sps:$4 sm:$0xff]   ;;  %v3907_v18 = vld [vmem:[%s6929_s1 + $0x8] sm:$0xff]  }
   0x7   :  { %259 = vmatpush1.bf16.msra.mxu0 %v3892_v4  ;;  %3883 = vmatpush1.bf16.msra.mxu1 %v3892_v4  ;;  %v4710_v19 = vld [vmem:[%s6929_s1 + $0x38] sm:$0xff]   ;;  %v3929_v20 = vld [vmem:[%s6930_s2 + $0x44] ss:$16 sps:$4 sm:$0xff]   ;;  %v3927_v23 = vld [vmem:[%s6930_s2 + $0x40] ss:$16 sps:$4 sm:$0xff]  }
   0x8   :  { %260 = vmatprep.subr.bf16.mxu0 %v3893_v5  ;;  %3880 = vmatprep.subr.bf16.mxu1 %v3893_v5  ;;  %v3909_v21 = vld [vmem:[%s6928_s3 + $0x28] ss:$16 sps:$4 sm:$0xff]   ;;  %v3914_v22 = vld [vmem:[%s6928_s3 + $0xc] ss:$16 sps:$4 sm:$0xff]   ;;  %v3933_v24 = vld [vmem:[%s6930_s2 + $0x24] ss:$16 sps:$4 sm:$0xff]  }
   0x9   :  { %v3912_v25 = vld [vmem:[%s6928_s3 + $0x8] ss:$16 sps:$4 sm:$0xff]   ;;  %v3918_v26 = vld [vmem:[%s6930_s2 + $0x6c] ss:$16 sps:$4 sm:$0xff]   ;;  %v3931_v27 = vld [vmem:[%s6930_s2 + $0x20] ss:$16 sps:$4 sm:$0xff]  }
   0xa   :  { %v3915_v28 = vld [vmem:[%s6929_s1 + $0x10] sm:$0xff]   ;;  %v3916_v29 = vld [vmem:[%s6930_s2 + $0x68] ss:$16 sps:$4 sm:$0xff]   ;;  %v3926_v30 = vld [vmem:[%s6930_s2 + $0x4c] ss:$16 sps:$4 sm:$0xff]  }
   0xb   :  { %261 = vmatpush1.bf16.msra.mxu0 %v3895_v6  ;;  %3884 = vmatpush1.bf16.msra.mxu1 %v3895_v6  ;;  %v3936_v31 = vld [vmem:[%s6930_s2 + $0x4] ss:$16 sps:$4 sm:$0xff]   ;;  %v3934_v32 = vld [vmem:[%s6930_s2] ss:$16 sps:$4 sm:$0xff]   ;;  %v3924_v33 = vld [vmem:[%s6930_s2 + $0x48] ss:$16 sps:$4 sm:$0xff]  }
   0xc   :  { %262 = vmatprep.subr.bf16.mxu0 %v3896_v7  ;;  %3881 = vmatprep.subr.bf16.mxu1 %v3896_v7  ;;  %v3940_v34 = vld [vmem:[%s6930_s2 + $0x2c] ss:$16 sps:$4 sm:$0xff]   ;;  %v3938_v36 = vld [vmem:[%s6930_s2 + $0x28] ss:$16 sps:$4 sm:$0xff]   ;;  %v3923_v39 = vld [vmem:[%s6929_s1 + $0x20] sm:$0xff]  }
   0xd   :  { %v3919_v35 = vld [vmem:[%s6929_s1 + $0x18] sm:$0xff]   ;;  %v3930_v40 = vld [vmem:[%s6929_s1 + $0x28] sm:$0xff]   ;;  %v3937_v41 = vld [vmem:[%s6931_s0] sm:$0xff]  }
   0xe   :  { %v3945_v37 = vld [vmem:[%s6930_s2 + $0xc] ss:$16 sps:$4 sm:$0xff]   ;;  %v3943_v38 = vld [vmem:[%s6930_s2 + $0x8] ss:$16 sps:$4 sm:$0xff]   ;;  %v3942_v43 = vld [vmem:[%s6931_s0 + $0x10] sm:$0xff]  }
   0xf   :  { %263 = vmatpush1.bf16.msra.mxu0 %v3898_v8  ;;  %3885 = vmatpush1.bf16.msra.mxu1 %v3898_v8  ;;  %v3941_v42 = vld [vmem:[%s6931_s0 + $0x8] sm:$0xff]   ;;  %v3946_v44 = vld [vmem:[%s6931_s0 + $0x18] sm:$0xff]   ;;  %v3947_v45 = vld [vmem:[%s6931_s0 + $0x20] sm:$0xff]  }
  0x10   :  { %369 = vmatprep.subr.bf16.mxu1 %v3903_v9  ;;  %626 = vmatprep.subr.bf16.mxu0 %v3922_v16  ;;  %v3948_v46 = vld [vmem:[%s6931_s0 + $0x28] sm:$0xff]   ;;  %v3949_v47 = vld [vmem:[%s6931_s0 + $0x30] sm:$0xff]   ;;  %v3950_v48 = vld [vmem:[%s6931_s0 + $0x38] sm:$0xff]   ;;  %v846_v9 = vlaneseq }
  0x11   :  { %v3953_v49 = vld [vmem:[%s6932_s5 + $0x74] ss:$8 sps:$4 sm:$0xff]   ;;  %v3951_v50 = vld [vmem:[%s6932_s5 + $0x70] ss:$8 sps:$4 sm:$0xff]   ;;  %v3956_v51 = vld [vmem:[%s6932_s5 + $0x64] ss:$8 sps:$4 sm:$0xff]  }
  0x12   :  { %3492 = vmatmul.mubr.msk.bf16.vlgmr.msra.gmra.mxu0 %vm223_vm0, %v3899_v10  ;;  %3498 = vmatmul.mubr.msk.bf16.vlgmr.msra.gmra.mxu1 %vm223_vm0, %v4679_v11  ;;  %v3954_v52 = vld [vmem:[%s6932_s5 + $0x60] ss:$8 sps:$4 sm:$0xff]   ;;  %v3959_v53 = vld [vmem:[%s6932_s5 + $0x54] ss:$8 sps:$4 sm:$0xff]   ;;  %v3957_v54 = vld [vmem:[%s6932_s5 + $0x50] ss:$8 sps:$4 sm:$0xff]  }
  0x13   :  { %370 = vmatpush1.bf16.msra.mxu1 %v3901_v12  ;;  %290 = vmatprep.mubr.bf16.mxu0 %v4583_v1  ;;  %v3962_v55 = vld [vmem:[%s6932_s5 + $0x44] ss:$8 sps:$4 sm:$0xff]   ;;  %v3960_v56 = vld [vmem:[%s6932_s5 + $0x40] ss:$8 sps:$4 sm:$0xff]   ;;  %v3965_v57 = vld [vmem:[%s6932_s5 + $0x34] ss:$8 sps:$4 sm:$0xff]  }
  0x14   :  { %371 = vmatprep.subr.bf16.mxu1 %v3906_v13  ;;  %350 = vmatprep.mubr.bf16.mxu1 %v4583_v1  ;;  %v3963_v58 = vld [vmem:[%s6932_s5 + $0x30] ss:$8 sps:$4 sm:$0xff]   ;;  %v3968_v59 = vld [vmem:[%s6932_s5 + $0x24] ss:$8 sps:$4 sm:$0xff]   ;;  %v3966_v60 = vld [vmem:[%s6932_s5 + $0x20] ss:$8 sps:$4 sm:$0xff]  }
  0x15   :  { %627 = vmatpush1.bf16.msra.mxu0 %v3920_v15  ;;  %v3971_v61 = vld [vmem:[%s6932_s5 + $0x14] ss:$8 sps:$4 sm:$0xff]   ;;  %v3969_v62 = vld [vmem:[%s6932_s5 + $0x10] ss:$8 sps:$4 sm:$0xff]   ;;  %v3974_v63 = vld [vmem:[%s6932_s5 + $0x4] ss:$8 sps:$4 sm:$0xff]  }
  0x16   :  { %628 = vmatprep.subr.bf16.mxu0 %v3929_v20  ;;  %v3972_v0 = vld [vmem:[%s6932_s5] ss:$8 sps:$4 sm:$0xff]   ;;  %v3977_v2 = vld [vmem:[%s6932_s5 + $0xf4] ss:$8 sps:$4 sm:$0xff]   ;;  %v3975_v3 = vld [vmem:[%s6932_s5 + $0xf0] ss:$8 sps:$4 sm:$0xff]  }
  0x17   :  { %372 = vmatpush1.bf16.msra.mxu1 %v3904_v14  ;;  %v3978_v4 = vld [vmem:[%s6932_s5 + $0x170] ss:$8 sps:$4 sm:$0xff]   ;;  %v3983_v5 = vld [vmem:[%s6932_s5 + $0xe4] ss:$8 sps:$4 sm:$0xff]   ;;  %v3981_v7 = vld [vmem:[%s6932_s5 + $0xe0] ss:$8 sps:$4 sm:$0xff]  }
  0x18   :  { %373 = vmatprep.subr.bf16.mxu1 %v3911_v17  ;;  %v3986_v6 = vld [vmem:[%s6932_s5 + $0x164] ss:$8 sps:$4 sm:$0xff]   ;;  %v3984_v8 = vld [vmem:[%s6932_s5 + $0x160] ss:$8 sps:$4 sm:$0xff]   ;;  %v3987_v12 = vld [vmem:[%s6932_s5 + $0xd0] ss:$8 sps:$4 sm:$0xff]  }
  0x19   :  { %629 = vmatpush1.bf16.msra.mxu0 %v3927_v23  ;;  %v3990_v13 = vld [vmem:[%s6932_s5 + $0x150] ss:$8 sps:$4 sm:$0xff]   ;;  %v4944_v14 = vshrl.u32 %v846_v9, 7  ;;  %v4950_v16 = vld [vmem:[%s6933_s4] sm:$0xf] }
  0x1a   :  { %3493 = vmatmul.mubr.msk.bf16.gmra.mxu0 %vm223_vm0, %v3907_v18  ;;  %3499 = vmatmul.mubr.msk.bf16.gmra.mxu1 %vm223_vm0, %v4710_v19  ;;  %v3998_v20 = vld [vmem:[%s6932_s5 + $0x144] ss:$8 sps:$4 sm:$0xff]  }
  0x1b   :  { %374 = vmatpush1.bf16.msra.mxu1 %v3909_v21  ;;  %300 = vmatprep.mubr.bf16.mxu0 %v4583_v1  ;;  %7050 = vst [vmem:[#allocation2_spill] sm:$0xff] %v4944_v14  ;;  %v856_v15 = vsub.s32 2, %v4944_v14  ;;  %v3993_v21 = vld [vmem:[%s6932_s5 + $0xc0] ss:$8 sps:$4 sm:$0xff]  }
  0x1c   :  { %375 = vmatprep.subr.bf16.mxu1 %v3914_v22  ;;  %393 = vmatprep.mubr.bf16.mxu1 %v4583_v1  ;;  %v3996_v22 = vld [vmem:[%s6932_s5 + $0x140] ss:$8 sps:$4 sm:$0xff]  }
  0x1d   :  { %630 = vmatprep.subr.bf16.mxu0 %v3933_v24  ;;  %v4953_v17 = vrot.slane %v4950_v16, %v856_v15  ;;  %v4001_v24 = vld [vmem:[%s6932_s5 + $0xb4] ss:$8 sps:$4 sm:$0xff]  }
  0x1e   :  { %631 = vmatpush1.bf16.msra.mxu0 %v3931_v27  ;;  %v4002_v27 = vld [vmem:[%s6932_s5 + $0x130] ss:$8 sps:$4 sm:$0xff]  }
  0x1f   :  { %376 = vmatpush1.bf16.msra.mxu1 %v3912_v25  ;;  %632 = vmatprep.subr.bf16.mxu0 %v3936_v31  ;;  %v4004_v25 = vld [vmem:[%s6932_s5 + $0x134] ss:$8 sps:$4 sm:$0xff]   ;;  %v4008_v31 = vld [vmem:[%s6932_s5 + $0x120] ss:$8 sps:$4 sm:$0xff]  }
  0x20   :  { %739 = vmatprep.subr.bf16.mxu1 %v3918_v26  ;;  %v3999_v26 = vld [vmem:[%s6932_s5 + $0xb0] ss:$8 sps:$4 sm:$0xff]  }
  0x22   :  { %3494 = vmatmul.mubr.msk.bf16.gmra.mxu0 %vm223_vm0, %v3915_v28  ;;  %3500 = vmatmul.mubr.msk.bf16.vlgmr.msra.gmra.mxu1 %vm223_vm0, %v3899_v10  ;;  %v3989_v10 = vld [vmem:[%s6932_s5 + $0xd4] ss:$8 sps:$4 sm:$0xff]  }
  0x23   :  { %740 = vmatpush1.bf16.msra.mxu1 %v3916_v29  ;;  %310 = vmatprep.mubr.bf16.mxu0 %v4583_v1  ;;  %v4010_v29 = vld [vmem:[%s6932_s5 + $0x124] ss:$8 sps:$4 sm:$0xff]  }
  0x24   :  { %403 = vmatprep.mubr.bf16.mxu1 %v4583_v1  ;;  %741 = vmatprep.subr.bf16.mxu1 %v3926_v30  ;;  %v4005_v30 = vld [vmem:[%s6932_s5 + $0xa0] ss:$8 sps:$4 sm:$0xff]  }
  0x25   :  { %633 = vmatpush1.bf16.msra.mxu0 %v3934_v32 }
  0x26   :  { %2126 = vmatprep.subr.bf16.mxu0 %v3953_v49 }
  0x27   :  { %742 = vmatpush1.bf16.msra.mxu1 %v3924_v33 }
  0x28   :  { %743 = vmatprep.subr.bf16.mxu1 %v3940_v34 }
  0x2a   :  { %3495 = vmatmul.mubr.msk.bf16.gmra.mxu0 %vm223_vm0, %v3919_v35  ;;  %3501 = vmatmul.mubr.msk.bf16.gmra.mxu1 %vm223_vm0, %v3907_v18  ;;  %v860_v18 = vsub.s32 3, %v4944_v14 }
  0x2b   :  { %320 = vmatprep.mubr.bf16.mxu0 %v4583_v1  ;;  %413 = vmatprep.mubr.bf16.mxu1 %v4583_v1 }
  0x2c   :  { %744 = vmatpush1.bf16.msra.mxu1 %v3938_v36  ;;  %v4969_v23 = vrot.slane %v4950_v16, %v860_v18  ;;  %v4023_v18 = vld [vmem:[%s6932_s5 + $0x1f0] ss:$8 sps:$4 sm:$0xff]  }
  0x2d   :  { %745 = vmatprep.subr.bf16.mxu1 %v3945_v37 }
  0x30   :  { %746 = vmatpush1.bf16.msra.mxu1 %v3943_v38 }
  0x32   :  { %3496 = vmatmul.mubr.msk.bf16.gmra.mxu0 %vm223_vm0, %v3923_v39  ;;  %3502 = vmatmul.mubr.msk.bf16.gmra.mxu1 %vm223_vm0, %v3915_v28  ;;  %v4007_v28 = vld [vmem:[%s6932_s5 + $0xa4] ss:$8 sps:$4 sm:$0xff]  }
  0x33   :  { %330 = vmatprep.mubr.bf16.mxu0 %v4583_v1  ;;  %423 = vmatprep.mubr.bf16.mxu1 %v4583_v1 }
  0x3a   :  { %3497 = vmatmul.mubr.msk.bf16.gmra.mxu0 %vm223_vm0, %v3930_v40  ;;  %3503 = vmatmul.mubr.msk.bf16.gmra.mxu1 %vm223_vm0, %v3919_v35 }
  0x3b   :  { %433 = vmatprep.mubr.bf16.mxu1 %v4583_v1  ;;  %650 = vmatprep.mubr.bf16.mxu0 %v4583_v1 }
  0x42   :  { %3504 = vmatmul.mubr.msk.bf16.gmra.mxu1 %vm223_vm0, %v3923_v39  ;;  %3532 = vmatmul.mubr.msk.bf16.vlgmr.msra.gmra.mxu0 %vm223_vm0, %v3937_v41 }
  0x43   :  { %443 = vmatprep.mubr.bf16.mxu1 %v4583_v1  ;;  %660 = vmatprep.mubr.bf16.mxu0 %v4583_v1 }
  0x44   :  { %2127 = vmatpush1.bf16.msra.mxu0 %v3951_v50 }
  0x45   :  { %2128 = vmatprep.subr.bf16.mxu0 %v3956_v51 }
  0x48   :  { %2129 = vmatpush1.bf16.msra.mxu0 %v3954_v52 }
  0x49   :  { %2130 = vmatprep.subr.bf16.mxu0 %v3959_v53 }
  0x4a   :  { %3505 = vmatmul.mubr.msk.bf16.gmra.mxu1 %vm223_vm0, %v3930_v40  ;;  %3533 = vmatmul.mubr.msk.bf16.gmra.mxu0 %vm223_vm0, %v3941_v42 }
  0x4b   :  { %453 = vmatprep.mubr.bf16.mxu1 %v4583_v1  ;;  %670 = vmatprep.mubr.bf16.mxu0 %v4583_v1 }
  0x4c   :  { %2131 = vmatpush1.bf16.msra.mxu0 %v3957_v54 }
  0x4d   :  { %2132 = vmatprep.subr.bf16.mxu0 %v3962_v55 }
  0x50   :  { %2133 = vmatpush1.bf16.msra.mxu0 %v3960_v56  ;;  %v4019_v56 = vld [vmem:[%s6932_s5 + $0x84] ss:$8 sps:$4 sm:$0xff]  }
  0x51   :  { %2134 = vmatprep.subr.bf16.mxu0 %v3965_v57  ;;  %v4022_v57 = vld [vmem:[%s6932_s5 + $0x104] ss:$8 sps:$4 sm:$0xff]  }
  0x52   :  { %3506 = vmatmul.mubr.msk.bf16.gmra.mxu1 %vm223_vm0, %v4679_v11  ;;  %3534 = vmatmul.mubr.msk.bf16.gmra.mxu0 %vm223_vm0, %v3942_v43  ;;  %v3992_v11 = vld [vmem:[%s6932_s5 + $0x154] ss:$8 sps:$4 sm:$0xff]  }
  0x53   :  { %463 = vmatprep.mubr.bf16.mxu1 %v4583_v1  ;;  %680 = vmatprep.mubr.bf16.mxu0 %v4583_v1 }
  0x54   :  { %2135 = vmatpush1.bf16.msra.mxu0 %v3963_v58 }
  0x55   :  { %2136 = vmatprep.subr.bf16.mxu0 %v3968_v59 }
  0x58   :  { %2137 = vmatpush1.bf16.msra.mxu0 %v3966_v60  ;;  %v4017_v60 = vld [vmem:[%s6932_s5 + $0x80] ss:$8 sps:$4 sm:$0xff]  }
  0x59   :  { %2138 = vmatprep.subr.bf16.mxu0 %v3971_v61  ;;  %v4020_v61 = vld [vmem:[%s6932_s5 + $0x100] ss:$8 sps:$4 sm:$0xff]  }
  0x5a   :  { %3507 = vmatmul.mubr.msk.bf16.gmra.mxu1 %vm223_vm0, %v4710_v19  ;;  %3535 = vmatmul.mubr.msk.bf16.gmra.mxu0 %vm223_vm0, %v3946_v44  ;;  %v3995_v19 = vld [vmem:[%s6932_s5 + $0xc4] ss:$8 sps:$4 sm:$0xff]  }
  0x5b   :  { %690 = vmatprep.mubr.bf16.mxu0 %v4583_v1  ;;  %763 = vmatprep.mubr.bf16.mxu1 %v4583_v1 }
  0x5c   :  { %2139 = vmatpush1.bf16.msra.mxu0 %v3969_v62 }
  0x5d   :  { %2140 = vmatprep.subr.bf16.mxu0 %v3974_v63 }
  0x60   :  { %2141 = vmatpush1.bf16.msra.mxu0 %v3972_v0 }
  0x61   :  { %2142 = vmatprep.subr.bf16.mxu0 %v3977_v2 }
  0x62   :  { %3536 = vmatmul.mubr.msk.bf16.gmra.mxu0 %vm223_vm0, %v3947_v45  ;;  %3540 = vmatmul.mubr.msk.bf16.vlgmr.msra.gmra.mxu1 %vm223_vm0, %v3937_v41 }
  0x63   :  { %700 = vmatprep.mubr.bf16.mxu0 %v4583_v1  ;;  %773 = vmatprep.mubr.bf16.mxu1 %v4583_v1 }
  0x64   :  { %2143 = vmatpush2.bf16.msra.mxu0 %v3975_v3 }
  0x65   :  { %2144 = vmatprep.subr.bf16.mxu0 %v3983_v5 }
  0x68   :  { %2145 = vmatpush2.bf16.msra.mxu0 %v3981_v7 }
  0x69   :  { %2146 = vmatprep.subr.bf16.mxu0 %v3989_v10 }
  0x6a   :  { %3537 = vmatmul.mubr.msk.bf16.gmra.mxu0 %vm223_vm0, %v3948_v46  ;;  %3541 = vmatmul.mubr.msk.bf16.gmra.mxu1 %vm223_vm0, %v3941_v42  ;;  %v4013_v42 = vld [vmem:[%s6932_s5 + $0x94] ss:$8 sps:$4 sm:$0xff]  }
  0x6b   :  { %710 = vmatprep.mubr.bf16.mxu0 %v4583_v1  ;;  %783 = vmatprep.mubr.bf16.mxu1 %v4583_v1 }
  0x6c   :  { %2147 = vmatpush2.bf16.msra.mxu0 %v3987_v12  ;;  %v4025_v12 = vld [vmem:[%s6932_s5 + $0x1f4] ss:$8 sps:$4 sm:$0xff]  }
  0x6d   :  { %2148 = vmatprep.subr.bf16.mxu0 %v3995_v19 }
  0x70   :  { %2149 = vmatpush2.bf16.msra.mxu0 %v3993_v21  ;;  %v4028_v21 = vld [vmem:[%s6932_s5 + $0x1e4] ss:$8 sps:$4 sm:$0xff]  }
  0x71   :  { %2150 = vmatprep.subr.bf16.mxu0 %v4001_v24 }
  0x72   :  { %3538 = vmatmul.mubr.msk.bf16.gmra.mxu0 %vm223_vm0, %v3949_v47  ;;  %3542 = vmatmul.mubr.msk.bf16.gmra.mxu1 %vm223_vm0, %v3942_v43  ;;  %v4016_v43 = vld [vmem:[%s6932_s5 + $0x114] ss:$8 sps:$4 sm:$0xff]  }
  0x73   :  { %720 = vmatprep.mubr.bf16.mxu0 %v4583_v1  ;;  %793 = vmatprep.mubr.bf16.mxu1 %v4583_v1 }
  0x74   :  { %2151 = vmatpush2.bf16.msra.mxu0 %v3999_v26 }
  0x75   :  { %2152 = vmatprep.subr.bf16.mxu0 %v4007_v28  ;;  %v6940_v28 = vsub.s32 0, %v4944_v14 }
  0x78   :  { %2153 = vmatpush2.bf16.msra.mxu0 %v4005_v30 }
  0x79   :  { %2154 = vmatprep.subr.bf16.mxu0 %v4013_v42 }
  0x7a   :  { %3539 = vmatmul.mubr.msk.bf16.gmra.mxu0 %vm223_vm0, %v3950_v48  ;;  %3543 = vmatmul.mubr.msk.bf16.gmra.mxu1 %vm223_vm0, %v3946_v44  ;;  %v4011_v44 = vld [vmem:[%s6932_s5 + $0x90] ss:$8 sps:$4 sm:$0xff]  }
  0x7b   :  { %803 = vmatprep.mubr.bf16.mxu1 %v4583_v1 }
  0x7c   :  { %2155 = vmatpush2.bf16.msra.mxu0 %v4011_v44  ;;  %v5132_v44 = vrot.slane %v4950_v16, %v6940_v28 }
  0x7d   :  { %2156 = vmatprep.subr.bf16.mxu0 %v4019_v56 }
  0x80   :  { %2157 = vmatpush2.bf16.msra.mxu0 %v4017_v60 }
  0x82   :  { %3544 = vmatmul.mubr.msk.bf16.gmra.mxu1 %vm223_vm0, %v3947_v45  ;;  %v4014_v45 = vld [vmem:[%s6932_s5 + $0x110] ss:$8 sps:$4 sm:$0xff]  }
  0x83   :  { %813 = vmatprep.mubr.bf16.mxu1 %v4583_v1 }
  0x8a   :  { %3545 = vmatmul.mubr.msk.bf16.gmra.mxu1 %vm223_vm0, %v3948_v46 }
  0x8b   :  { %823 = vmatprep.mubr.bf16.mxu1 %v4583_v1 }
  0x92   :  { %3546 = vmatmul.mubr.msk.bf16.gmra.mxu1 %vm223_vm0, %v3949_v47 }
  0x93   :  { %833 = vmatprep.mubr.bf16.mxu1 %v4583_v1  ;;  %v3980_v1 = vld [vmem:[%s6932_s5 + $0x174] ss:$8 sps:$4 sm:$0xff]  }
  0x94   :  { %2239 = vmatprep.subr.bf16.mxu1 %v3980_v1 }
  0x95   :  { %2240 = vmatpush1.bf16.msra.mxu1 %v3978_v4 }
  0x96   :  { %2241 = vmatprep.subr.bf16.mxu1 %v3986_v6 }
  0x99   :  { %2242 = vmatpush1.bf16.msra.mxu1 %v3984_v8 }
  0x9a   :  { %3547 = vmatmul.mubr.msk.bf16.gmra.mxu1 %vm223_vm0, %v3950_v48  ;;  %2243 = vmatprep.subr.bf16.mxu1 %v3992_v11 }
  0x9d   :  { %2244 = vmatpush1.bf16.msra.mxu1 %v3990_v13 }
  0x9e   :  { %2245 = vmatprep.subr.bf16.mxu1 %v3998_v20 }
  0xa1   :  { %2246 = vmatpush1.bf16.msra.mxu1 %v3996_v22 }
  0xa2   :  { %2247 = vmatprep.subr.bf16.mxu1 %v4004_v25  ;;  %v4026_v25 = vld [vmem:[%s6932_s5 + $0x1e0] ss:$8 sps:$4 sm:$0xff]  }
  0xa5   :  { %2248 = vmatpush1.bf16.msra.mxu1 %v4002_v27 }
  0xa6   :  { %2249 = vmatprep.subr.bf16.mxu1 %v4010_v29 }
  0xa9   :  { %2250 = vmatpush1.bf16.msra.mxu1 %v4008_v31  ;;  %v6941_v31 = vsub.s32 1, %v4944_v14 }
  0xaa   :  { %2251 = vmatprep.subr.bf16.mxu1 %v4016_v43 }
  0xab   :  { %v5140_v60 = vrot.slane %v4950_v16, %v6941_v31 }
  0xad   :  { %2252 = vmatpush1.bf16.msra.mxu1 %v4014_v45 }
  0xae   :  { %2253 = vmatprep.subr.bf16.mxu1 %v4022_v57 }
  0xb1   :  { %2254 = vmatpush1.bf16.msra.mxu1 %v4020_v61 }
  0xb2   :  { %2255 = vmatprep.subr.bf16.mxu1 %v4025_v12 }
  0xb5   :  { %2256 = vmatpush2.bf16.msra.mxu1 %v4023_v18 }
  0xb6   :  { %2257 = vmatprep.subr.bf16.mxu1 %v4028_v21 }
  0xb9   :  { %2258 = vmatpush2.bf16.msra.mxu1 %v4026_v25 }
  0xd2   :  { %v4995_v32 = vpop.f32.mrf.mxu0  ;;  %v4997_v33 = vpop.f32.mrf.mxu1 }
  0xd4   :  { %v4999_v34 = vpop.f32.mrf.mxu0  ;;  %v5001_v35 = vpop.f32.mrf.mxu1 }
  0xd5   :  { %7051 = vst [vmem:[#allocation3_spill] sm:$0xff] %v5001_v35 }
  0xd6   :  { %v5003_v36 = vpop.f32.mrf.mxu0  ;;  %v5005_v37 = vpop.f32.mrf.mxu1 }
  0xd7   :  { %7052 = vst [vmem:[#allocation4_spill] sm:$0xff] %v5005_v37 }
  0xd8   :  { %v5007_v38 = vpop.f32.mrf.mxu0  ;;  %v5009_v39 = vpop.f32.mrf.mxu1 }
  0xd9   :  { %7053 = vst [vmem:[#allocation5_spill] sm:$0xff] %v5009_v39 }
  0xda   :  { %v5011_v40 = vpop.f32.mrf.mxu0  ;;  %v5013_v41 = vpop.f32.mrf.mxu1 }
  0xdb   :  { %7054 = vst [vmem:[#allocation6_spill] sm:$0xff] %v5013_v41 }
  0xdc   :  { %v5027_v46 = vpop.f32.mrf.mxu0  ;;  %v5029_v47 = vpop.f32.mrf.mxu1 }
  0xdd   :  { %7055 = vst [vmem:[#allocation7_spill] sm:$0xff] %v5029_v47  ;;  %v4034_v47 = vld [vmem:[%s6932_s5 + $0x1c4] ss:$8 sps:$4 sm:$0xff]  }
  0xde   :  { %v5031_v48 = vpop.f32.mrf.mxu0  ;;  %v5033_v49 = vpop.f32.mrf.mxu1 }
  0xdf   :  { %7056 = vst [vmem:[#allocation8_spill] sm:$0xff] %v5033_v49 }
  0xe0   :  { %v5035_v50 = vpop.f32.mrf.mxu0  ;;  %v5037_v51 = vpop.f32.mrf.mxu1 }
  0xe1   :  { %7057 = vst [vmem:[#allocation9_spill] sm:$0xff] %v5037_v51 }
  0xe2   :  { %v5039_v52 = vpop.f32.mrf.mxu0  ;;  %v5041_v53 = vpop.f32.mrf.mxu1 }
  0xe4   :  { %v5043_v54 = vpop.f32.mrf.mxu0  ;;  %v5045_v55 = vpop.f32.mrf.mxu1 }
  0xe6   :  { %v5053_v58 = vpop.f32.mrf.mxu0  ;;  %v5055_v59 = vpop.f32.mrf.mxu1 }
  0xe8   :  { %v5063_v62 = vpop.f32.mrf.mxu0  ;;  %v5065_v63 = vpop.f32.mrf.mxu1 }
  0xea   :  { %v5067_v0 = vpop.f32.mrf.mxu0  ;;  %v5069_v2 = vpop.f32.mrf.mxu1 }
  0xec   :  { %v5071_v1 = vpop.f32.mrf.mxu0  ;;  %v5073_v3 = vpop.f32.mrf.mxu1 }
  0xee   :  { %v5075_v4 = vpop.f32.mrf.mxu0  ;;  %v5077_v5 = vpop.f32.mrf.mxu1 }
  0xf0   :  { %v5079_v6 = vpop.f32.mrf.mxu0  ;;  %v5081_v7 = vpop.f32.mrf.mxu1 }
  0xf2   :  { %v5083_v8 = vpop.f32.mrf.mxu0  ;;  %v5085_v9 = vpop.f32.mrf.mxu1 }
  0xf3   :  { %7058 = vst [vmem:[#allocation10_spill] sm:$0xff] %v5085_v9 }
  0xf4   :  { %v5087_v10 = vpop.f32.mrf.mxu0  ;;  %v5089_v11 = vpop.f32.mrf.mxu1 }
  0xf5   :  { %7059 = vst [vmem:[#allocation11_spill] sm:$0xff] %v5089_v11 }
  0xf6   :  { %v5094_v13 = vpop.f32.mrf.mxu0  ;;  %v5096_v15 = vpop.f32.mrf.mxu1 }
  0xf7   :  { %7060 = vst [vmem:[#allocation12_spill] sm:$0xff] %v5096_v15 }
  0xf8   :  { %v5101_v19 = vpop.f32.mrf.mxu0  ;;  %v5103_v20 = vpop.f32.mrf.mxu1 }
  0xf9   :  { %7061 = vst [vmem:[#allocation13_spill] sm:$0xff] %v5103_v20 }
  0xfa   :  { %v5108_v22 = vpop.f32.mrf.mxu0  ;;  %v5110_v24 = vpop.f32.mrf.mxu1 }
  0xfb   :  { %7062 = vst [vmem:[#allocation14_spill] sm:$0xff] %v5110_v24 }
  0xfc   :  { %v5115_v26 = vpop.f32.mrf.mxu0  ;;  %v5117_v27 = vpop.f32.mrf.mxu1 }
  0xfd   :  { %7063 = vst [vmem:[#allocation15_spill] sm:$0xff] %v5117_v27 }
  0xfe   :  { %v5120_v29 = vpop.f32.mrf.mxu0  ;;  %v5122_v30 = vpop.f32.mrf.mxu1 }
  0xff   :  { %7064 = vst [vmem:[#allocation16_spill] sm:$0xff] %v5122_v30 }
 0x100   :  { %v5125_v42 = vpop.f32.mrf.mxu0  ;;  %v5127_v43 = vpop.f32.mrf.mxu1 }
 0x101   :  { %7065 = vst [vmem:[#allocation17_spill] sm:$0xff] %v5127_v43 }
 0x102   :  { %v5134_v45 = vpop.f32.mrf.mxu1  ;;  %v652_v56 = vpop.f32.mrf.mxu0 }
 0x103   :  { %7066 = vst [vmem:[#allocation18_spill] sm:$0xff] %v5134_v45  ;;  %v653_v57 = vadd.f32 %v652_v56, %v4995_v32 }
 0x104   :  { %v5142_v61 = vpop.f32.mrf.mxu1  ;;  %v654_v12 = vpop.f32.mrf.mxu0 }
 0x105   :  { %7067 = vst [vmem:[#allocation19_spill] sm:$0xff] %v5142_v61  ;;  %v5145_v18 = vadd.f32 %v5132_v44, %v653_v57  ;;  %v655_v21 = vadd.f32 %v654_v12, %v4999_v34 }
 0x106   :  { %v5148_v25 = vpop.f32.mrf.mxu1  ;;  %v656_v28 = vpop.f32.mrf.mxu0 }
 0x107   :  { %7068 = vst [vmem:[#allocation20_spill] sm:$0xff] %v5148_v25  ;;  %v930_v45 = vmin.f32 %v5145_v18, 20.0  ;;  %v5152_v32 = vadd.f32 %v5140_v60, %v655_v21  ;;  %v657_v56 = vadd.f32 %v656_v28, %v5003_v36  ;;  %vm1570_vm1 = vcmp.gt.f32.partialorder %v5145_v18, 20.0 }
 0x108   :  { %v5155_v16 = vpop.f32.mrf.mxu1  ;;  %v658_v31 = vpop.f32.mrf.mxu0 }
 0x109   :  { %7069 = vst [vmem:[#allocation21_spill] sm:$0xff] %v5152_v32  ;;  %7070 = vst [vmem:[#allocation22_spill] sm:$0xff] %v5155_v16  ;;  %v994_v14 = vmul.f32 1.442695, %v930_v45  ;;  %v931_v61 = vmin.f32 %v5152_v32, 20.0  ;;  %v5159_v57 = vadd.f32 %v5132_v44, %v657_v56  ;;  %v659_v34 = vadd.f32 %v658_v31, %v5007_v38 }
 0x10a   :  { %v5162_v12 = vpop.f32.mrf.mxu1  ;;  %v662_v25 = vpop.f32.mrf.mxu0 }
 0x10b   :  { %7071 = vst [vmem:[#allocation23_spill] sm:$0xff] %v5162_v12  ;;  %4071 = vpow2.f32 %v994_v14  ;;  %v996_v43 = vmul.f32 1.442695, %v931_v61  ;;  %v934_v21 = vmin.f32 %v5159_v57, 20.0  ;;  %v5166_v36 = vadd.f32 %v5140_v60, %v659_v34 }
 0x10c   :  { %v663_v28 = vadd.f32 %v662_v25, %v5011_v40  ;;  %v5169_v45 = vpop.f32.mrf.mxu1  ;;  %v664_v16 = vpop.f32.mrf.mxu0  ;;  %vm1574_vm2 = vcmp.gt.f32.partialorder %v5159_v57, 20.0 }
 0x10d   :  { %7072 = vst [vmem:[#allocation24_spill] sm:$0xff] %v5166_v36  ;;  %7073 = vst [vmem:[#allocation25_spill] sm:$0xff] %v5169_v45  ;;  %v1002_v51 = vmul.f32 1.442695, %v934_v21  ;;  %v665_v56 = vadd.f32 %v664_v16, %v5027_v46  ;;  %v935_v38 = vmin.f32 %v5166_v36, 20.0  ;;  %4073 = vpow2.f32 %v996_v43 }
 0x10e   :  { %v5174_v31 = vadd.f32 %v5132_v44, %v663_v28  ;;  %v5176_v14 = vpop.f32.mrf.mxu1  ;;  %v666_v61 = vpop.f32.mrf.mxu0 }
 0x10f   :  { %7075 = vst [vmem:[#allocation27_spill] sm:$0xff] %v5176_v14  ;;  %v5179_v34 = vadd.f32 %v5140_v60, %v665_v56  ;;  %v667_v40 = vadd.f32 %v666_v61, %v5031_v48  ;;  %v1004_v25 = vmul.f32 1.442695, %v935_v38  ;;  %4075 = vpow2.f32 %v1002_v51 }
 0x110   :  { %7074 = vst [vmem:[#allocation26_spill] sm:$0xff] %v5174_v31  ;;  %v938_v45 = vmin.f32 %v5174_v31, 20.0  ;;  %v5183_v21 = vpop.f32.mrf.mxu1  ;;  %v668_v46 = vpop.f32.mrf.mxu0 }
 0x111   :  { %7076 = vst [vmem:[#allocation28_spill] sm:$0xff] %v5183_v21  ;;  %v939_v16 = vmin.f32 %v5179_v34, 20.0  ;;  %v5187_v28 = vadd.f32 %v5132_v44, %v667_v40  ;;  %v669_v14 = vadd.f32 %v668_v46, %v5035_v50  ;;  %4077 = vpow2.f32 %v1004_v25 }
 0x112   :  { %v1010_v43 = vmul.f32 1.442695, %v938_v45  ;;  %v5190_v56 = vpop.f32.mrf.mxu1  ;;  %v672_v12 = vpop.f32.mrf.mxu0  ;;  %vm1579_vm7 = vcmp.gt.f32.partialorder %v5179_v34, 20.0 }
 0x113   :  { %7077 = vst [vmem:[#allocation29_spill] sm:$0xff] %v5190_v56  ;;  %v1012_v48 = vmul.f32 1.442695, %v939_v16  ;;  %v942_v38 = vmin.f32 %v5187_v28, 20.0  ;;  %v5194_v61 = vadd.f32 %v5140_v60, %v669_v14  ;;  %v673_v51 = vadd.f32 %v672_v12, %v5039_v52 }
 0x114   :  { %4079 = vpow2.f32 %v1010_v43  ;;  %v5197_v21 = vpop.f32.mrf.mxu1  ;;  %v674_v40 = vpop.f32.mrf.mxu0  ;;  %vm1582_vm10 = vcmp.gt.f32.partialorder %v5187_v28, 20.0 }
 0x115   :  { %7078 = vst [vmem:[#allocation30_spill] sm:$0xff] %v5197_v21  ;;  %v1018_v30 = vmul.f32 1.442695, %v942_v38  ;;  %v943_v50 = vmin.f32 %v5194_v61, 20.0  ;;  %v5201_v45 = vadd.f32 %v5132_v44, %v673_v51  ;;  %v675_v25 = vadd.f32 %v674_v40, %v5043_v54 }
 0x116   :  { %v5204_v46 = vpop.f32.mrf.mxu1  ;;  %v676_v16 = vpop.f32.mrf.mxu0  ;;  %4081 = vpow2.f32 %v1012_v48  ;;  %vm1583_vm8 = vcmp.gt.f32.partialorder %v5194_v61, 20.0 }
 0x117   :  { %7079 = vst [vmem:[#allocation31_spill] sm:$0xff] %v5201_v45  ;;  %7080 = vst [vmem:[#allocation32_spill] sm:$0xff] %v5204_v46  ;;  %v1020_v14 = vmul.f32 1.442695, %v943_v50  ;;  %v946_v56 = vmin.f32 %v5201_v45, 20.0  ;;  %v677_v52 = vadd.f32 %v676_v16, %v5053_v58  ;;  %v5209_v43 = vadd.f32 %v5140_v60, %v675_v25 }
 0x118   :  { %v4072_v12 = vpop.eup %4071  ;;  %v678_v38 = vpop.f32.mrf.mxu0  ;;  %4083 = vpow2.f32 %v1018_v30  ;;  %v4031_v30 = vld [vmem:[%s6932_s5 + $0x1d4] ss:$8 sps:$4 sm:$0xff]  }
 0x119   :  { %7081 = vst [vmem:[#allocation33_spill] sm:$0xff] %v5209_v43  ;;  %v1122_v21 = vadd.f32 1.0, %v4072_v12  ;;  %v5212_v51 = vadd.f32 %v5132_v44, %v677_v52  ;;  %4085 = vpow2.f32 %v1020_v14  ;;  %v947_v54 = vmin.f32 %v5209_v43, 20.0  ;;  %v5215_v40 = vpop.f32.mrf.mxu1  ;;  %v4029_v14 = vld [vmem:[%s6932_s5 + $0x1d0] ss:$8 sps:$4 sm:$0xff]   ;;  %2259 = vmatprep.subr.bf16.mxu1 %v4031_v30 }
 0x11a   :  { %7083 = vst [vmem:[#allocation35_spill] sm:$0xff] %v5215_v40  ;;  %v1026_v50 = vmul.f32 1.442695, %v946_v56  ;;  %v682_v46 = vpop.f32.mrf.mxu0  ;;  %v4074_v49 = vpop.eup %4073  ;;  %v679_v25 = vadd.f32 %v678_v38, %v5063_v62  ;;  %2260 = vmatpush2.bf16.msra.mxu1 %v4029_v14 }
 0x11b   :  { %7082 = vst [vmem:[#allocation34_spill] sm:$0xff] %v5212_v51  ;;  %v1186_v48 = vmul.f32 %v1122_v21, %v1122_v21  ;;  %v950_v58 = vmin.f32 %v5212_v51, 20.0  ;;  %v1028_v16 = vmul.f32 1.442695, %v947_v54  ;;  %v5225_v12 = vpop.f32.mrf.mxu1  ;;  %v683_v21 = vadd.f32 %v682_v46, %v5067_v0  ;;  %v4032_v0 = vld [vmem:[%s6932_s5 + $0x1c0] ss:$8 sps:$4 sm:$0xff]   ;;  %2261 = vmatprep.subr.bf16.mxu1 %v4034_v47 }
 0x11c   :  { %v4076_v52 = vpop.eup %4075  ;;  %7084 = vst [vmem:[#allocation36_spill] sm:$0xff] %v5225_v12  ;;  %v1123_v27 = vadd.f32 1.0, %v4074_v49  ;;  %4087 = vpow2.f32 %v1026_v50  ;;  %v5229_v38 = vadd.f32 %v5140_v60, %v679_v25  ;;  %v684_v54 = vpop.f32.mrf.mxu0 }
 0x11d   :  { %v1378_v40 = vadd.f32 1.0, %v1186_v48  ;;  %v1034_v62 = vmul.f32 1.442695, %v950_v58  ;;  %v1126_v41 = vadd.f32 1.0, %v4076_v52  ;;  %4089 = vpow2.f32 %v1028_v16  ;;  %v5240_v50 = vpop.f32.mrf.mxu1 }
 0x11e   :  { %v4078_v56 = vpop.eup %4077  ;;  %7085 = vst [vmem:[#allocation37_spill] sm:$0xff] %v5229_v38  ;;  %v5238_v49 = vadd.f32 %v5132_v44, %v683_v21  ;;  %7087 = vst [vmem:[#allocation39_spill] sm:$0xff] %v5240_v50  ;;  %v1187_v58 = vmul.f32 %v1123_v27, %v1123_v27  ;;  %2262 = vmatpush2.bf16.msra.mxu1 %v4032_v0  ;;  %v951_v14 = vmin.f32 %v5229_v38, 20.0  ;;  %v686_v52 = vpop.f32.mrf.mxu0  ;;  %v3548_v12 = vadd.f32 -1.0, %v1186_v48 }
 0x11f   :  { %v1127_v46 = vadd.f32 1.0, %v4078_v56  ;;  %4091 = vrcp.f32 %v1378_v40  ;;  %v685_v16 = vadd.f32 %v684_v54, %v5071_v1  ;;  %v1190_v20 = vmul.f32 %v1126_v41, %v1126_v41  ;;  %v5245_v15 = vpop.f32.mrf.mxu1 }
 0x120   :  { %7086 = vst [vmem:[#allocation38_spill] sm:$0xff] %v5238_v49  ;;  %4093 = vpow2.f32 %v1034_v62  ;;  %v954_v21 = vmin.f32 %v5238_v49, 20.0  ;;  %7088 = vst [vmem:[#allocation40_spill] sm:$0xff] %v5245_v15  ;;  %v1379_v40 = vadd.f32 1.0, %v1187_v58  ;;  %v687_v0 = vadd.f32 %v686_v52, %v5075_v4  ;;  %v688_v1 = vpop.f32.mrf.mxu0 }
 0x121   :  { %v4080_v24 = vpop.eup %4079  ;;  %v1191_v39 = vmul.f32 %v1127_v46, %v1127_v46  ;;  %v1036_v62 = vmul.f32 1.442695, %v951_v14  ;;  %v5249_v50 = vadd.f32 %v5140_v60, %v685_v16  ;;  %v1314_v48 = vmul.f32 %v3548_v12, %v5145_v18  ;;  %v5252_v9 = vpop.f32.mrf.mxu1 }
 0x122   :  { %v1130_v30 = vadd.f32 1.0, %v4080_v24  ;;  %v3549_v41 = vadd.f32 -1.0, %v1187_v58  ;;  %v1382_v54 = vadd.f32 1.0, %v1190_v20  ;;  %v3552_v37 = vadd.f32 -1.0, %v1190_v20  ;;  %7090 = vst [vmem:[#allocation42_spill] sm:$0xff] %v5252_v9  ;;  %v692_v52 = vpop.f32.mrf.mxu0 }
 0x123   :  { %v4082_v25 = vpop.eup %4081  ;;  %7089 = vst [vmem:[#allocation41_spill] sm:$0xff] %v5249_v50  ;;  %v3553_v11 = vadd.f32 -1.0, %v1191_v39  ;;  %v1042_v15 = vmul.f32 1.442695, %v954_v21  ;;  %4095 = vrcp.f32 %v1379_v40  ;;  %v955_v12 = vmin.f32 %v5249_v50, 20.0 }
 0x124   :  { %v1131_v27 = vadd.f32 1.0, %v4082_v25  ;;  %v1194_v24 = vmul.f32 %v1130_v30, %v1130_v30  ;;  %v1383_v25 = vadd.f32 1.0, %v1191_v39  ;;  %v5255_v30 = vadd.f32 %v5132_v44, %v687_v0  ;;  %v765_v0 = vpop.f32.mrf.mxu1 }
 0x125   :  { %v4084_v56 = vpop.eup %4083  ;;  %4097 = vpow2.f32 %v1036_v62  ;;  %v689_v58 = vadd.f32 %v688_v1, %v5079_v6  ;;  %v5260_v20 = vmul.f32 %v3549_v41, %v5152_v32  ;;  %v5263_v39 = vmul.f32 %v3552_v37, %v5159_v57 }
 0x126   :  { %v4086_v47 = vpop.eup %4085  ;;  %v1134_v46 = vadd.f32 1.0, %v4084_v56  ;;  %v1195_v4 = vmul.f32 %v1131_v27, %v1131_v27  ;;  %7091 = vst [vmem:[#allocation43_spill] sm:$0xff] %v5255_v30  ;;  %v3556_v16 = vadd.f32 -1.0, %v1194_v24  ;;  %4099 = vrcp.f32 %v1382_v54 }
 0x127   :  { %v1135_v35 = vadd.f32 1.0, %v4086_v47  ;;  %7092 = vst [vmem:[#allocation44_spill] sm:$0xff] %v5260_v20  ;;  %v1386_v56 = vadd.f32 1.0, %v1194_v24  ;;  %v5266_v40 = vmul.f32 %v3553_v11, %v5166_v36  ;;  %4101 = vpow2.f32 %v1042_v15  ;;  %v694_v11 = vpop.f32.mrf.mxu0 }
 0x128   :  { %v1198_v21 = vmul.f32 %v1134_v46, %v1134_v46  ;;  %4103 = vrcp.f32 %v1383_v25  ;;  %v1387_v6 = vadd.f32 1.0, %v1195_v4  ;;  %v958_v1 = vmin.f32 %v5255_v30, 20.0 }
 0x129   :  { %v4088_v14 = vpop.eup %4087  ;;  %7093 = vst [vmem:[#allocation45_spill] sm:$0xff] %v5266_v40  ;;  %v1199_v27 = vmul.f32 %v1135_v35, %v1135_v35  ;;  %v5271_v24 = vmul.f32 %v3556_v16, %v5174_v31  ;;  %v3557_v54 = vadd.f32 -1.0, %v1195_v4  ;;  %v1044_v37 = vmul.f32 1.442695, %v955_v12  ;;  %v767_v16 = vpop.f32.mrf.mxu1 }
 0x12a   :  { %v4090_v47 = vpop.eup %4089  ;;  %v1138_v62 = vadd.f32 1.0, %v4088_v14  ;;  %v5274_v46 = vadd.f32 %v5140_v60, %v689_v58  ;;  %4105 = vrcp.f32 %v1386_v56  ;;  %v3560_v15 = vadd.f32 -1.0, %v1198_v21 }
 0x12b   :  { %7094 = vst [vmem:[#allocation46_spill] sm:$0xff] %v5271_v24  ;;  %v1390_v9 = vadd.f32 1.0, %v1198_v21  ;;  %v1139_v40 = vadd.f32 1.0, %v4090_v47  ;;  %v1391_v25 = vadd.f32 1.0, %v1199_v27  ;;  %v693_v20 = vadd.f32 %v692_v52, %v5083_v8  ;;  %v696_v21 = vpop.f32.mrf.mxu0 }
 0x12c   :  { %v4092_v41 = vpop.eup %4091  ;;  %7095 = vst [vmem:[#allocation47_spill] sm:$0xff] %v5274_v46  ;;  %v959_v14 = vmin.f32 %v5274_v46, 20.0  ;;  %v766_v32 = vadd.f32 %v765_v0, %v5041_v53  ;;  %4107 = vrcp.f32 %v1387_v6  ;;  %v3561_v4 = vadd.f32 -1.0, %v1199_v27  ;;  %v4035_v53 = vld [vmem:[%s6932_s5 + $0x1b0] ss:$8 sps:$4 sm:$0xff]  }
 0x12d   :  { %v4094_v35 = vpop.eup %4093  ;;  %v1202_v12 = vmul.f32 %v1138_v62, %v1138_v62  ;;  %v1050_v24 = vmul.f32 1.442695, %v958_v1  ;;  %v1506_v58 = vmul.f32 %v4092_v41, %v1314_v48  ;;  %v5280_v31 = vmul.f32 %v3557_v54, %v5179_v34  ;;  %v4037_v48 = vld [vmem:[%s6932_s5 + $0x1b4] ss:$8 sps:$4 sm:$0xff]   ;;  %v698_v54 = vpop.f32.mrf.mxu0 }
 0x12e   :  { %v1142_v56 = vadd.f32 1.0, %v4094_v35  ;;  %4109 = vpow2.f32 %v1044_v37  ;;  %v5283_v47 = vmul.f32 %v3560_v15, %v5187_v28  ;;  %v1203_v36 = vmul.f32 %v1139_v40, %v1139_v40  ;;  %2263 = vmatprep.subr.bf16.mxu1 %v4037_v48 }
 0x12f   :  { %4111 = vrcp.f32 %v1390_v9  ;;  %v1052_v8 = vmul.f32 1.442695, %v959_v14  ;;  %v5292_v52 = vadd.f32 %v5132_v44, %v693_v20  ;;  %v5295_v27 = vadd.f32 %v4953_v17, %v766_v32  ;;  %v769_v9 = vpop.f32.mrf.mxu1  ;;  %2264 = vmatpush2.bf16.msra.mxu1 %v4035_v53 }
 0x130   :  { %7096 = vst [vmem:[#allocation48_spill] sm:$0xff] %v5283_v47  ;;  %4113 = vrcp.f32 %v1391_v25  ;;  %v695_v0 = vadd.f32 %v694_v11, %v5087_v10  ;;  %v5299_v40 = vmul.f32 %v3561_v4, %v5194_v61  ;;  %v3564_v6 = vadd.f32 -1.0, %v1202_v12  ;;  %v5301_v1 = vpop.eup %4095 }
 0x131   :  { %7097 = vst [vmem:[#allocation49_spill] sm:$0xff] %v5292_v52  ;;  %v1394_v62 = vadd.f32 1.0, %v1202_v12  ;;  %4115 = vpow2.f32 %v1050_v24  ;;  %v5306_v20 = vsel %vm1570_vm1, %v5145_v18, %v1506_v58  ;;  %v962_v32 = vmin.f32 %v5292_v52, 20.0  ;;  %v771_v12 = vpop.f32.mrf.mxu1 }
 0x132   :  { %v932_v41 = vmin.f32 %v5295_v27, 20.0  ;;  %v5311_v10 = vadd.f32 %v5140_v60, %v695_v0  ;;  %v4098_v37 = vpop.eup %4097  ;;  %v3565_v11 = vadd.f32 -1.0, %v1203_v36  ;;  %v1206_v24 = vmul.f32 %v1142_v56, %v1142_v56 }
 0x133   :  { %4117 = vpow2.f32 %v1052_v8  ;;  %v768_v35 = vadd.f32 %v767_v16, %v5045_v55  ;;  %v4100_v15 = vpop.eup %4099  ;;  %v1058_v25 = vmul.f32 1.442695, %v962_v32  ;;  %v697_v4 = vadd.f32 %v696_v21, %v5094_v13 }
 0x134   :  { %7098 = vst [vmem:[#allocation50_spill] sm:$0xff] %v5311_v10  ;;  %v998_v14 = vmul.f32 1.442695, %v932_v41  ;;  %v963_v18 = vmin.f32 %v5311_v10, 20.0  ;;  %v4102_v58 = vpop.eup %4101  ;;  %v1395_v48 = vadd.f32 1.0, %v1203_v36  ;;  %v770_v56 = vadd.f32 %v769_v9, %v5055_v59 }
 0x135   :  { %v5318_v53 = vadd.f32 %v4969_v23, %v768_v35  ;;  %v699_v8 = vadd.f32 %v698_v54, %v5101_v19  ;;  %v5322_v55 = vpop.eup %4103  ;;  %v5325_v16 = vmul.f32 %v3564_v6, %v5201_v45  ;;  %4119 = vpow2.f32 %v1058_v25  ;;  %v4038_v36 = vld [vmem:[%s6932_s5 + $0x1a0] ss:$8 sps:$4 sm:$0xff]   ;;  %v4040_v59 = vld [vmem:[%s6932_s5 + $0x1a4] ss:$8 sps:$4 sm:$0xff]   ;;  %v702_v6 = vpop.f32.mrf.mxu0 }
 0x136   :  { %v1060_v0 = vmul.f32 1.442695, %v963_v18  ;;  %v5328_v13 = vadd.f32 %v5132_v44, %v697_v4  ;;  %v1143_v21 = vadd.f32 1.0, %v4098_v37  ;;  %4121 = vpow2.f32 %v998_v14  ;;  %2265 = vmatprep.subr.bf16.mxu1 %v4040_v59  ;;  %v775_v18 = vpop.f32.mrf.mxu1  ;;  %v4043_v4 = vld [vmem:[%s6932_s5 + $0x194] ss:$8 sps:$4 sm:$0xff]  }
 0x137   :  { %7099 = vst [vmem:[#allocation51_spill] sm:$0xff] %v5318_v53  ;;  %7100 = vst [vmem:[#allocation52_spill] sm:$0xff] %v5325_v16  ;;  %v933_v19 = vmin.f32 %v5318_v53, 20.0  ;;  %v772_v9 = vadd.f32 %v771_v12, %v5065_v63  ;;  %v5338_v32 = vpop.eup %4105  ;;  %v3568_v41 = vadd.f32 -1.0, %v1206_v24  ;;  %v5342_v35 = vadd.f32 %v4953_v17, %v770_v56  ;;  %2266 = vmatpush2.bf16.msra.mxu1 %v4038_v36  ;;  %v4041_v63 = vld [vmem:[%s6932_s5 + $0x190] ss:$8 sps:$4 sm:$0xff]  }
 0x138   :  { %7101 = vst [vmem:[#allocation53_spill] sm:$0xff] %v5328_v13  ;;  %7102 = vst [vmem:[#allocation54_spill] sm:$0xff] %v5338_v32  ;;  %4123 = vpow2.f32 %v1060_v0  ;;  %v966_v54 = vmin.f32 %v5328_v13, 20.0  ;;  %v1510_v25 = vmul.f32 %v4100_v15, %v5263_v39  ;;  %v5346_v14 = vadd.f32 %v5140_v60, %v699_v8  ;;  %2267 = vmatprep.subr.bf16.mxu1 %v4043_v4  ;;  %v777_v47 = vpop.f32.mrf.mxu1 }
 0x139   :  { %4125 = vrcp.f32 %v1394_v62  ;;  %v1000_v37 = vmul.f32 1.442695, %v933_v19  ;;  %v5354_v12 = vpop.eup %4107  ;;  %v5357_v56 = vmul.f32 %v3565_v11, %v5209_v43  ;;  %v1398_v39 = vadd.f32 1.0, %v1206_v24  ;;  %v704_v19 = vpop.f32.mrf.mxu0 }
 0x13a   :  { %7103 = vst [vmem:[#allocation55_spill] sm:$0xff] %v5346_v14  ;;  %v1066_v62 = vmul.f32 1.442695, %v966_v54  ;;  %v936_v15 = vmin.f32 %v5342_v35, 20.0  ;;  %v967_v0 = vmin.f32 %v5346_v14, 20.0  ;;  %v5362_v36 = vadd.f32 %v4969_v23, %v772_v9 }
 0x13b   :  { %7104 = vst [vmem:[#allocation56_spill] sm:$0xff] %v5357_v56  ;;  %v4110_v8 = vpop.eup %4109  ;;  %4127 = vpow2.f32 %v1000_v37  ;;  %v703_v59 = vadd.f32 %v702_v6, %v5108_v22  ;;  %v1207_v45 = vmul.f32 %v1143_v21, %v1143_v21  ;;  %v1146_v11 = vadd.f32 1.0, %v4102_v58  ;;  %2268 = vmatpush2.bf16.msra.mxu1 %v4041_v63 }
 0x13c   :  { %7105 = vst [vmem:[#allocation57_spill] sm:$0xff] %v5362_v36  ;;  %v5365_v16 = vpop.eup %4111  ;;  %4129 = vpow2.f32 %v1066_v62  ;;  %v1006_v24 = vmul.f32 1.442695, %v936_v15  ;;  %v1068_v56 = vmul.f32 1.442695, %v967_v0  ;;  %v937_v37 = vmin.f32 %v5362_v36, 20.0 }
 0x13d   :  { %7106 = vst [vmem:[#allocation58_spill] sm:$0xff] %v5365_v16  ;;  %v5367_v54 = vpop.eup %4113  ;;  %v5371_v43 = vadd.f32 %v5132_v44, %v703_v59  ;;  %v776_v9 = vadd.f32 %v775_v18, %v5069_v2  ;;  %v5377_v21 = vsel %vm1574_vm2, %v5159_v57, %v1510_v25  ;;  %4131 = vrcp.f32 %v1395_v48 }
 0x13e   :  { %7107 = vst [vmem:[#allocation59_spill] sm:$0xff] %v5367_v54  ;;  %v4116_v22 = vpop.eup %4115  ;;  %v5380_v58 = vmul.f32 %v3568_v41, %v5212_v51  ;;  %v705_v6 = vadd.f32 %v704_v19, %v5115_v26  ;;  %v1147_v4 = vadd.f32 1.0, %v4110_v8  ;;  %4133 = vpow2.f32 %v1006_v24  ;;  %v706_v8 = vpop.f32.mrf.mxu0 }
 0x13f   :  { %7108 = vst [vmem:[#allocation60_spill] sm:$0xff] %v5371_v43  ;;  %v970_v62 = vmin.f32 %v5371_v43, 20.0  ;;  %v5385_v2 = vadd.f32 %v4953_v17, %v776_v9  ;;  %v3569_v63 = vadd.f32 -1.0, %v1207_v45  ;;  %4135 = vpow2.f32 %v1068_v56  ;;  %v4044_v56 = vld [vmem:[%s6932_s5 + $0x180] ss:$8 sps:$4 sm:$0xff]  }
 0x140   :  { %7109 = vst [vmem:[#allocation61_spill] sm:$0xff] %v5380_v58  ;;  %v4118_v18 = vpop.eup %4117  ;;  %v5388_v15 = vadd.f32 %v5140_v60, %v705_v6  ;;  %v778_v57 = vadd.f32 %v777_v47, %v5073_v3  ;;  %v1210_v48 = vmul.f32 %v1146_v11, %v1146_v11  ;;  %v1150_v41 = vadd.f32 1.0, %v4116_v22 }
 0x141   :  { %7110 = vst [vmem:[#allocation62_spill] sm:$0xff] %v5385_v2  ;;  %v1008_v25 = vmul.f32 1.442695, %v937_v37  ;;  %v940_v26 = vmin.f32 %v5385_v2, 20.0  ;;  %4137 = vrcp.f32 %v1398_v39  ;;  %v1074_v0 = vmul.f32 1.442695, %v970_v62 }
 0x142   :  { %7111 = vst [vmem:[#allocation63_spill] sm:$0xff] %v5388_v15  ;;  %v971_v59 = vmin.f32 %v5388_v15, 20.0  ;;  %v5394_v19 = vadd.f32 %v4969_v23, %v778_v57  ;;  %v4120_v24 = vpop.eup %4119  ;;  %v1399_v47 = vadd.f32 1.0, %v1207_v45  ;;  %v1211_v11 = vmul.f32 %v1147_v4, %v1147_v4  ;;  %v4046_v39 = vld [vmem:[%s6932_s5 + $0x184] ss:$8 sps:$4 sm:$0xff]   ;;  %v779_v45 = vpop.f32.mrf.mxu1 }
 0x143   :  { %v1014_v37 = vmul.f32 1.442695, %v940_v26  ;;  %v4122_v9 = vpop.eup %4121  ;;  %v5405_v22 = vmul.f32 %v3569_v63, %v5229_v38  ;;  %v1151_v6 = vadd.f32 1.0, %v4118_v18  ;;  %v707_v57 = vadd.f32 %v706_v8, %v5120_v29  ;;  %2269 = vmatprep.subr.bf16.mxu1 %v4046_v39  ;;  %v708_v29 = vpop.f32.mrf.mxu0 }
 0x144   :  { %7112 = vst [vmem:[#allocation64_spill] sm:$0xff] %v5394_v19  ;;  %v1076_v62 = vmul.f32 1.442695, %v971_v59  ;;  %v3572_v51 = vadd.f32 -1.0, %v1210_v48  ;;  %v1214_v16 = vmul.f32 %v1150_v41, %v1150_v41  ;;  %v1154_v32 = vadd.f32 1.0, %v4120_v24  ;;  %2270 = vmatpush2.bf16.msra.mxu1 %v4044_v56 }
 0x145   :  { %v4124_v58 = vpop.eup %4123  ;;  %4139 = vpow2.f32 %v1008_v25  ;;  %v1402_v26 = vadd.f32 1.0, %v1210_v48  ;;  %v1124_v3 = vadd.f32 1.0, %v4122_v9  ;;  %v941_v54 = vmin.f32 %v5394_v19, 20.0 }
 0x146   :  { %v5408_v4 = vpop.eup %4125  ;;  %4141 = vpow2.f32 %v1074_v0  ;;  %v3573_v63 = vadd.f32 -1.0, %v1211_v11  ;;  %v1403_v18 = vadd.f32 1.0, %v1211_v11  ;;  %v1155_v59 = vadd.f32 1.0, %v4124_v58 }
 0x147   :  { %4143 = vpow2.f32 %v1014_v37  ;;  %v1215_v38 = vmul.f32 %v1151_v6, %v1151_v6  ;;  %v5412_v41 = vadd.f32 %v5132_v44, %v707_v57  ;;  %v780_v25 = vadd.f32 %v779_v45, %v5077_v5 }
 0x148   :  { %v4128_v8 = vpop.eup %4127  ;;  %4145 = vpow2.f32 %v1076_v62  ;;  %v1406_v48 = vadd.f32 1.0, %v1214_v16  ;;  %v1218_v0 = vmul.f32 %v1154_v32, %v1154_v32  ;;  %v1188_v56 = vmul.f32 %v1124_v3, %v1124_v3 }
 0x149   :  { %7113 = vst [vmem:[#allocation65_spill] sm:$0xff] %v5412_v41  ;;  %v4130_v24 = vpop.eup %4129  ;;  %4147 = vrcp.f32 %v1399_v47  ;;  %v1125_v39 = vadd.f32 1.0, %v4128_v8  ;;  %v1016_v9 = vmul.f32 1.442695, %v941_v54  ;;  %v709_v58 = vadd.f32 %v708_v29, %v5125_v42 }
 0x14a   :  { %4149 = vrcp.f32 %v1402_v26  ;;  %v5416_v11 = vpop.eup %4131  ;;  %v5419_v37 = vmul.f32 %v3572_v51, %v5238_v49  ;;  %v5422_v6 = vmul.f32 %v3573_v63, %v5249_v50  ;;  %v1219_v5 = vmul.f32 %v1155_v59, %v1155_v59 }
 0x14b   :  { %4151 = vrcp.f32 %v1403_v18  ;;  %v4134_v62 = vpop.eup %4133  ;;  %v3576_v47 = vadd.f32 -1.0, %v1214_v16  ;;  %v1407_v57 = vadd.f32 1.0, %v1215_v38  ;;  %v974_v32 = vmin.f32 %v5412_v41, 20.0 }
 0x14c   :  { %7114 = vst [vmem:[#allocation66_spill] sm:$0xff] %v5419_v37  ;;  %7115 = vst [vmem:[#allocation67_spill] sm:$0xff] %v5422_v6  ;;  %v5426_v3 = vadd.f32 %v4953_v17, %v780_v25  ;;  %v4136_v54 = vpop.eup %4135  ;;  %4153 = vrcp.f32 %v1406_v48  ;;  %v1410_v42 = vadd.f32 1.0, %v1218_v0  ;;  %v1189_v45 = vmul.f32 %v1125_v39, %v1125_v39  ;;  %v781_v37 = vpop.f32.mrf.mxu1 }
 0x14d   :  { %v1158_v26 = vadd.f32 1.0, %v4130_v24  ;;  %v3577_v51 = vadd.f32 -1.0, %v1215_v38  ;;  %v1380_v29 = vadd.f32 1.0, %v1188_v56  ;;  %4155 = vpow2.f32 %v1016_v9 }
 0x14e   :  { %7116 = vst [vmem:[#allocation68_spill] sm:$0xff] %v5426_v3  ;;  %v5429_v63 = vadd.f32 %v5140_v60, %v709_v58  ;;  %v5431_v18 = vpop.eup %4137  ;;  %v3580_v16 = vadd.f32 -1.0, %v1218_v0  ;;  %v1411_v59 = vadd.f32 1.0, %v1219_v5  ;;  %v1128_v8 = vadd.f32 1.0, %v4134_v62 }
 0x14f   :  { %7118 = vst [vmem:[#allocation70_spill] sm:$0xff] %v5431_v18  ;;  %v1159_v49 = vadd.f32 1.0, %v4136_v54  ;;  %v5434_v25 = vmul.f32 %v3576_v47, %v5255_v30  ;;  %4157 = vrcp.f32 %v1407_v57  ;;  %v1082_v48 = vmul.f32 1.442695, %v974_v32  ;;  %v7144_v18 = vld [vmem:[#allocation21_spill] sm:$0xff] }
 0x150   :  { %7117 = vst [vmem:[#allocation69_spill] sm:$0xff] %v5429_v63  ;;  %v944_v24 = vmin.f32 %v5426_v3, 20.0  ;;  %4159 = vrcp.f32 %v1410_v42  ;;  %v3550_v38 = vadd.f32 -1.0, %v1188_v56  ;;  %v1381_v39 = vadd.f32 1.0, %v1189_v45 }
 0x151   :  { %7119 = vst [vmem:[#allocation71_spill] sm:$0xff] %v5434_v25  ;;  %v1222_v9 = vmul.f32 %v1158_v26, %v1158_v26  ;;  %v5438_v50 = vmul.f32 %v3577_v51, %v5274_v46  ;;  %4161 = vrcp.f32 %v1380_v29  ;;  %v975_v0 = vmin.f32 %v5429_v63, 20.0  ;;  %v712_v25 = vpop.f32.mrf.mxu0 }
 0x152   :  { %v4140_v58 = vpop.eup %4139  ;;  %v782_v62 = vadd.f32 %v781_v37, %v5081_v7  ;;  %v5443_v47 = vmul.f32 %v3580_v16, %v5292_v52  ;;  %4163 = vrcp.f32 %v1411_v59  ;;  %v1192_v57 = vmul.f32 %v1128_v8, %v1128_v8 }
 0x153   :  { %7120 = vst [vmem:[#allocation72_spill] sm:$0xff] %v5438_v50  ;;  %v4142_v54 = vpop.eup %4141  ;;  %v1223_v32 = vmul.f32 %v1159_v49, %v1159_v49  ;;  %v3581_v56 = vadd.f32 -1.0, %v1219_v5  ;;  %v3551_v30 = vadd.f32 -1.0, %v1189_v45  ;;  %4165 = vpow2.f32 %v1082_v48  ;;  %v785_v5 = vpop.f32.mrf.mxu1 }
 0x154   :  { %7121 = vst [vmem:[#allocation73_spill] sm:$0xff] %v5443_v47  ;;  %v4144_v42 = vpop.eup %4143  ;;  %v1022_v26 = vmul.f32 1.442695, %v944_v24  ;;  %v5446_v29 = vmul.f32 %v3550_v38, %v5295_v27  ;;  %4167 = vrcp.f32 %v1381_v39  ;;  %v1414_v46 = vadd.f32 1.0, %v1222_v9 }
 0x155   :  { %v4146_v51 = vpop.eup %4145  ;;  %v1129_v7 = vadd.f32 1.0, %v4140_v58  ;;  %v3584_v16 = vadd.f32 -1.0, %v1222_v9  ;;  %v1162_v52 = vadd.f32 1.0, %v4142_v54  ;;  %v1084_v59 = vmul.f32 1.442695, %v975_v0  ;;  %v714_v0 = vpop.f32.mrf.mxu0 }
 0x156   :  { %v5448_v37 = vpop.eup %4147  ;;  %v5451_v49 = vadd.f32 %v4969_v23, %v782_v62  ;;  %v3554_v8 = vadd.f32 -1.0, %v1192_v57  ;;  %v1384_v48 = vadd.f32 1.0, %v1192_v57  ;;  %v3585_v24 = vadd.f32 -1.0, %v1223_v32 }
 0x157   :  { %v5453_v45 = vpop.eup %4149  ;;  %v1132_v47 = vadd.f32 1.0, %v4144_v42  ;;  %v5458_v39 = vmul.f32 %v3581_v56, %v5311_v10  ;;  %v5461_v58 = vmul.f32 %v3551_v30, %v5318_v53  ;;  %v1163_v9 = vadd.f32 1.0, %v4146_v51  ;;  %v787_v10 = vpop.f32.mrf.mxu1 }
 0x158   :  { %7122 = vst [vmem:[#allocation74_spill] sm:$0xff] %v5451_v49  ;;  %7123 = vst [vmem:[#allocation75_spill] sm:$0xff] %v5453_v45  ;;  %v5455_v38 = vpop.eup %4151  ;;  %4169 = vpow2.f32 %v1022_v26  ;;  %v1415_v62 = vadd.f32 1.0, %v1223_v32  ;;  %v1193_v54 = vmul.f32 %v1129_v7, %v1129_v7  ;;  %v945_v45 = vmin.f32 %v5451_v49, 20.0 }
 0x159   :  { %7124 = vst [vmem:[#allocation76_spill] sm:$0xff] %v5455_v38  ;;  %7125 = vst [vmem:[#allocation77_spill] sm:$0xff] %v5458_v39  ;;  %4171 = vrcp.f32 %v1414_v46  ;;  %v5464_v50 = vpop.eup %4153  ;;  %v5467_v57 = vmul.f32 %v3584_v16, %v5328_v13  ;;  %v1226_v42 = vmul.f32 %v1162_v52, %v1162_v52  ;;  %v713_v56 = vadd.f32 %v712_v25, %v4997_v33  ;;  %v7131_v16 = vld [vmem:[#allocation10_spill] sm:$0xff]  ;;  %v7133_v25 = vld [vmem:[#allocation3_spill] sm:$0xff] }
 0x15a   :  { %7126 = vst [vmem:[#allocation78_spill] sm:$0xff] %v5461_v58  ;;  %7127 = vst [vmem:[#allocation79_spill] sm:$0xff] %v5464_v50  ;;  %4173 = vpow2.f32 %v1084_v59  ;;  %v4156_v30 = vpop.eup %4155  ;;  %v5471_v51 = vmul.f32 %v3554_v8, %v5342_v35  ;;  %v5474_v46 = vmul.f32 %v3585_v24, %v5346_v14  ;;  %v1196_v32 = vmul.f32 %v1132_v47, %v1132_v47  ;;  %v716_v59 = vpop.f32.mrf.mxu0  ;;  %v7141_v50 = vld [vmem:[#allocation4_spill] sm:$0xff] }
 0x15b   :  { %7128 = vst [vmem:[#allocation80_spill] sm:$0xff] %v5467_v57  ;;  %4175 = vrcp.f32 %v1384_v48  ;;  %v1227_v26 = vmul.f32 %v1163_v9, %v1163_v9  ;;  %v1024_v7 = vmul.f32 1.442695, %v945_v45  ;;  %v5477_v53 = vadd.f32 %v5132_v44, %v713_v56  ;;  %v7134_v57 = vld [vmem:[#allocation11_spill] sm:$0xff]  ;;  %v789_v56 = vpop.f32.mrf.mxu1 }
 0x15c   :  { %7129 = vst [vmem:[#allocation81_spill] sm:$0xff] %v5474_v46  ;;  %v786_v52 = vadd.f32 %v785_v5, %v7131_v16  ;;  %v5480_v13 = vpop.eup %4157  ;;  %4177 = vrcp.f32 %v1415_v62  ;;  %v3555_v33 = vadd.f32 -1.0, %v1193_v54  ;;  %v715_v8 = vadd.f32 %v714_v0, %v7133_v25 }
 0x15d   :  { %7130 = vst [vmem:[#allocation82_spill] sm:$0xff] %v5477_v53  ;;  %7132 = vst [vmem:[#allocation10_spill] sm:$0xff] %v5480_v13  ;;  %v788_v48 = vadd.f32 %v787_v10, %v7134_v57  ;;  %v5484_v58 = vpop.eup %4159  ;;  %v1385_v24 = vadd.f32 1.0, %v1193_v54  ;;  %v3588_v47 = vadd.f32 -1.0, %v1226_v42  ;;  %v1133_v9 = vadd.f32 1.0, %v4156_v30  ;;  %v718_v30 = vpop.f32.mrf.mxu0 }
 0x15e   :  { %7135 = vst [vmem:[#allocation3_spill] sm:$0xff] %v5484_v58  ;;  %v978_v45 = vmin.f32 %v5477_v53, 20.0  ;;  %v4162_v14 = vpop.eup %4161  ;;  %v1418_v46 = vadd.f32 1.0, %v1226_v42  ;;  %v5488_v5 = vadd.f32 %v4953_v17, %v786_v52  ;;  %v5491_v62 = vadd.f32 %v5140_v60, %v715_v8  ;;  %v791_v13 = vpop.f32.mrf.mxu1 }
 0x15f   :  { %v5494_v0 = vadd.f32 %v4969_v23, %v788_v48  ;;  %v5496_v10 = vpop.eup %4163  ;;  %v3558_v57 = vadd.f32 -1.0, %v1196_v32  ;;  %v1388_v54 = vadd.f32 1.0, %v1196_v32  ;;  %v3589_v16 = vadd.f32 -1.0, %v1227_v26 }
 0x160   :  { %7136 = vst [vmem:[#allocation11_spill] sm:$0xff] %v5488_v5  ;;  %7138 = vst [vmem:[#allocation84_spill] sm:$0xff] %v5496_v10  ;;  %4179 = vpow2.f32 %v1024_v7  ;;  %v4166_v25 = vpop.eup %4165  ;;  %v1090_v58 = vmul.f32 1.442695, %v978_v45  ;;  %v948_v42 = vmin.f32 %v5488_v5, 20.0  ;;  %v979_v52 = vmin.f32 %v5491_v62, 20.0 }
 0x161   :  { %7137 = vst [vmem:[#allocation83_spill] sm:$0xff] %v5494_v0  ;;  %v949_v39 = vmin.f32 %v5494_v0, 20.0  ;;  %v5501_v8 = vpop.eup %4167  ;;  %v5504_v48 = vmul.f32 %v3555_v33, %v5362_v36  ;;  %4181 = vrcp.f32 %v1385_v24  ;;  %v1197_v10 = vmul.f32 %v1133_v9, %v1133_v9  ;;  %v7142_v7 = vld [vmem:[#allocation24_spill] sm:$0xff] }
 0x162   :  { %7139 = vst [vmem:[#allocation85_spill] sm:$0xff] %v5501_v8  ;;  %v717_v32 = vadd.f32 %v716_v59, %v7141_v50  ;;  %vm1575_vm3 = vcmp.gt.f32.partialorder %v7142_v7, 20.0  ;;  %v5509_v45 = vmul.f32 %v4162_v14, %v5446_v29  ;;  %v5512_v38 = vmul.f32 %v3588_v47, %v5371_v43  ;;  %v722_v59 = vpop.f32.mrf.mxu0 }
 0x163   :  { %7140 = vst [vmem:[#allocation86_spill] sm:$0xff] %v5504_v48  ;;  %4183 = vrcp.f32 %v1418_v46  ;;  %v1030_v6 = vmul.f32 1.442695, %v948_v42  ;;  %vm1571_vm4 = vcmp.gt.f32.partialorder %v7144_v18, 20.0  ;;  %v5516_v33 = vmul.f32 %v3558_v57, %v5385_v2  ;;  %v7149_v57 = vld [vmem:[#allocation12_spill] sm:$0xff] }
 0x164   :  { %7143 = vst [vmem:[#allocation4_spill] sm:$0xff] %v5512_v38  ;;  %4185 = vrcp.f32 %v1388_v54  ;;  %v5518_v24 = vadd.f32 1.0, %v1227_v26  ;;  %v1092_v50 = vmul.f32 1.442695, %v979_v52  ;;  %v5521_v36 = vmul.f32 %v3589_v16, %v5388_v15  ;;  %v7150_v26 = vld [vmem:[#allocation5_spill] sm:$0xff]  ;;  %v795_v52 = vpop.f32.mrf.mxu1 }
 0x165   :  { %7145 = vst [vmem:[#allocation24_spill] sm:$0xff] %v5516_v33  ;;  %v4170_v9 = vpop.eup %4169  ;;  %v1166_v14 = vadd.f32 1.0, %v4166_v25  ;;  %4187 = vpow2.f32 %v1090_v58  ;;  %v1032_v29 = vmul.f32 1.442695, %v949_v39  ;;  %v5525_v46 = vadd.f32 -1.0, %v1197_v10  ;;  %v7151_v16 = vld [vmem:[#allocation13_spill] sm:$0xff] }
 0x166   :  { %7146 = vst [vmem:[#allocation21_spill] sm:$0xff] %v5521_v36  ;;  %v5523_v47 = vpop.eup %4171  ;;  %v5528_v42 = vadd.f32 %v5132_v44, %v717_v32  ;;  %v790_v54 = vadd.f32 %v789_v56, %v7149_v57  ;;  %v719_v2 = vadd.f32 %v718_v30, %v7150_v26  ;;  %v5532_v43 = vadd.f32 1.0, %v1197_v10  ;;  %v7152_v58 = vld [vmem:[#allocation44_spill] sm:$0xff]  ;;  %v724_v30 = vpop.f32.mrf.mxu0 }
 0x167   :  { %7147 = vst [vmem:[#allocation87_spill] sm:$0xff] %v5523_v47  ;;  %v4174_v33 = vpop.eup %4173  ;;  %4189 = vpow2.f32 %v1030_v6  ;;  %v792_v25 = vadd.f32 %v791_v13, %v7151_v16  ;;  %v1507_v39 = vmul.f32 %v5301_v1, %v7152_v58  ;;  %vm1572_vm5 = vcmp.gt.f32.partialorder %v5295_v27, 20.0  ;;  %v7155_v6 = vld [vmem:[#allocation45_spill] sm:$0xff]  ;;  %v797_v58 = vpop.f32.mrf.mxu1  ;;  %v7159_v47 = vld [vmem:[#allocation7_spill] sm:$0xff] }
 0x168   :  { %7148 = vst [vmem:[#allocation88_spill] sm:$0xff] %v5528_v42  ;;  %v4176_v38 = vpop.eup %4175  ;;  %4191 = vpow2.f32 %v1092_v50  ;;  %v982_v15 = vmin.f32 %v5528_v42, 20.0  ;;  %v5539_v32 = vadd.f32 %v4953_v17, %v790_v54  ;;  %v5542_v56 = vadd.f32 %v5140_v60, %v719_v2  ;;  %v7157_v2 = vld [vmem:[#allocation6_spill] sm:$0xff] }
 0x169   :  { %v1230_v10 = vmul.f32 %v1166_v14, %v1166_v14  ;;  %4193 = vpow2.f32 %v1032_v29  ;;  %v5546_v13 = vadd.f32 %v4969_v23, %v792_v25  ;;  %v1511_v1 = vmul.f32 %v5322_v55, %v7155_v6  ;;  %v5550_v50 = vpop.eup %4177  ;;  %v7158_v29 = vld [vmem:[#allocation14_spill] sm:$0xff] }
 0x16a   :  { %7153 = vst [vmem:[#allocation12_spill] sm:$0xff] %v5539_v32  ;;  %7156 = vst [vmem:[#allocation13_spill] sm:$0xff] %v5550_v50  ;;  %v1098_v57 = vmul.f32 1.442695, %v982_v15  ;;  %v952_v54 = vmin.f32 %v5539_v32, 20.0  ;;  %v983_v26 = vmin.f32 %v5542_v56, 20.0  ;;  %v723_v16 = vadd.f32 %v722_v59, %v7157_v2 }
 0x16b   :  { %7154 = vst [vmem:[#allocation5_spill] sm:$0xff] %v5546_v13  ;;  %v953_v36 = vmin.f32 %v5546_v13, 20.0  ;;  %v1639_v14 = vsel %vm1575_vm3, %v7142_v7, %v1511_v1  ;;  %v796_v25 = vadd.f32 %v795_v52, %v7158_v29  ;;  %v725_v55 = vadd.f32 %v724_v30, %v7159_v47  ;;  %v7162_v30 = vld [vmem:[#allocation15_spill] sm:$0xff] }
 0x16c   :  { %4195 = vpow2.f32 %v1098_v57  ;;  %v1038_v6 = vmul.f32 1.442695, %v952_v54  ;;  %v1100_v15 = vmul.f32 1.442695, %v983_v26  ;;  %v1635_v48 = vsel %vm1571_vm4, %v7144_v18, %v1507_v39  ;;  %v726_v57 = vpop.f32.mrf.mxu0  ;;  %v799_v18 = vpop.f32.mrf.mxu1 }
 0x16d   :  { %v4180_v8 = vpop.eup %4179  ;;  %vm1576_vm6 = vcmp.gt.f32.partialorder %v5342_v35, 20.0  ;;  %v1040_v59 = vmul.f32 1.442695, %v953_v36  ;;  %v1699_v2 = vpack.c.bf16 %v1639_v14, %v1635_v48  ;;  %v5566_v50 = vadd.f32 %v5132_v44, %v723_v16 }
 0x16e   :  { %v5569_v7 = vadd.f32 %v4953_v17, %v796_v25  ;;  %v1136_v52 = vadd.f32 1.0, %v4170_v9  ;;  %4197 = vpow2.f32 %v1038_v6  ;;  %v5572_v47 = vadd.f32 %v5140_v60, %v725_v55  ;;  %v5575_v39 = vpop.eup %4181  ;;  %v7166_v6 = vld [vmem:[#allocation8_spill] sm:$0xff] }
 0x16f   :  { %7160 = vst [vmem:[#allocation44_spill] sm:$0xff] %v5566_v50  ;;  %v798_v1 = vadd.f32 %v797_v58, %v7162_v30  ;;  %v3592_v54 = vadd.f32 -1.0, %v1230_v10  ;;  %v1422_v36 = vadd.f32 1.0, %v1230_v10  ;;  %2158 = vmatprep.mubr.bf16.mxu0 %v1699_v2  ;;  %v986_v48 = vmin.f32 %v5566_v50, 20.0 }
 0x170   :  { %7161 = vst [vmem:[#allocation45_spill] sm:$0xff] %v5569_v7  ;;  %v956_v26 = vmin.f32 %v5569_v7, 20.0  ;;  %v5579_v16 = vpop.eup %4183  ;;  %v1167_v9 = vadd.f32 1.0, %v4174_v33  ;;  %v1137_v14 = vadd.f32 1.0, %v4180_v8  ;;  %4199 = vpow2.f32 %v1100_v15  ;;  %v5599_v33 = vpop.f32.mrf.mxu1 }
 0x171   :  { %7163 = vst [vmem:[#allocation6_spill] sm:$0xff] %v5579_v16  ;;  %v7164_v29 = vpack.c.bf16 %v5377_v21, %v5306_v20  ;;  %v987_v58 = vmin.f32 %v5572_v47, 20.0  ;;  %v5585_v25 = vpop.eup %4185  ;;  %4201 = vpow2.f32 %v1040_v59  ;;  %v1106_v10 = vmul.f32 1.442695, %v986_v48 }
 0x172   :  { %7165 = vst [vmem:[#allocation14_spill] sm:$0xff] %v5585_v25  ;;  %v5588_v55 = vadd.f32 %v4969_v23, %v798_v1  ;;  %v727_v2 = vadd.f32 %v726_v57, %v7166_v6  ;;  %v4188_v30 = vpop.eup %4187  ;;  %v5595_v8 = vsel %vm1572_vm5, %v5295_v27, %v5509_v45  ;;  %v1512_v20 = vmul.f32 %v4176_v38, %v5471_v51  ;;  %v728_v51 = vpop.f32.mrf.mxu0 }
 0x173   :  { %2159 = vmatmul.mubr.bf16.vlgmr.msra.gmra.mxu0 %v7164_v29  ;;  %4203 = vrcp.f32 %v5518_v24  ;;  %v1200_v21 = vmul.f32 %v1136_v52, %v1136_v52  ;;  %v5603_v15 = vmul.f32 %v5525_v46, %v5394_v19  ;;  %v5607_v59 = vmul.f32 %v3592_v54, %v5412_v41 }
 0x174   :  { %4205 = vrcp.f32 %v5532_v43  ;;  %v1046_v1 = vmul.f32 1.442695, %v956_v26  ;;  %v4190_v57 = vpop.eup %4189  ;;  %v1231_v27 = vmul.f32 %v1167_v9, %v1167_v9  ;;  %v1201_v45 = vmul.f32 %v1137_v14, %v1137_v14  ;;  %v7170_v26 = vld [vmem:[#allocation16_spill] sm:$0xff]  ;;  %v5619_v14 = vpop.f32.mrf.mxu1 }
 0x175   :  { %7167 = vst [vmem:[#allocation7_spill] sm:$0xff] %v5603_v15  ;;  %7168 = vst [vmem:[#allocation15_spill] sm:$0xff] %v5607_v59  ;;  %4207 = vrcp.f32 %v1422_v36  ;;  %v1108_v38 = vmul.f32 1.442695, %v987_v58  ;;  %v4192_v24 = vpop.eup %4191  ;;  %v1170_v52 = vadd.f32 1.0, %v4188_v30  ;;  %v957_v48 = vmin.f32 %v5588_v55, 20.0 }
 0x176   :  { %4209 = vpow2.f32 %v1106_v10  ;;  %v5611_v46 = vadd.f32 %v5132_v44, %v727_v2  ;;  %v4194_v29 = vpop.eup %4193  ;;  %v5616_v43 = vsel %vm1576_vm6, %v5342_v35, %v1512_v20  ;;  %v3562_v54 = vadd.f32 -1.0, %v1200_v21  ;;  %v7171_v10 = vld [vmem:[#allocation9_spill] sm:$0xff] }
 0x177   :  { %v1392_v36 = vadd.f32 1.0, %v1200_v21  ;;  %v800_v9 = vadd.f32 %v799_v18, %v7170_v26  ;;  %v1140_v58 = vadd.f32 1.0, %v4190_v57  ;;  %v1171_v6 = vadd.f32 1.0, %v4192_v24  ;;  %v7176_v15 = vld [vmem:[#allocation17_spill] sm:$0xff] }
 0x178   :  { %7169 = vst [vmem:[#allocation8_spill] sm:$0xff] %v5611_v46  ;;  %4211 = vpow2.f32 %v1046_v1  ;;  %v729_v30 = vadd.f32 %v728_v51, %v7171_v10  ;;  %v3593_v25 = vadd.f32 -1.0, %v1231_v27  ;;  %v1423_v44 = vadd.f32 1.0, %v1231_v27  ;;  %v5631_v51 = vpop.f32.mrf.mxu1 }
 0x179   :  { %v1141_v2 = vadd.f32 1.0, %v4194_v29  ;;  %4213 = vpow2.f32 %v1108_v38  ;;  %v4196_v41 = vpop.eup %4195  ;;  %v3563_v59 = vadd.f32 -1.0, %v1201_v45  ;;  %v1234_v16 = vmul.f32 %v1170_v52, %v1170_v52 }
 0x17a   :  { %v1048_v35 = vmul.f32 1.442695, %v957_v48  ;;  %v990_v20 = vmin.f32 %v5611_v46, 20.0  ;;  %v5626_v21 = vmul.f32 %v3562_v54, %v5426_v3  ;;  %v1393_v57 = vadd.f32 1.0, %v1201_v45 }
 0x17b   :  { %v5629_v1 = vadd.f32 %v4953_v17, %v800_v9  ;;  %v4198_v27 = vpop.eup %4197  ;;  %4215 = vrcp.f32 %v1392_v36  ;;  %v1204_v38 = vmul.f32 %v1140_v58, %v1140_v58  ;;  %v1235_v24 = vmul.f32 %v1171_v6, %v1171_v6  ;;  %v5643_v6 = vpop.f32.mrf.mxu1 }
 0x17c   :  { %7172 = vst [vmem:[#allocation16_spill] sm:$0xff] %v5626_v21  ;;  %v5634_v52 = vadd.f32 %v5140_v60, %v729_v30  ;;  %v5637_v48 = vmul.f32 %v3593_v25, %v5429_v63  ;;  %4217 = vrcp.f32 %v1423_v44  ;;  %v1205_v29 = vmul.f32 %v1141_v2, %v1141_v2 }
 0x17d   :  { %7173 = vst [vmem:[#allocation9_spill] sm:$0xff] %v5629_v1  ;;  %v1174_v54 = vadd.f32 1.0, %v4196_v41  ;;  %v4200_v26 = vpop.eup %4199  ;;  %v5640_v45 = vmul.f32 %v3563_v59, %v5451_v49  ;;  %v3596_v9 = vadd.f32 -1.0, %v1234_v16  ;;  %4219 = vpow2.f32 %v1048_v35 }
 0x17e   :  { %v1114_v10 = vmul.f32 1.442695, %v990_v20  ;;  %v4202_v18 = vpop.eup %4201  ;;  %4221 = vrcp.f32 %v1393_v57  ;;  %v1426_v36 = vadd.f32 1.0, %v1234_v16  ;;  %v1144_v58 = vadd.f32 1.0, %v4198_v27 }
 0x17f   :  { %7174 = vst [vmem:[#allocation89_spill] sm:$0xff] %v5640_v45  ;;  %v960_v60 = vmin.f32 %v5629_v1, 20.0  ;;  %v3566_v30 = vadd.f32 -1.0, %v1204_v38  ;;  %v1396_v44 = vadd.f32 1.0, %v1204_v38  ;;  %v3597_v41 = vadd.f32 -1.0, %v1235_v24 }
 0x180   :  { %v5645_v25 = vpop.eup %4203  ;;  %v991_v2 = vmin.f32 %v5634_v52, 20.0  ;;  %v1427_v3 = vadd.f32 1.0, %v1235_v24  ;;  %v3567_v35 = vadd.f32 -1.0, %v1205_v29  ;;  %v1238_v20 = vmul.f32 %v1174_v54, %v1174_v54  ;;  %v5659_v24 = vpop.f32.mrf.mxu1 }
 0x181   :  { %v5648_v59 = vpop.eup %4205  ;;  %v1175_v21 = vadd.f32 1.0, %v4200_v26  ;;  %v5653_v16 = vmul.f32 %v3596_v9, %v5477_v53  ;;  %v1397_v27 = vadd.f32 1.0, %v1205_v29  ;;  %v1145_v49 = vadd.f32 1.0, %v4202_v18  ;;  %v7178_v53 = vld [vmem:[#allocation26_spill] sm:$0xff] }
 0x182   :  { %v5650_v57 = vpop.eup %4207  ;;  %4223 = vpow2.f32 %v1114_v10  ;;  %v1208_v38 = vmul.f32 %v1144_v58, %v1144_v58  ;;  %v1054_v45 = vmul.f32 1.442695, %v960_v60  ;;  %v802_v63 = vadd.f32 %v5599_v33, %v7176_v15 }
 0x183   :  { %7175 = vst [vmem:[#allocation90_spill] sm:$0xff] %v5653_v16  ;;  %v4210_v19 = vpop.eup %4209  ;;  %4225 = vrcp.f32 %v1426_v36  ;;  %v5662_v54 = vmul.f32 %v3566_v30, %v5488_v5  ;;  %v5665_v18 = vmul.f32 %v3597_v41, %v5491_v62  ;;  %v1116_v29 = vmul.f32 1.442695, %v991_v2 }
 0x184   :  { %4227 = vrcp.f32 %v1396_v44  ;;  %v5668_v9 = vmul.f32 %v3567_v35, %v5494_v0  ;;  %v3600_v33 = vadd.f32 -1.0, %v1238_v20  ;;  %v1239_v15 = vmul.f32 %v1175_v21, %v1175_v21  ;;  %v7209_v0 = vld [vmem:[#allocation25_spill] sm:$0xff] }
 0x185   :  { %7177 = vst [vmem:[#allocation17_spill] sm:$0xff] %v5662_v54  ;;  %v4212_v26 = vpop.eup %4211  ;;  %4229 = vrcp.f32 %v1427_v3  ;;  %v1430_v36 = vadd.f32 1.0, %v1238_v20  ;;  %v1209_v58 = vmul.f32 %v1145_v49, %v1145_v49  ;;  %v1178_v60 = vadd.f32 1.0, %v4210_v19  ;;  %v5675_v3 = vpop.f32.mrf.mxu1  ;;  %v7179_v49 = vld [vmem:[#allocation59_spill] sm:$0xff] }
 0x186   :  { %v4214_v10 = vpop.eup %4213  ;;  %4231 = vrcp.f32 %v1397_v27  ;;  %vm1578_vm9 = vcmp.gt.f32.partialorder %v7178_v53, 20.0  ;;  %v3570_v30 = vadd.f32 -1.0, %v1208_v38  ;;  %v1400_v44 = vadd.f32 1.0, %v1208_v38 }
 0x187   :  { %4233 = vpow2.f32 %v1054_v45  ;;  %v5673_v41 = vadd.f32 %v4969_v23, %v802_v63  ;;  %v1148_v2 = vadd.f32 1.0, %v4212_v26  ;;  %v1515_v21 = vmul.f32 %v5354_v12, %v5280_v31  ;;  %v7182_v12 = vld [vmem:[#allocation46_spill] sm:$0xff] }
 0x188   :  { %4235 = vpow2.f32 %v1116_v29  ;;  %v1519_v19 = vmul.f32 %v7179_v49, %v5299_v40  ;;  %v5681_v35 = vpop.eup %4215  ;;  %v5684_v20 = vmul.f32 %v3600_v33, %v5528_v42  ;;  %v3601_v27 = vadd.f32 -1.0, %v1239_v15  ;;  %v7183_v49 = vld [vmem:[#allocation54_spill] sm:$0xff]  ;;  %v5694_v42 = vpop.f32.mrf.mxu1 }
 0x189   :  { %v1431_v45 = vadd.f32 1.0, %v1239_v15  ;;  %v1179_v38 = vadd.f32 1.0, %v4214_v10  ;;  %v5686_v63 = vpop.eup %4217  ;;  %4237 = vrcp.f32 %v1430_v36  ;;  %v3571_v5 = vadd.f32 -1.0, %v1209_v58 }
 0x18a   :  { %7180 = vst [vmem:[#allocation26_spill] sm:$0xff] %v5684_v20  ;;  %v1401_v26 = vadd.f32 1.0, %v1209_v58  ;;  %v1242_v29 = vmul.f32 %v1178_v60, %v1178_v60  ;;  %v4220_v54 = vpop.eup %4219  ;;  %v5689_v31 = vmul.f32 %v3570_v30, %v5539_v32  ;;  %4239 = vrcp.f32 %v1400_v44  ;;  %v7184_v60 = vld [vmem:[#allocation48_spill] sm:$0xff]  ;;  %v7185_v30 = vld [vmem:[#allocation58_spill] sm:$0xff] }
 0x18b   :  { %v961_v40 = vmin.f32 %v5673_v41, 20.0  ;;  %v1514_v33 = vmul.f32 %v7183_v49, %v7182_v12  ;;  %v5696_v15 = vpop.eup %4221  ;;  %v1212_v10 = vmul.f32 %v1148_v2, %v1148_v2  ;;  %v1643_v36 = vsel %vm1579_vm7, %v5179_v34, %v1515_v21  ;;  %v7187_v34 = vld [vmem:[#allocation33_spill] sm:$0xff] }
 0x18c   :  { %7181 = vst [vmem:[#allocation59_spill] sm:$0xff] %v5689_v31  ;;  %v1647_v58 = vsel %vm1583_vm8, %v5194_v61, %v1519_v19  ;;  %v1518_v44 = vmul.f32 %v7185_v30, %v7184_v60  ;;  %v5707_v32 = vmul.f32 %v3601_v27, %v5542_v56  ;;  %4241 = vrcp.f32 %v1431_v45  ;;  %v7188_v27 = vld [vmem:[#allocation18_spill] sm:$0xff]  ;;  %v819_v45 = vpop.f32.mrf.mxu1 }
 0x18d   :  { %v1243_v12 = vmul.f32 %v1179_v38, %v1179_v38  ;;  %v1703_v49 = vpack.c.bf16 %v1647_v58, %v1643_v36  ;;  %v5710_v31 = vmul.f32 %v3571_v5, %v5546_v13  ;;  %4243 = vrcp.f32 %v1401_v26  ;;  %v7207_v13 = vld [vmem:[#allocation70_spill] sm:$0xff] }
 0x18e   :  { %v3604_v2 = vadd.f32 -1.0, %v1242_v29  ;;  %v1149_v20 = vadd.f32 1.0, %v4220_v54  ;;  %vm1587_vm11 = vcmp.gt.f32.partialorder %v7187_v34, 20.0  ;;  %v1434_v16 = vadd.f32 1.0, %v1242_v29 }
 0x18f   :  { %7186 = vst [vmem:[#allocation46_spill] sm:$0xff] %v5710_v31  ;;  %v4224_v21 = vpop.eup %4223  ;;  %2168 = vmatprep.mubr.bf16.mxu0 %v1703_v49  ;;  %v1642_v61 = vsel %vm1578_vm9, %v7178_v53, %v1514_v33  ;;  %v1646_v19 = vsel %vm1582_vm10, %v5187_v28, %v1518_v44  ;;  %v806_v5 = vadd.f32 %v5619_v14, %v7188_v27  ;;  %v3574_v54 = vadd.f32 -1.0, %v1212_v10  ;;  %v7192_v28 = vld [vmem:[#allocation19_spill] sm:$0xff]  ;;  %v7194_v44 = vld [vmem:[#allocation34_spill] sm:$0xff] }
 0x190   :  { %v5721_v38 = vpop.eup %4225  ;;  %v1404_v26 = vadd.f32 1.0, %v1212_v10  ;;  %v1056_v36 = vmul.f32 1.442695, %v961_v40  ;;  %v1702_v58 = vpack.c.bf16 %v1646_v19, %v1642_v61  ;;  %v5725_v60 = vadd.f32 -1.0, %v1243_v12  ;;  %v7193_v14 = vld [vmem:[#allocation31_spill] sm:$0xff]  ;;  %v7195_v61 = vld [vmem:[#allocation20_spill] sm:$0xff] }
 0x191   :  { %7189 = vst [vmem:[#allocation54_spill] sm:$0xff] %v5721_v38  ;;  %v5723_v29 = vpop.eup %4227  ;;  %v5727_v30 = vadd.f32 1.0, %v1243_v12  ;;  %v5730_v53 = vadd.f32 %v4953_v17, %v806_v5  ;;  %v808_v33 = vadd.f32 %v5631_v51, %v7192_v28  ;;  %vm1586_vm12 = vcmp.gt.f32.partialorder %v7193_v14, 20.0  ;;  %v7196_v12 = vld [vmem:[#allocation22_spill] sm:$0xff]  ;;  %v7206_v38 = vld [vmem:[#allocation61_spill] sm:$0xff] }
 0x192   :  { %7190 = vst [vmem:[#allocation48_spill] sm:$0xff] %v5723_v29  ;;  %vm1590_vm13 = vcmp.gt.f32.partialorder %v7194_v44, 20.0  ;;  %v5736_v49 = vpop.eup %4229  ;;  %v1213_v40 = vmul.f32 %v1149_v20, %v1149_v20  ;;  %v1182_v10 = vadd.f32 1.0, %v4224_v21  ;;  %2169 = vmatmul.mubr.bf16.gmra.mxu0 %v1702_v58  ;;  %v810_v19 = vadd.f32 %v5643_v6, %v7195_v61  ;;  %v821_v20 = vpop.f32.mrf.mxu1 }
 0x193   :  { %7191 = vst [vmem:[#allocation58_spill] sm:$0xff] %v5730_v53  ;;  %v812_v27 = vadd.f32 %v5659_v24, %v7196_v12  ;;  %v5742_v5 = vpop.eup %4231  ;;  %v5745_v29 = vmul.f32 %v3604_v2, %v5566_v50  ;;  %4245 = vrcp.f32 %v1434_v16  ;;  %v964_v51 = vmin.f32 %v5730_v53, 20.0  ;;  %v7201_v12 = vld [vmem:[#allocation56_spill] sm:$0xff] }
 0x194   :  { %v5749_v28 = vadd.f32 %v4969_v23, %v808_v33  ;;  %v4234_v21 = vpop.eup %4233  ;;  %v5752_v58 = vmul.f32 %v3574_v54, %v5569_v7  ;;  %4247 = vpow2.f32 %v1056_v36  ;;  %v5755_v6 = vadd.f32 %v4953_v17, %v810_v19  ;;  %v7202_v36 = vld [vmem:[#allocation37_spill] sm:$0xff]  ;;  %v7203_v19 = vld [vmem:[#allocation52_spill] sm:$0xff] }
 0x195   :  { %7197 = vst [vmem:[#allocation33_spill] sm:$0xff] %v5745_v29  ;;  %v5758_v24 = vadd.f32 %v4969_v23, %v812_v27  ;;  %v4236_v2 = vpop.eup %4235  ;;  %v1062_v61 = vmul.f32 1.442695, %v964_v51  ;;  %v1523_v33 = vmul.f32 %v5416_v11, %v7201_v12  ;;  %v1527_v50 = vmul.f32 %v5448_v37, %v5405_v22  ;;  %v825_v12 = vpop.f32.mrf.mxu1 }
 0x196   :  { %7198 = vst [vmem:[#allocation18_spill] sm:$0xff] %v5749_v28  ;;  %7199 = vst [vmem:[#allocation19_spill] sm:$0xff] %v5752_v58  ;;  %v965_v16 = vmin.f32 %v5749_v28, 20.0  ;;  %4249 = vrcp.f32 %v1404_v26  ;;  %v968_v54 = vmin.f32 %v5755_v6, 20.0  ;;  %vm1591_vm14 = vcmp.gt.f32.partialorder %v7202_v36, 20.0  ;;  %v5769_v27 = vpop.eup %4237 }
 0x197   :  { %7200 = vst [vmem:[#allocation31_spill] sm:$0xff] %v5755_v6  ;;  %v1522_v7 = vmul.f32 %v5408_v4, %v7203_v19  ;;  %7204 = vst [vmem:[#allocation34_spill] sm:$0xff] %v5769_v27  ;;  %4251 = vpow2.f32 %v1062_v61  ;;  %v1651_v58 = vsel %vm1587_vm11, %v7187_v34, %v1523_v33  ;;  %v1655_v11 = vsel %vm1591_vm14, %v7202_v36, %v1527_v50  ;;  %v5775_v22 = vpop.eup %4239  ;;  %v827_v36 = vpop.f32.mrf.mxu1 }
 0x198   :  { %v1064_v51 = vmul.f32 1.442695, %v965_v16  ;;  %7205 = vst [vmem:[#allocation20_spill] sm:$0xff] %v5775_v22  ;;  %v1070_v37 = vmul.f32 1.442695, %v968_v54  ;;  %v969_v26 = vmin.f32 %v5758_v24, 20.0  ;;  %v1707_v29 = vpack.c.bf16 %v1655_v11, %v1651_v58 }
 0x199   :  { %v1526_v4 = vmul.f32 %v7207_v13, %v7206_v38  ;;  %v5780_v19 = vadd.f32 -1.0, %v1213_v40  ;;  %v1246_v61 = vmul.f32 %v1182_v10, %v1182_v10  ;;  %v7208_v16 = vld [vmem:[#allocation23_spill] sm:$0xff]  ;;  %v818_v34 = vadd.f32 %v5694_v42, %v7209_v0  ;;  %v5786_v50 = vpop.eup %4241  ;;  %v7214_v42 = vld [vmem:[#allocation28_spill] sm:$0xff] }
 0x19a   :  { %v816_v27 = vadd.f32 %v5675_v3, %v7208_v16  ;;  %4253 = vpow2.f32 %v1064_v51  ;;  %2178 = vmatprep.mubr.bf16.mxu0 %v1707_v29  ;;  %v1650_v58 = vsel %vm1586_vm12, %v7193_v14, %v1522_v7  ;;  %v7210_v38 = vld [vmem:[#allocation27_spill] sm:$0xff]  ;;  %v5795_v33 = vpop.eup %4243  ;;  %v822_v29 = vadd.f32 %v821_v20, %v7214_v42  ;;  %v7216_v11 = vld [vmem:[#allocation76_spill] sm:$0xff] }
 0x19b   :  { %v1654_v13 = vsel %vm1590_vm13, %v7194_v44, %v1526_v4  ;;  %v820_v10 = vadd.f32 %v819_v45, %v7210_v38  ;;  %7211 = vst [vmem:[#allocation22_spill] sm:$0xff] %v5795_v33  ;;  %v5801_v0 = vadd.f32 %v4969_v23, %v818_v34  ;;  %v1152_v51 = vadd.f32 1.0, %v4234_v21  ;;  %v7215_v14 = vld [vmem:[#allocation67_spill] sm:$0xff] }
 0x19c   :  { %v1706_v3 = vpack.c.bf16 %v1654_v13, %v1650_v58  ;;  %v5798_v54 = vadd.f32 %v4953_v17, %v816_v27  ;;  %4255 = vpow2.f32 %v1070_v37  ;;  %v1072_v7 = vmul.f32 1.442695, %v969_v26  ;;  %v7217_v27 = vld [vmem:[#allocation72_spill] sm:$0xff]  ;;  %v7218_v58 = vld [vmem:[#allocation10_spill] sm:$0xff]  ;;  %v7220_v21 = vld [vmem:[#allocation47_spill] sm:$0xff] }
 0x19d   :  { %7213 = vst [vmem:[#allocation37_spill] sm:$0xff] %v5801_v0  ;;  %v1531_v44 = vmul.f32 %v7216_v11, %v7215_v14  ;;  %v1405_v4 = vadd.f32 1.0, %v1213_v40  ;;  %v973_v16 = vmin.f32 %v5801_v0, 20.0  ;;  %v1535_v13 = vmul.f32 %v7218_v58, %v7217_v27  ;;  %v7221_v40 = vld [vmem:[#allocation41_spill] sm:$0xff]  ;;  %v7226_v0 = vld [vmem:[#allocation79_spill] sm:$0xff] }
 0x19e   :  { %7212 = vst [vmem:[#allocation56_spill] sm:$0xff] %v5798_v54  ;;  %2179 = vmatmul.mubr.bf16.gmra.mxu0 %v1706_v3  ;;  %v972_v45 = vmin.f32 %v5798_v54, 20.0  ;;  %4257 = vrcp.f32 %v5727_v30  ;;  %v3608_v34 = vadd.f32 -1.0, %v1246_v61  ;;  %v5812_v20 = vadd.f32 %v4953_v17, %v820_v10  ;;  %v829_v3 = vpop.f32.mrf.mxu1  ;;  %v7223_v54 = vld [vmem:[#allocation66_spill] sm:$0xff] }
 0x19f   :  { %vm1599_vm15 = vcmp.gt.f32.partialorder %v7220_v21, 20.0  ;;  %v1183_v37 = vadd.f32 1.0, %v4236_v2  ;;  %v5816_v26 = vadd.f32 %v4969_v23, %v822_v29  ;;  %vm1595_vm0 = vcmp.gt.f32.partialorder %v7221_v40, 20.0  ;;  %v7224_v2 = vld [vmem:[#allocation75_spill] sm:$0xff] }
 0x1a0   :  { %7219 = vst [vmem:[#allocation52_spill] sm:$0xff] %v5812_v20  ;;  %v1663_v38 = vsel %vm1599_vm15, %v7220_v21, %v1535_v13  ;;  %v5820_v42 = vpop.eup %4245  ;;  %v1216_v14 = vmul.f32 %v1152_v51, %v1152_v51  ;;  %4259 = vpow2.f32 %v1072_v7  ;;  %v1078_v30 = vmul.f32 1.442695, %v972_v45  ;;  %v7225_v29 = vld [vmem:[#allocation71_spill] sm:$0xff]  ;;  %v7227_v21 = vld [vmem:[#allocation38_spill] sm:$0xff] }
 0x1a1   :  { %7222 = vst [vmem:[#allocation61_spill] sm:$0xff] %v5820_v42  ;;  %v1659_v11 = vsel %vm1595_vm0, %v7221_v40, %v1531_v44  ;;  %v4248_v10 = vpop.eup %4247  ;;  %v1080_v27 = vmul.f32 1.442695, %v973_v16  ;;  %v1530_v22 = vmul.f32 %v7224_v2, %v7223_v54  ;;  %v1534_v33 = vmul.f32 %v7226_v0, %v7225_v29  ;;  %v7228_v42 = vld [vmem:[#allocation43_spill] sm:$0xff]  ;;  %v7230_v54 = vld [vmem:[#allocation29_spill] sm:$0xff]  ;;  %v831_v40 = vpop.f32.mrf.mxu1 }
 0x1a2   :  { %v1711_v58 = vpack.c.bf16 %v1663_v38, %v1659_v11  ;;  %v1438_v31 = vadd.f32 1.0, %v1246_v61  ;;  %v976_v13 = vmin.f32 %v5812_v20, 20.0  ;;  %vm1594_vm1 = vcmp.gt.f32.partialorder %v7227_v21, 20.0  ;;  %v7231_v11 = vld [vmem:[#allocation30_spill] sm:$0xff] }
 0x1a3   :  { %vm1598_vm2 = vcmp.gt.f32.partialorder %v7228_v42, 20.0  ;;  %v5830_v51 = vpop.eup %4249  ;;  %v977_v7 = vmin.f32 %v5816_v26, 20.0  ;;  %v1658_v44 = vsel %vm1594_vm1, %v7227_v21, %v1530_v22  ;;  %v826_v16 = vadd.f32 %v825_v12, %v7230_v54 }
 0x1a4   :  { %7229 = vst [vmem:[#allocation70_spill] sm:$0xff] %v5830_v51  ;;  %2188 = vmatprep.mubr.bf16.mxu0 %v1711_v58  ;;  %v1662_v45 = vsel %vm1598_vm2, %v7228_v42, %v1534_v33  ;;  %v4252_v0 = vpop.eup %4251  ;;  %v1247_v61 = vmul.f32 %v1183_v37, %v1183_v37  ;;  %4261 = vpow2.f32 %v1078_v30  ;;  %v828_v2 = vadd.f32 %v827_v36, %v7231_v11  ;;  %v7234_v33 = vld [vmem:[#allocation32_spill] sm:$0xff]  ;;  %v7235_v42 = vld [vmem:[#allocation35_spill] sm:$0xff] }
 0x1a5   :  { %v1710_v38 = vpack.c.bf16 %v1662_v45, %v1658_v44  ;;  %v1408_v29 = vadd.f32 1.0, %v1216_v14  ;;  %v1153_v20 = vadd.f32 1.0, %v4248_v10  ;;  %4263 = vpow2.f32 %v1080_v27 }
 0x1a6   :  { %v5838_v51 = vadd.f32 %v4953_v17, %v826_v16  ;;  %v1086_v58 = vmul.f32 1.442695, %v976_v13  ;;  %v5841_v22 = vadd.f32 %v4969_v23, %v828_v2  ;;  %v830_v12 = vadd.f32 %v829_v3, %v7234_v33  ;;  %v7240_v2 = vld [vmem:[#allocation81_spill] sm:$0xff] }
 0x1a7   :  { %2189 = vmatmul.mubr.bf16.gmra.mxu0 %v1710_v38  ;;  %v832_v21 = vadd.f32 %v831_v40, %v7235_v42  ;;  %v4254_v37 = vpop.eup %4253  ;;  %4265 = vrcp.f32 %v1405_v4  ;;  %v1156_v30 = vadd.f32 1.0, %v4252_v0  ;;  %v1088_v44 = vmul.f32 1.442695, %v977_v7  ;;  %v7238_v38 = vld [vmem:[#allocation77_spill] sm:$0xff] }
 0x1a8   :  { %7232 = vst [vmem:[#allocation23_spill] sm:$0xff] %v5838_v51  ;;  %7233 = vst [vmem:[#allocation25_spill] sm:$0xff] %v5841_v22  ;;  %v980_v36 = vmin.f32 %v5838_v51, 20.0  ;;  %v5848_v10 = vmul.f32 %v5725_v60, %v5572_v47  ;;  %v5852_v27 = vmul.f32 %v5780_v19, %v5588_v55  ;;  %v5855_v13 = vmul.f32 %v3608_v34, %v5611_v46 }
 0x1a9   :  { %4267 = vrcp.f32 %v1438_v31  ;;  %v4256_v3 = vpop.eup %4255  ;;  %v1439_v45 = vadd.f32 1.0, %v1247_v61  ;;  %v1217_v4 = vmul.f32 %v1153_v20, %v1153_v20  ;;  %v981_v7 = vmin.f32 %v5841_v22, 20.0  ;;  %v7239_v20 = vld [vmem:[#allocation84_spill] sm:$0xff] }
 0x1aa   :  { %4269 = vrcp.f32 %v1408_v29  ;;  %v1094_v54 = vmul.f32 1.442695, %v980_v36  ;;  %v5859_v16 = vadd.f32 %v4953_v17, %v830_v12  ;;  %v5862_v60 = vadd.f32 %v4969_v23, %v832_v21  ;;  %v7241_v29 = vld [vmem:[#allocation13_spill] sm:$0xff]  ;;  %v835_v36 = vpop.f32.mrf.mxu1 }
 0x1ab   :  { %4271 = vpow2.f32 %v1086_v58  ;;  %v5864_v19 = vpop.eup %4257  ;;  %v3578_v40 = vadd.f32 -1.0, %v1216_v14  ;;  %v1220_v34 = vmul.f32 %v1156_v30, %v1156_v30  ;;  %v1157_v0 = vadd.f32 1.0, %v4254_v37  ;;  %v7242_v30 = vld [vmem:[#allocation50_spill] sm:$0xff] }
 0x1ac   :  { %7236 = vst [vmem:[#allocation27_spill] sm:$0xff] %v5859_v16  ;;  %7237 = vst [vmem:[#allocation28_spill] sm:$0xff] %v5862_v60  ;;  %4273 = vpow2.f32 %v1088_v44  ;;  %v1160_v31 = vadd.f32 1.0, %v4256_v3  ;;  %v1539_v11 = vmul.f32 %v7239_v20, %v7238_v38  ;;  %v1543_v58 = vmul.f32 %v7241_v29, %v7240_v2  ;;  %v7243_v38 = vld [vmem:[#allocation55_spill] sm:$0xff]  ;;  %v837_v22 = vpop.f32.mrf.mxu1 }
 0x1ad   :  { %4275 = vpow2.f32 %v1094_v54  ;;  %v4260_v33 = vpop.eup %4259  ;;  %v3609_v12 = vadd.f32 -1.0, %v1247_v61  ;;  %v3579_v42 = vadd.f32 -1.0, %v1217_v4  ;;  %v1096_v21 = vmul.f32 1.442695, %v981_v7 }
 0x1ae   :  { %4277 = vrcp.f32 %v1439_v45  ;;  %v1409_v51 = vadd.f32 1.0, %v1217_v4  ;;  %v984_v14 = vmin.f32 %v5859_v16, 20.0  ;;  %v985_v37 = vmin.f32 %v5862_v60, 20.0  ;;  %v7246_v60 = vld [vmem:[#allocation85_spill] sm:$0xff] }
 0x1af   :  { %vm1603_vm3 = vcmp.gt.f32.partialorder %v7242_v30, 20.0  ;;  %v3582_v44 = vadd.f32 -1.0, %v1220_v34  ;;  %v1412_v3 = vadd.f32 1.0, %v1220_v34  ;;  %v1221_v54 = vmul.f32 %v1157_v0, %v1157_v0 }
 0x1b0   :  { %vm1607_vm4 = vcmp.gt.f32.partialorder %v7243_v38, 20.0  ;;  %v1224_v20 = vmul.f32 %v1160_v31, %v1160_v31  ;;  %v1161_v2 = vadd.f32 1.0, %v4260_v33  ;;  %v1667_v61 = vsel %vm1603_vm3, %v7242_v30, %v1539_v11  ;;  %v7245_v33 = vld [vmem:[#allocation78_spill] sm:$0xff] }
 0x1b1   :  { %v1671_v45 = vsel %vm1607_vm4, %v7243_v38, %v1543_v58  ;;  %v4262_v7 = vpop.eup %4261  ;;  %v5877_v4 = vmul.f32 %v3578_v40, %v5629_v1  ;;  %v5880_v29 = vmul.f32 %v3609_v12, %v5634_v52  ;;  %4279 = vpow2.f32 %v1096_v21  ;;  %v7247_v30 = vld [vmem:[#allocation86_spill] sm:$0xff] }
 0x1b2   :  { %v1715_v16 = vpack.c.bf16 %v1671_v45, %v1667_v61  ;;  %v4264_v34 = vpop.eup %4263  ;;  %v5883_v0 = vmul.f32 %v3579_v42, %v5673_v41  ;;  %v1104_v31 = vmul.f32 1.442695, %v985_v37  ;;  %v1509_v11 = vmul.f32 %v7246_v60, %v7245_v33  ;;  %v7250_v33 = vld [vmem:[#allocation51_spill] sm:$0xff] }
 0x1b3   :  { %7244 = vst [vmem:[#allocation67_spill] sm:$0xff] %v5877_v4  ;;  %v1513_v58 = vmul.f32 %v5575_v39, %v7247_v30  ;;  %4281 = vrcp.f32 %v1409_v51  ;;  %v5890_v40 = vmul.f32 %v3582_v44, %v5730_v53  ;;  %v3583_v12 = vadd.f32 -1.0, %v1221_v54  ;;  %v7251_v39 = vld [vmem:[#allocation57_spill] sm:$0xff]  ;;  %v839_v51 = vpop.f32.mrf.mxu1  ;;  %v7255_v4 = vld [vmem:[#allocation87_spill] sm:$0xff] }
 0x1b4   :  { %v1102_v38 = vmul.f32 1.442695, %v984_v14  ;;  %2198 = vmatprep.mubr.bf16.mxu0 %v1715_v16  ;;  %v5892_v21 = vpop.eup %4265  ;;  %4283 = vrcp.f32 %v1412_v3  ;;  %v1413_v61 = vadd.f32 1.0, %v1221_v54  ;;  %v3586_v42 = vadd.f32 -1.0, %v1224_v20  ;;  %v7252_v3 = vld [vmem:[#allocation73_spill] sm:$0xff]  ;;  %v7253_v54 = vld [vmem:[#allocation3_spill] sm:$0xff] }
 0x1b5   :  { %7248 = vst [vmem:[#allocation76_spill] sm:$0xff] %v5890_v40  ;;  %v1225_v45 = vmul.f32 %v1161_v2, %v1161_v2  ;;  %v1164_v1 = vadd.f32 1.0, %v4262_v7  ;;  %v1165_v60 = vadd.f32 1.0, %v4264_v34  ;;  %vm1573_vm5 = vcmp.gt.f32.partialorder %v7250_v33, 20.0  ;;  %v7254_v40 = vld [vmem:[#allocation80_spill] sm:$0xff] }
 0x1b6   :  { %v5894_v37 = vpop.eup %4267  ;;  %vm1577_vm6 = vcmp.gt.f32.partialorder %v7251_v39, 20.0  ;;  %4285 = vpow2.f32 %v1104_v31  ;;  %v1637_v16 = vsel %vm1573_vm5, %v7250_v33, %v1509_v11  ;;  %v1538_v30 = vmul.f32 %v7253_v54, %v7252_v3  ;;  %v7257_v3 = vld [vmem:[#allocation49_spill] sm:$0xff]  ;;  %v7258_v54 = vld [vmem:[#allocation36_spill] sm:$0xff] }
 0x1b7   :  { %7249 = vst [vmem:[#allocation72_spill] sm:$0xff] %v5894_v37  ;;  %v5898_v44 = vpop.eup %4269  ;;  %v1641_v14 = vsel %vm1577_vm6, %v7251_v39, %v1513_v58  ;;  %v5905_v53 = vmul.f32 %v3583_v12, %v5749_v28  ;;  %v1416_v7 = vadd.f32 1.0, %v1224_v20  ;;  %v1542_v46 = vmul.f32 %v7255_v4, %v7254_v40  ;;  %v7259_v28 = vld [vmem:[#allocation39_spill] sm:$0xff] }
 0x1b8   :  { %v4272_v2 = vpop.eup %4271  ;;  %v1701_v34 = vpack.c.bf16 %v1641_v14, %v1637_v16  ;;  %4287 = vrcp.f32 %v1413_v61  ;;  %v5910_v31 = vmul.f32 %v3586_v42, %v5755_v6  ;;  %v3587_v11 = vadd.f32 -1.0, %v1225_v45  ;;  %v841_v16 = vpop.f32.mrf.mxu1  ;;  %v7260_v61 = vld [vmem:[#allocation53_spill] sm:$0xff]  ;;  %v7263_v6 = vld [vmem:[#allocation42_spill] sm:$0xff] }
 0x1b9   :  { %v4274_v37 = vpop.eup %4273  ;;  %v1417_v33 = vadd.f32 1.0, %v1225_v45  ;;  %v1228_v39 = vmul.f32 %v1164_v1, %v1164_v1  ;;  %vm1602_vm7 = vcmp.gt.f32.partialorder %v7257_v3, 20.0  ;;  %v836_v12 = vadd.f32 %v835_v36, %v7258_v54 }
 0x1ba   :  { %7256 = vst [vmem:[#allocation10_spill] sm:$0xff] %v5910_v31  ;;  %v4276_v58 = vpop.eup %4275  ;;  %2271 = vmatprep.mubr.bf16.mxu1 %v1701_v34  ;;  %v838_v20 = vadd.f32 %v837_v22, %v7259_v28  ;;  %v1229_v4 = vmul.f32 %v1165_v60, %v1165_v60  ;;  %v1168_v40 = vadd.f32 1.0, %v4272_v2  ;;  %vm1606_vm8 = vcmp.gt.f32.partialorder %v7260_v61, 20.0  ;;  %v7262_v22 = vld [vmem:[#allocation40_spill] sm:$0xff] }
 0x1bb   :  { %v5915_v14 = vpop.eup %4277  ;;  %v1666_v42 = vsel %vm1602_vm7, %v7257_v3, %v1538_v30  ;;  %v7261_v45 = vpack.c.bf16 %v5616_v43, %v5595_v8  ;;  %v1670_v1 = vsel %vm1606_vm8, %v7260_v61, %v1542_v46  ;;  %v5924_v34 = vadd.f32 %v4953_v17, %v836_v12 }
 0x1bc   :  { %v5927_v28 = vadd.f32 %v4969_v23, %v838_v20  ;;  %v840_v36 = vadd.f32 %v839_v51, %v7262_v22  ;;  %v1169_v60 = vadd.f32 1.0, %v4274_v37  ;;  %v1172_v2 = vadd.f32 1.0, %v4276_v58 }
 0x1bd   :  { %2272 = vmatmul.mubr.bf16.vlgmr.msra.gmra.mxu1 %v7261_v45  ;;  %v1714_v54 = vpack.c.bf16 %v1670_v1, %v1666_v42  ;;  %v842_v31 = vadd.f32 %v841_v16, %v7263_v6  ;;  %4289 = vrcp.f32 %v1416_v7  ;;  %v1420_v30 = vadd.f32 1.0, %v1228_v39  ;;  %v7264_v42 = vld [vmem:[#allocation21_spill] sm:$0xff] }
 0x1be   :  { %v989_v8 = vmin.f32 %v5927_v28, 20.0  ;;  %v5933_v43 = vadd.f32 %v4953_v17, %v840_v36  ;;  %v4280_v46 = vpop.eup %4279  ;;  %v5936_v3 = vmul.f32 %v3587_v11, %v5758_v24  ;;  %4291 = vpow2.f32 %v1102_v38 }
 0x1bf   :  { %2199 = vmatmul.mubr.bf16.gmra.mxu0 %v1714_v54  ;;  %v988_v51 = vmin.f32 %v5924_v34, 20.0  ;;  %v5940_v37 = vadd.f32 %v4969_v23, %v842_v31  ;;  %4293 = vrcp.f32 %v1417_v33  ;;  %v1421_v6 = vadd.f32 1.0, %v1229_v4 }
 0x1c0   :  { %v1232_v7 = vmul.f32 %v1168_v40, %v1168_v40  ;;  %v1112_v58 = vmul.f32 1.442695, %v989_v8  ;;  %v5942_v12 = vpop.eup %4281  ;;  %v5944_v20 = vadd.f32 -1.0, %v1228_v39  ;;  %v1233_v17 = vmul.f32 %v1169_v60, %v1169_v60 }
 0x1c1   :  { %v5946_v16 = vmul.f32 %v1172_v2, %v1172_v2  ;;  %v992_v11 = vmin.f32 %v5933_v43, 20.0  ;;  %v5949_v38 = vpop.eup %4283  ;;  %4295 = vrcp.f32 %v1420_v30  ;;  %v1173_v61 = vadd.f32 1.0, %v4280_v46  ;;  %v7266_v30 = vld [vmem:[#allocation69_spill] sm:$0xff] }
 0x1c2   :  { %v1547_v23 = vmul.f32 %v5645_v25, %v7264_v42  ;;  %v1551_v31 = vmul.f32 %v5686_v63, %v5637_v48  ;;  %v1110_v33 = vmul.f32 1.442695, %v988_v51  ;;  %4297 = vpow2.f32 %v1112_v58  ;;  %v7270_v42 = vld [vmem:[#allocation74_spill] sm:$0xff] }
 0x1c3   :  { %v1118_v40 = vmul.f32 1.442695, %v992_v11  ;;  %v993_v39 = vmin.f32 %v5940_v37, 20.0  ;;  %v4286_v45 = vpop.eup %4285  ;;  %v5956_v1 = vadd.f32 -1.0, %v1229_v4  ;;  %4299 = vrcp.f32 %v1421_v6  ;;  %v7265_v4 = vld [vmem:[#allocation63_spill] sm:$0xff] }
 0x1c4   :  { %v5958_v22 = vadd.f32 -1.0, %v1232_v7  ;;  %v5960_v36 = vadd.f32 1.0, %v1232_v7  ;;  %v5962_v60 = vadd.f32 -1.0, %v1233_v17  ;;  %v5964_v2 = vadd.f32 1.0, %v1233_v17  ;;  %v7267_v7 = vld [vmem:[#allocation7_spill] sm:$0xff]  ;;  %v7268_v17 = vld [vmem:[#allocation89_spill] sm:$0xff] }
 0x1c5   :  { %v5967_v25 = vadd.f32 1.0, %v5946_v16  ;;  %v1120_v48 = vmul.f32 1.442695, %v993_v39  ;;  %v5969_v63 = vpop.eup %4287  ;;  %v5971_v54 = vmul.f32 %v1173_v61, %v1173_v61  ;;  %4301 = vpow2.f32 %v1118_v40  ;;  %v7269_v61 = vld [vmem:[#allocation64_spill] sm:$0xff]  ;;  %v7272_v39 = vld [vmem:[#allocation6_spill] sm:$0xff] }
 0x1c6   :  { %vm1611_vm9 = vcmp.gt.f32.partialorder %v7265_v4, 20.0  ;;  %vm1615_vm10 = vcmp.gt.f32.partialorder %v7266_v30, 20.0  ;;  %v1177_v8 = vadd.f32 1.0, %v4286_v45  ;;  %4303 = vpow2.f32 %v1110_v33  ;;  %v7271_v40 = vld [vmem:[#allocation4_spill] sm:$0xff]  ;;  %v7273_v33 = vld [vmem:[#allocation15_spill] sm:$0xff] }
 0x1c7   :  { %v1675_v46 = vsel %vm1611_vm9, %v7265_v4, %v1547_v23  ;;  %v1679_v51 = vsel %vm1615_vm10, %v7266_v30, %v1551_v31  ;;  %4305 = vpow2.f32 %v1120_v48  ;;  %v1517_v58 = vmul.f32 %v5648_v59, %v7267_v7  ;;  %v7274_v4 = vld [vmem:[#allocation60_spill] sm:$0xff]  ;;  %v7275_v59 = vld [vmem:[#allocation65_spill] sm:$0xff] }
 0x1c8   :  { %v1719_v6 = vpack.c.bf16 %v1679_v51, %v1675_v46  ;;  %v1521_v11 = vmul.f32 %v5696_v15, %v7268_v17  ;;  %vm1581_vm11 = vcmp.gt.f32.partialorder %v7269_v61, 20.0  ;;  %vm1585_vm12 = vcmp.gt.f32.partialorder %v7270_v42, 20.0  ;;  %v7276_v7 = vld [vmem:[#allocation24_spill] sm:$0xff]  ;;  %v7277_v17 = vld [vmem:[#allocation14_spill] sm:$0xff] }
 0x1c9   :  { %v1546_v45 = vmul.f32 %v7272_v39, %v7271_v40  ;;  %v1550_v23 = vmul.f32 %v5650_v57, %v7273_v33  ;;  %v1645_v31 = vsel %vm1581_vm11, %v7269_v61, %v1517_v58  ;;  %vm1610_vm13 = vcmp.gt.f32.partialorder %v7274_v4, 20.0  ;;  %v7278_v39 = vld [vmem:[#allocation16_spill] sm:$0xff] }
 0x1ca   :  { %2208 = vmatprep.mubr.bf16.mxu0 %v1719_v6  ;;  %v1649_v48 = vsel %vm1585_vm12, %v7270_v42, %v1521_v11  ;;  %vm1614_vm14 = vcmp.gt.f32.partialorder %v7275_v59, 20.0  ;;  %v5991_v15 = vpop.eup %4289  ;;  %v1516_v40 = vmul.f32 %v7277_v17, %v7276_v7  ;;  %v1520_v58 = vmul.f32 %v5681_v35, %v7278_v39  ;;  %v7279_v11 = vld [vmem:[#allocation62_spill] sm:$0xff]  ;;  %v7280_v61 = vld [vmem:[#allocation68_spill] sm:$0xff]  ;;  %v7283_v17 = vld [vmem:[#allocation83_spill] sm:$0xff] }
 0x1cb   :  { %v1705_v30 = vpack.c.bf16 %v1649_v48, %v1645_v31  ;;  %v1674_v46 = vsel %vm1610_vm13, %v7274_v4, %v1546_v45  ;;  %v1678_v51 = vsel %vm1614_vm14, %v7275_v59, %v1550_v23  ;;  %v4292_v57 = vpop.eup %4291  ;;  %vm1580_vm15 = vcmp.gt.f32.partialorder %v7279_v11, 20.0  ;;  %v7281_v48 = vld [vmem:[#allocation46_spill] sm:$0xff] }
 0x1cc   :  { %v1718_v6 = vpack.c.bf16 %v1678_v51, %v1674_v46  ;;  %vm1584_vm0 = vcmp.gt.f32.partialorder %v7280_v61, 20.0  ;;  %v6001_v42 = vpop.eup %4293  ;;  %v1644_v33 = vsel %vm1580_vm15, %v7279_v11, %v1516_v40  ;;  %v1555_v45 = vmul.f32 %v5736_v49, %v5665_v18  ;;  %v7282_v4 = vld [vmem:[#allocation22_spill] sm:$0xff]  ;;  %v7284_v40 = vld [vmem:[#allocation5_spill] sm:$0xff] }
 0x1cd   :  { %2281 = vmatprep.mubr.bf16.mxu1 %v1705_v30  ;;  %v1559_v23 = vmul.f32 %v5786_v50, %v5707_v32  ;;  %vm1619_vm1 = vcmp.gt.f32.partialorder %v5491_v62, 20.0  ;;  %v1648_v35 = vsel %vm1584_vm0, %v7280_v61, %v1520_v58  ;;  %vm1623_vm2 = vcmp.gt.f32.partialorder %v5542_v56, 20.0  ;;  %v7286_v39 = vld [vmem:[#allocation54_spill] sm:$0xff] }
 0x1ce   :  { %2209 = vmatmul.mubr.bf16.gmra.mxu0 %v1718_v6  ;;  %v1525_v31 = vmul.f32 %v5742_v5, %v5668_v9  ;;  %v1529_v59 = vmul.f32 %v7282_v4, %v7281_v48  ;;  %v6015_v30 = vpop.eup %4295  ;;  %v1176_v46 = vadd.f32 1.0, %v4292_v57  ;;  %v1704_v18 = vpack.c.bf16 %v1648_v35, %v1644_v33  ;;  %v7285_v57 = vld [vmem:[#allocation90_spill] sm:$0xff] }
 0x1cf   :  { %v1683_v49 = vsel %vm1619_vm1, %v5491_v62, %v1555_v45  ;;  %v1687_v32 = vsel %vm1623_vm2, %v5542_v56, %v1559_v23  ;;  %v4298_v50 = vpop.eup %4297  ;;  %v1241_v51 = vmul.f32 %v1177_v8, %v1177_v8  ;;  %vm1589_vm3 = vcmp.gt.f32.partialorder %v7283_v17, 20.0  ;;  %v7287_v62 = vld [vmem:[#allocation26_spill] sm:$0xff]  ;;  %v7290_v45 = vld [vmem:[#allocation88_spill] sm:$0xff] }
 0x1d0   :  { %v1723_v7 = vpack.c.bf16 %v1687_v32, %v1683_v49  ;;  %vm1593_vm4 = vcmp.gt.f32.partialorder %v7284_v40, 20.0  ;;  %v6021_v6 = vpop.eup %4299  ;;  %2282 = vmatmul.mubr.bf16.gmra.mxu1 %v1704_v18  ;;  %v1653_v9 = vsel %vm1589_vm3, %v7283_v17, %v1525_v31  ;;  %v1554_v58 = vmul.f32 %v7286_v39, %v7285_v57  ;;  %v7288_v11 = vld [vmem:[#allocation34_spill] sm:$0xff]  ;;  %v7291_v18 = vld [vmem:[#allocation37_spill] sm:$0xff]  ;;  %v7295_v57 = vld [vmem:[#allocation20_spill] sm:$0xff] }
 0x1d1   :  { %v1657_v5 = vsel %vm1593_vm4, %v7284_v40, %v1529_v59  ;;  %v1558_v56 = vmul.f32 %v7288_v11, %v7287_v62  ;;  %v1181_v61 = vadd.f32 1.0, %v4298_v50  ;;  %v7289_v33 = vld [vmem:[#allocation82_spill] sm:$0xff]  ;;  %vm1622_vm6 = vcmp.gt.f32.partialorder %v7290_v45, 20.0  ;;  %v7292_v17 = vld [vmem:[#allocation17_spill] sm:$0xff]  ;;  %v7293_v40 = vld [vmem:[#allocation48_spill] sm:$0xff] }
 0x1d2   :  { %2218 = vmatprep.mubr.bf16.mxu0 %v1723_v7  ;;  %v1709_v8 = vpack.c.bf16 %v1657_v5, %v1653_v9  ;;  %vm1618_vm5 = vcmp.gt.f32.partialorder %v7289_v33, 20.0  ;;  %v4302_v23 = vpop.eup %4301  ;;  %v1429_v35 = vadd.f32 1.0, %v5971_v54  ;;  %v6032_v48 = vmul.f32 %v1176_v46, %v1176_v46  ;;  %v7294_v5 = vld [vmem:[#allocation59_spill] sm:$0xff] }
 0x1d3   :  { %v1682_v31 = vsel %vm1618_vm5, %v7289_v33, %v1554_v58  ;;  %v1686_v4 = vsel %vm1622_vm6, %v7290_v45, %v1558_v56  ;;  %v4304_v59 = vpop.eup %4303  ;;  %v6038_v49 = vmul.f32 %v5956_v1, %v7291_v18  ;;  %4307 = vrcp.f32 %v5960_v36  ;;  %v7296_v56 = vld [vmem:[#allocation11_spill] sm:$0xff] }
 0x1d4   :  { %v6043_v32 = vmul.f32 %v5962_v60, %v5816_v26  ;;  %2291 = vmatprep.mubr.bf16.mxu1 %v1709_v8  ;;  %v1722_v50 = vpack.c.bf16 %v1686_v4, %v1682_v31  ;;  %v4306_v7 = vpop.eup %4305  ;;  %4309 = vrcp.f32 %v5964_v2  ;;  %v1433_v46 = vadd.f32 1.0, %v1241_v51  ;;  %v7297_v8 = vld [vmem:[#allocation12_spill] sm:$0xff] }
 0x1d5   :  { %v1524_v9 = vmul.f32 %v7293_v40, %v7292_v17  ;;  %v1528_v39 = vmul.f32 %v7295_v57, %v7294_v5  ;;  %4311 = vrcp.f32 %v5967_v25  ;;  %v6051_v1 = vmul.f32 %v1181_v61, %v1181_v61  ;;  %v7303_v40 = vld [vmem:[#allocation19_spill] sm:$0xff] }
 0x1d6   :  { %v1184_v36 = vadd.f32 1.0, %v4302_v23  ;;  %v1185_v58 = vadd.f32 1.0, %v4306_v7  ;;  %2219 = vmatmul.mubr.bf16.gmra.mxu0 %v1722_v50  ;;  %v6054_v60 = vadd.f32 -1.0, %v5971_v54  ;;  %4313 = vrcp.f32 %v1429_v35  ;;  %v7298_v50 = vld [vmem:[#allocation33_spill] sm:$0xff] }
 0x1d7   :  { %v1432_v2 = vadd.f32 1.0, %v6032_v48  ;;  %v6057_v62 = vadd.f32 -1.0, %v1241_v51  ;;  %vm1588_vm7 = vcmp.gt.f32.partialorder %v7296_v56, 20.0  ;;  %vm1592_vm8 = vcmp.gt.f32.partialorder %v7297_v8, 20.0  ;;  %v7299_v7 = vld [vmem:[#allocation61_spill] sm:$0xff] }
 0x1d8   :  { %v6059_v11 = vmul.f32 %v1185_v58, %v1185_v58  ;;  %v1563_v25 = vmul.f32 %v5864_v19, %v5848_v10  ;;  %4315 = vrcp.f32 %v1433_v46  ;;  %v1652_v61 = vsel %vm1588_vm7, %v7296_v56, %v1524_v9  ;;  %v7301_v46 = vld [vmem:[#allocation44_spill] sm:$0xff]  ;;  %v7304_v9 = vld [vmem:[#allocation70_spill] sm:$0xff] }
 0x1d9   :  { %v1656_v54 = vsel %vm1592_vm8, %v7297_v8, %v1528_v39  ;;  %v1567_v33 = vmul.f32 %v5915_v14, %v5880_v29  ;;  %v1180_v45 = vadd.f32 1.0, %v4304_v59  ;;  %v1437_v51 = vadd.f32 1.0, %v6051_v1 }
 0x1da   :  { %v6070_v23 = vmul.f32 %v1184_v36, %v1184_v36  ;;  %v1708_v35 = vpack.c.bf16 %v1656_v54, %v1652_v61  ;;  %vm1627_vm9 = vcmp.gt.f32.partialorder %v5572_v47, 20.0  ;;  %vm1631_vm10 = vcmp.gt.f32.partialorder %v5634_v52, 20.0  ;;  %v7307_v36 = vld [vmem:[#allocation9_spill] sm:$0xff] }
 0x1db   :  { %v1533_v10 = vmul.f32 %v5892_v21, %v5852_v27  ;;  %v1537_v19 = vmul.f32 %v5942_v12, %v5883_v0  ;;  %v1441_v31 = vadd.f32 1.0, %v6059_v11  ;;  %v1691_v29 = vsel %vm1627_vm9, %v5572_v47, %v1563_v25  ;;  %v7300_v0 = vld [vmem:[#allocation72_spill] sm:$0xff] }
 0x1dc   :  { %2292 = vmatmul.mubr.bf16.gmra.mxu1 %v1708_v35  ;;  %v1695_v14 = vsel %vm1631_vm10, %v5634_v52, %v1567_v33  ;;  %vm1597_vm11 = vcmp.gt.f32.partialorder %v5588_v55, 20.0  ;;  %vm1601_vm12 = vcmp.gt.f32.partialorder %v5673_v41, 20.0  ;;  %v1562_v27 = vmul.f32 %v7299_v7, %v7298_v50  ;;  %v7302_v47 = vld [vmem:[#allocation8_spill] sm:$0xff]  ;;  %v7308_v33 = vld [vmem:[#allocation18_spill] sm:$0xff] }
 0x1dd   :  { %v1727_v4 = vpack.c.bf16 %v1695_v14, %v1691_v29  ;;  %v1661_v59 = vsel %vm1597_vm11, %v5588_v55, %v1533_v10  ;;  %v1665_v21 = vsel %vm1601_vm12, %v5673_v41, %v1537_v19  ;;  %v1566_v12 = vmul.f32 %v7300_v0, %v5855_v13  ;;  %v7305_v55 = vld [vmem:[#allocation67_spill] sm:$0xff]  ;;  %v7306_v41 = vld [vmem:[#allocation45_spill] sm:$0xff]  ;;  %v7309_v10 = vld [vmem:[#allocation10_spill] sm:$0xff] }
 0x1de   :  { %vm1626_vm13 = vcmp.gt.f32.partialorder %v7301_v46, 20.0  ;;  %vm1630_vm14 = vcmp.gt.f32.partialorder %v7302_v47, 20.0  ;;  %v1713_v52 = vpack.c.bf16 %v1665_v21, %v1661_v59  ;;  %v1532_v5 = vmul.f32 %v7304_v9, %v7303_v40  ;;  %v7311_v59 = vld [vmem:[#allocation31_spill] sm:$0xff]  ;;  %v7313_v50 = vld [vmem:[#allocation28_spill] sm:$0xff] }
 0x1df   :  { %2228 = vmatprep.mubr.bf16.mxu0 %v1727_v4  ;;  %v1690_v17 = vsel %vm1626_vm13, %v7301_v46, %v1562_v27  ;;  %v1536_v57 = vmul.f32 %v5898_v44, %v7305_v55  ;;  %v1694_v39 = vsel %vm1630_vm14, %v7302_v47, %v1566_v12  ;;  %vm1596_vm15 = vcmp.gt.f32.partialorder %v7306_v41, 20.0  ;;  %v7310_v4 = vld [vmem:[#allocation76_spill] sm:$0xff] }
 0x1e0   :  { %vm1600_vm0 = vcmp.gt.f32.partialorder %v7307_v36, 20.0  ;;  %v1541_v13 = vmul.f32 %v5969_v63, %v5905_v53  ;;  %v4308_v58 = vpop.eup %4307  ;;  %2301 = vmatprep.mubr.bf16.mxu1 %v1713_v52  ;;  %v1726_v56 = vpack.c.bf16 %v1694_v39, %v1690_v17  ;;  %v1660_v8 = vsel %vm1596_vm15, %v7306_v41, %v1532_v5  ;;  %v7314_v27 = vld [vmem:[#allocation52_spill] sm:$0xff]  ;;  %v7316_v17 = vld [vmem:[#allocation25_spill] sm:$0xff] }
 0x1e1   :  { %v1664_v25 = vsel %vm1600_vm0, %v7307_v36, %v1536_v57  ;;  %v1545_v61 = vmul.f32 %v6001_v42, %v5936_v3  ;;  %v4310_v44 = vpop.eup %4309  ;;  %4317 = vrcp.f32 %v1441_v31  ;;  %vm1605_vm1 = vcmp.gt.f32.partialorder %v7308_v33, 20.0  ;;  %v7315_v47 = vld [vmem:[#allocation56_spill] sm:$0xff] }
 0x1e2   :  { %v1712_v54 = vpack.c.bf16 %v1664_v25, %v1660_v8  ;;  %vm1609_vm2 = vcmp.gt.f32.partialorder %v5758_v24, 20.0  ;;  %v6107_v35 = vpop.eup %4311  ;;  %4319 = vrcp.f32 %v1432_v2  ;;  %2229 = vmatmul.mubr.bf16.gmra.mxu0 %v1726_v56  ;;  %v1669_v53 = vsel %vm1605_vm1, %v7308_v33, %v1541_v13  ;;  %v4047_v2 = vld [vmem:[%s6934_s7 + $0x78] sm:$0xff]   ;;  %v7317_v13 = vld [vmem:[#allocation27_spill] sm:$0xff] }
 0x1e3   :  { %v1673_v63 = vsel %vm1609_vm2, %v5758_v24, %v1545_v61  ;;  %v1544_v19 = vmul.f32 %v5991_v15, %v7309_v10  ;;  %v4314_v29 = vpop.eup %4313  ;;  %v6113_v3 = vmul.f32 %v1180_v45, %v1180_v45  ;;  %4321 = vrcp.f32 %v1437_v51  ;;  %3766 = vmatprep.subr.bf16.mxu0 %v4047_v2 }
 0x1e4   :  { %2302 = vmatmul.mubr.bf16.gmra.mxu1 %v1712_v54  ;;  %v1717_v42 = vpack.c.bf16 %v1673_v63, %v1669_v53  ;;  %v1549_v31 = vmul.f32 %v6021_v6, %v6038_v49  ;;  %v1440_v14 = vadd.f32 1.0, %v6070_v23  ;;  %v1540_v24 = vmul.f32 %v5949_v38, %v7310_v4  ;;  %v4048_v6 = vld [vmem:[%s6934_s7 + $0x38] sm:$0xff]   ;;  %v7312_v49 = vld [vmem:[#allocation58_spill] sm:$0xff]  ;;  %v7318_v54 = vld [vmem:[#allocation23_spill] sm:$0xff] }
 0x1e5   :  { %vm1608_vm3 = vcmp.gt.f32.partialorder %v7311_v59, 20.0  ;;  %v1553_v15 = vmul.f32 %v4310_v44, %v6043_v32  ;;  %v4316_v45 = vpop.eup %4315  ;;  %vm1617_vm4 = vcmp.gt.f32.partialorder %v5816_v26, 20.0  ;;  %vm1604_vm5 = vcmp.gt.f32.partialorder %v7312_v49, 20.0  ;;  %3767 = vmatpush3.bf16.msra.mxu0 %v4048_v6 }
 0x1e6   :  { %2311 = vmatprep.mubr.bf16.mxu1 %v1717_v42  ;;  %v1672_v51 = vsel %vm1608_vm3, %v7311_v59, %v1544_v19  ;;  %vm1613_vm6 = vcmp.gt.f32.partialorder %v7291_v18, 20.0  ;;  %v1369_v32 = vmul.f32 %v6057_v62, %v7313_v50  ;;  %v1360_v21 = vmul.f32 %v5958_v22, %v7314_v27 }
 0x1e7   :  { %v1681_v38 = vsel %vm1617_vm4, %v5816_v26, %v1553_v15  ;;  %v1677_v7 = vsel %vm1613_vm6, %v7291_v18, %v1549_v31  ;;  %v1436_v0 = vadd.f32 1.0, %v6113_v3  ;;  %v1668_v12 = vsel %vm1604_vm5, %v7312_v49, %v1540_v24  ;;  %v4051_v49 = vld [vmem:[%s6934_s7 + $0x68] sm:$0xff]  }
 0x1e8   :  { %v1721_v46 = vpack.c.bf16 %v1681_v38, %v1677_v7  ;;  %v1356_v52 = vmul.f32 %v5944_v20, %v7315_v47  ;;  %v1365_v26 = vmul.f32 %v6054_v60, %v7316_v17  ;;  %v1716_v40 = vpack.c.bf16 %v1672_v51, %v1668_v12  ;;  %v4049_v20 = vld [vmem:[%s6934_s7 + $0x70] sm:$0xff]   ;;  %v4052_v51 = vld [vmem:[%s6934_s7 + $0x28] sm:$0xff]   ;;  %v4055_v38 = vld [vmem:[%s6934_s7 + $0x58] sm:$0xff]  }
 0x1e9   :  { %v1561_v9 = vmul.f32 %v4316_v45, %v1369_v32  ;;  %v3598_v62 = vadd.f32 -1.0, %v5946_v16  ;;  %v3602_v18 = vadd.f32 -1.0, %v6032_v48  ;;  %4323 = vrcp.f32 %v1440_v14  ;;  %3768 = vmatprep.subr.bf16.mxu0 %v4049_v20  ;;  %v4057_v7 = vld [vmem:[%s6934_s7 + $0x50] sm:$0xff]   ;;  %v1794_v20 = vld [vmem:[%s6935_s6] sm:$0x3] }
 0x1ea   :  { %v1552_v5 = vmul.f32 %v4308_v58, %v1360_v21  ;;  %v3607_v22 = vadd.f32 -1.0, %v6051_v1  ;;  %v3611_v55 = vadd.f32 -1.0, %v6059_v11  ;;  %v1557_v57 = vmul.f32 %v4314_v29, %v1365_v26  ;;  %v4050_v1 = vld [vmem:[%s6934_s7 + $0x30] sm:$0xff]  }
 0x1eb   :  { %vm1625_vm7 = vcmp.gt.f32.partialorder %v7313_v50, 20.0  ;;  %4325 = vrcp.f32 %v1436_v0  ;;  %v1548_v16 = vmul.f32 %v6015_v30, %v1356_v52  ;;  %vm1612_vm8 = vcmp.gt.f32.partialorder %v7315_v47, 20.0  ;;  %3769 = vmatpush3.bf16.msra.mxu0 %v4050_v1  ;;  %v4058_v21 = vld [vmem:[%s6934_s7 + $0x10] sm:$0xff]   ;;  %v4060_v52 = vld [vmem:[%s6934_s7 + $0x8] sm:$0xff]  }
 0x1ec   :  { %2312 = vmatmul.mubr.bf16.gmra.mxu1 %v1716_v40  ;;  %vm1616_vm9 = vcmp.gt.f32.partialorder %v7314_v27, 20.0  ;;  %vm1621_vm10 = vcmp.gt.f32.partialorder %v7316_v17, 20.0  ;;  %v1689_v48 = vsel %vm1625_vm7, %v7313_v50, %v1561_v9  ;;  %v1377_v41 = vmul.f32 %v3611_v55, %v5940_v37  ;;  %3770 = vmatprep.subr.bf16.mxu0 %v4051_v49  ;;  %v4056_v50 = vld [vmem:[%s6934_s7 + $0x18] sm:$0xff]   ;;  %v4061_v9 = vld [vmem:[%s6934_s7 + $0x40] sm:$0xff]  }
 0x1ed   :  { %2321 = vmatprep.mubr.bf16.mxu1 %v1721_v46  ;;  %v1680_v11 = vsel %vm1616_vm9, %v7314_v27, %v1552_v5  ;;  %v1685_v30 = vsel %vm1621_vm10, %v7316_v17, %v1557_v57  ;;  %v1368_v58 = vmul.f32 %v3602_v18, %v7317_v13  ;;  %v1676_v56 = vsel %vm1612_vm8, %v7315_v47, %v1548_v16  ;;  %v4059_v46 = vld [vmem:[%s6934_s7 + $0x48] sm:$0xff]  }
 0x1ee   :  { %v4318_v60 = vpop.eup %4317  ;;  %v1725_v8 = vpack.c.bf16 %v1689_v48, %v1685_v30  ;;  %v1373_v25 = vmul.f32 %v3607_v22, %v5927_v28  ;;  %v1720_v61 = vpack.c.bf16 %v1680_v11, %v1676_v56  ;;  %v1364_v33 = vmul.f32 %v3598_v62, %v7318_v54  ;;  %v4062_v62 = vld [vmem:[%s6934_s7] sm:$0xff]  }
 0x1ef   :  { %v4320_v39 = vpop.eup %4319  ;;  %v1569_v44 = vmul.f32 %v4318_v60, %v1377_v41  ;;  %v3610_v10 = vadd.f32 -1.0, %v6070_v23  ;;  %vm1633_vm11 = vcmp.gt.f32.partialorder %v5940_v37, 20.0  ;;  %vm1624_vm12 = vcmp.gt.f32.partialorder %v7317_v13, 20.0  ;;  %3771 = vmatpush3.bf16.msra.mxu0 %v4052_v51  ;;  %v7319_v48 = vld [vmem:[#allocation2_spill] sm:$0xff] }
 0x1f0   :  { %v4322_v36 = vpop.eup %4321  ;;  %v1560_v53 = vmul.f32 %v4320_v39, %v1368_v58  ;;  %v1556_v19 = vmul.f32 %v6107_v35, %v1364_v33  ;;  %v3606_v42 = vadd.f32 -1.0, %v6113_v3  ;;  %vm1629_vm13 = vcmp.gt.f32.partialorder %v5927_v28, 20.0 }
 0x1f1   :  { %v1565_v63 = vmul.f32 %v4322_v36, %v1373_v25  ;;  %v1697_v29 = vsel %vm1633_vm11, %v5940_v37, %v1569_v44  ;;  %vm1620_vm14 = vcmp.gt.f32.partialorder %v7318_v54, 20.0  ;;  %v1376_v14 = vmul.f32 %v3610_v10, %v5933_v43 }
 0x1f2   :  { %v1688_v31 = vsel %vm1624_vm12, %v7317_v13, %v1560_v53  ;;  %v1684_v35 = vsel %vm1620_vm14, %v7318_v54, %v1556_v19  ;;  %v1372_v37 = vmul.f32 %v3606_v42, %v5924_v34  ;;  %vm1632_vm15 = vcmp.gt.f32.partialorder %v5933_v43, 20.0 }
 0x1f3   :  { %v1693_v23 = vsel %vm1629_vm13, %v5927_v28, %v1565_v63  ;;  %v1724_v59 = vpack.c.bf16 %v1688_v31, %v1684_v35  ;;  %vm1628_vm0 = vcmp.gt.f32.partialorder %v5924_v34, 20.0  ;;  %v7320_v1 = vsub.s32 0, %v7319_v48 }
 0x1f4   :  { %2322 = vmatmul.mubr.bf16.gmra.mxu1 %v1720_v61  ;;  %v1729_v4 = vpack.c.bf16 %v1697_v29, %v1693_v23  ;;  %v7321_v39 = vsub.s32 1, %v7319_v48 }
 0x1f5   :  { %2331 = vmatprep.mubr.bf16.mxu1 %v1725_v8  ;;  %v6237_v60 = vrot.slane %v1794_v20, %v7320_v1 }
 0x1f6   :  { %v4324_v2 = vpop.eup %4323  ;;  %v6243_v41 = vrot.slane %v1794_v20, %v7321_v39 }
 0x1f7   :  { %v1568_v15 = vmul.f32 %v4324_v2, %v1376_v14 }
 0x1f8   :  { %v4326_v24 = vpop.eup %4325 }
 0x1f9   :  { %v1564_v3 = vmul.f32 %v4326_v24, %v1372_v37  ;;  %v1696_v45 = vsel %vm1632_vm15, %v5933_v43, %v1568_v15  ;;  %v4053_v43 = vld [vmem:[%s6934_s7 + $0x60] sm:$0xff]  }
 0x1fa   :  { %3772 = vmatprep.subr.bf16.mxu0 %v4053_v43 }
 0x1fb   :  { %v1692_v28 = vsel %vm1628_vm0, %v5924_v34, %v1564_v3  ;;  %v4054_v34 = vld [vmem:[%s6934_s7 + $0x20] sm:$0xff]  }
 0x1fc   :  { %2332 = vmatmul.mubr.bf16.gmra.mxu1 %v1724_v59  ;;  %v1728_v6 = vpack.c.bf16 %v1696_v45, %v1692_v28  ;;  %3773 = vmatpush3.bf16.msra.mxu0 %v4054_v34 }
 0x1fd   :  { %2341 = vmatprep.mubr.bf16.mxu1 %v1729_v4  ;;  %3774 = vmatprep.subr.bf16.mxu0 %v4055_v38 }
 0x200   :  { %3775 = vmatpush3.bf16.msra.mxu0 %v4056_v50 }
 0x201   :  { %3776 = vmatprep.subr.bf16.mxu0 %v4057_v7 }
 0x204   :  { %2342 = vmatmul.mubr.bf16.gmra.mxu1 %v1728_v6  ;;  %3777 = vmatpush3.bf16.msra.mxu0 %v4058_v21 }
 0x205   :  { %3778 = vmatprep.subr.bf16.mxu0 %v4059_v46 }
 0x208   :  { %3779 = vmatpush3.bf16.msra.mxu0 %v4060_v52 }
 0x209   :  { %3780 = vmatprep.subr.bf16.mxu0 %v4061_v9 }
 0x20c   :  { %3781 = vmatpush3.bf16.msra.mxu0 %v4062_v62 }
 0x233   :  { %v2160_v32 = vpop.f32.mrf.mxu0 }
 0x234   :  { %v2161_v30 = vadd.f32 %v2160_v32, %v6237_v60 }
 0x235   :  { %v2162_v27 = vpop.f32.mrf.mxu0 }
 0x236   :  { %v2163_v58 = vadd.f32 %v2162_v27, %v6243_v41 }
 0x237   :  { %v2164_v0 = vpop.f32.mrf.mxu0 }
 0x238   :  { %v2165_v25 = vadd.f32 %v2164_v0, %v6237_v60 }
 0x239   :  { %v2166_v12 = vpop.f32.mrf.mxu0 }
 0x23a   :  { %v2167_v23 = vadd.f32 %v2166_v12, %v6243_v41 }
 0x252   :  { %v2170_v47 = vpop.f32.mrf.mxu0 }
 0x253   :  { %v2171_v15 = vadd.f32 %v2170_v47, %v6237_v60 }
 0x254   :  { %v2172_v17 = vpop.f32.mrf.mxu0 }
 0x255   :  { %v2173_v34 = vadd.f32 %v2172_v17, %v6243_v41 }
 0x256   :  { %v2174_v26 = vpop.f32.mrf.mxu0 }
 0x257   :  { %v2175_v0 = vadd.f32 %v2174_v26, %v6237_v60 }
 0x258   :  { %v2176_v40 = vpop.f32.mrf.mxu0 }
 0x259   :  { %v2177_v12 = vadd.f32 %v2176_v40, %v6243_v41 }
 0x25e   :  { %v6220_v18 = vpop.f32.mrf.mxu0 }
 0x260   :  { %v6222_v5 = vpop.f32.mrf.mxu0 }
 0x262   :  { %v6224_v22 = vpop.f32.mrf.mxu0 }
 0x264   :  { %v6226_v55 = vpop.f32.mrf.mxu0 }
 0x267   :  { %v6228_v57 = vpop.f32.mrf.mxu0 }
 0x269   :  { %v6233_v16 = vpop.f32.mrf.mxu0 }
 0x26b   :  { %v6239_v11 = vpop.f32.mrf.mxu0 }
 0x26d   :  { %v6246_v36 = vpop.f32.mrf.mxu0 }
 0x27d   :  { %v2273_v13 = vpop.f32.mrf.mxu1 }
 0x27e   :  { %v6249_v56 = vadd.f32 %v2273_v13, %v2161_v30  ;;  %v2181_v13 = vadd.f32 %v6220_v18, %v6237_v60  ;;  %v2185_v18 = vadd.f32 %v6224_v22, %v6237_v60 }
 0x27f   :  { %v2275_v8 = vpop.f32.mrf.mxu1  ;;  %v6255_v54 = vpop.f32.mrf.mxu0 }
 0x280   :  { %v2352_v61 = vmin.f32 %v6249_v56, 20.0  ;;  %v6253_v44 = vadd.f32 %v2275_v8, %v2163_v58  ;;  %vm2672_vm1 = vcmp.gt.f32.partialorder %v6249_v56, 20.0 }
 0x281   :  { %v2277_v33 = vpop.f32.mrf.mxu1  ;;  %v6260_v19 = vpop.f32.mrf.mxu0 }
 0x282   :  { %v2384_v53 = vmul.f32 1.442695, %v2352_v61  ;;  %v2353_v63 = vmin.f32 %v6253_v44, 20.0  ;;  %v6258_v10 = vadd.f32 %v2277_v33, %v2165_v25  ;;  %v2183_v33 = vadd.f32 %v6222_v5, %v6243_v41 }
 0x283   :  { %v2279_v2 = vpop.f32.mrf.mxu1  ;;  %v6264_v14 = vpop.f32.mrf.mxu0  ;;  %vm2673_vm2 = vcmp.gt.f32.partialorder %v6253_v44, 20.0 }
 0x284   :  { %v2386_v29 = vmul.f32 1.442695, %v2353_v63  ;;  %v2354_v42 = vmin.f32 %v6258_v10, 20.0  ;;  %4327 = vpow2.f32 %v2384_v53  ;;  %v6266_v35 = vadd.f32 %v2279_v2, %v2167_v23 }
 0x285   :  { %v6268_v4 = vpop.f32.mrf.mxu0  ;;  %vm2674_vm3 = vcmp.gt.f32.partialorder %v6258_v10, 20.0 }
 0x286   :  { %4329 = vpow2.f32 %v2386_v29  ;;  %v2388_v31 = vmul.f32 1.442695, %v2354_v42  ;;  %v2355_v24 = vmin.f32 %v6266_v35, 20.0  ;;  %vm2675_vm4 = vcmp.gt.f32.partialorder %v6266_v35, 20.0 }
 0x288   :  { %4331 = vpow2.f32 %v2388_v31  ;;  %v2390_v3 = vmul.f32 1.442695, %v2355_v24 }
 0x28a   :  { %4333 = vpow2.f32 %v2390_v3 }
 0x28e   :  { %v6271_v59 = vpop.f32.mrf.mxu0 }
 0x290   :  { %v6274_v45 = vpop.f32.mrf.mxu0  ;;  %v2283_v6 = vpop.f32.mrf.mxu1 }
 0x291   :  { %v4328_v37 = vpop.eup %4327  ;;  %v6276_v49 = vadd.f32 %v2283_v6, %v2171_v15  ;;  %v2187_v15 = vadd.f32 %v6226_v55, %v6243_v41  ;;  %v2193_v55 = vadd.f32 %v6233_v16, %v6243_v41 }
 0x292   :  { %v6278_v51 = vpop.f32.mrf.mxu0  ;;  %v2448_v38 = vadd.f32 1.0, %v4328_v37  ;;  %v2285_v50 = vpop.f32.mrf.mxu1 }
 0x293   :  { %v4330_v28 = vpop.eup %4329  ;;  %v2356_v7 = vmin.f32 %v6276_v49, 20.0  ;;  %v6282_v27 = vadd.f32 %v2285_v50, %v2173_v34  ;;  %vm2676_vm7 = vcmp.gt.f32.partialorder %v6276_v49, 20.0 }
 0x294   :  { %v2449_v32 = vadd.f32 1.0, %v4330_v28  ;;  %v2287_v21 = vpop.f32.mrf.mxu1  ;;  %v6286_v47 = vpop.f32.mrf.mxu0  ;;  %v2480_v52 = vmul.f32 %v2448_v38, %v2448_v38 }
 0x295   :  { %v4332_v43 = vpop.eup %4331  ;;  %v2392_v9 = vmul.f32 1.442695, %v2356_v7  ;;  %v2357_v17 = vmin.f32 %v6282_v27, 20.0  ;;  %v6289_v48 = vadd.f32 %v2287_v21, %v2175_v0  ;;  %vm2677_vm6 = vcmp.gt.f32.partialorder %v6282_v27, 20.0 }
 0x296   :  { %v2450_v46 = vadd.f32 1.0, %v4332_v43  ;;  %v2289_v62 = vpop.f32.mrf.mxu1  ;;  %v2481_v20 = vmul.f32 %v2449_v32, %v2449_v32  ;;  %v6296_v40 = vpop.f32.mrf.mxu0  ;;  %v2576_v58 = vadd.f32 1.0, %v2480_v52  ;;  %v2191_v43 = vadd.f32 %v6228_v57, %v6237_v60 }
 0x297   :  { %v6291_v1 = vadd.f32 %v2289_v62, %v2177_v12  ;;  %4335 = vpow2.f32 %v2392_v9  ;;  %v2394_v30 = vmul.f32 1.442695, %v2357_v17  ;;  %v2358_v26 = vmin.f32 %v6289_v48, 20.0  ;;  %v4334_v5 = vpop.eup %4333 }
 0x298   :  { %v6293_v39 = vmul.f32 %v2450_v46, %v2450_v46  ;;  %v2577_v8 = vadd.f32 1.0, %v2481_v20  ;;  %v6306_v42 = vpop.f32.mrf.mxu0  ;;  %v2451_v50 = vadd.f32 1.0, %v4334_v5  ;;  %v2195_v12 = vadd.f32 %v6239_v11, %v6237_v60 }
 0x299   :  { %4337 = vpow2.f32 %v2394_v30  ;;  %v2359_v25 = vmin.f32 %v6291_v1, 20.0  ;;  %v2396_v53 = vmul.f32 1.442695, %v2358_v26  ;;  %v2197_v57 = vadd.f32 %v6246_v36, %v6243_v41 }
 0x29a   :  { %v2578_v29 = vadd.f32 1.0, %v6293_v39  ;;  %4339 = vrcp.f32 %v2576_v58  ;;  %v6318_v6 = vpop.f32.mrf.mxu0  ;;  %v2201_v46 = vadd.f32 %v6255_v54, %v6237_v60  ;;  %v6340_v30 = vadd.f32 %v6260_v19, %v6243_v41 }
 0x29b   :  { %4341 = vrcp.f32 %v2577_v8  ;;  %v2398_v24 = vmul.f32 1.442695, %v2359_v25  ;;  %v6344_v26 = vadd.f32 %v6264_v14, %v6237_v60  ;;  %v3676_v36 = vadd.f32 -1.0, %v2480_v52 }
 0x29c   :  { %v2293_v61 = vpop.f32.mrf.mxu1  ;;  %4343 = vpow2.f32 %v2396_v53  ;;  %v6335_v9 = vpop.f32.mrf.mxu0  ;;  %v6349_v54 = vadd.f32 %v6268_v4, %v6243_v41  ;;  %v6355_v19 = vadd.f32 %v6271_v59, %v6237_v60  ;;  %v3678_v52 = vadd.f32 -1.0, %v6293_v39 }
 0x29d   :  { %v6303_v63 = vadd.f32 %v2293_v61, %v2181_v13  ;;  %4345 = vrcp.f32 %v2578_v29  ;;  %v2483_v13 = vmul.f32 %v2451_v50, %v2451_v50  ;;  %v3677_v61 = vadd.f32 -1.0, %v2481_v20 }
 0x29e   :  { %v2295_v31 = vpop.f32.mrf.mxu1  ;;  %4347 = vpow2.f32 %v2398_v24  ;;  %v6361_v4 = vadd.f32 %v6274_v45, %v6243_v41  ;;  %v6365_v20 = vadd.f32 %v6278_v51, %v6237_v60  ;;  %v6369_v59 = vadd.f32 %v6286_v47, %v6243_v41 }
 0x29f   :  { %v2360_v2 = vmin.f32 %v6303_v63, 20.0  ;;  %v6311_v23 = vadd.f32 %v2295_v31, %v2183_v33  ;;  %v2544_v24 = vmul.f32 %v3676_v36, %v6249_v56  ;;  %v2579_v45 = vadd.f32 1.0, %v2483_v13 }
 0x2a0   :  { %v2297_v37 = vpop.f32.mrf.mxu1  ;;  %v2545_v51 = vmul.f32 %v3677_v61, %v6253_v44  ;;  %v6378_v47 = vadd.f32 %v6296_v40, %v6237_v60  ;;  %vm2679_vm5 = vcmp.gt.f32.partialorder %v6291_v1, 20.0  ;;  %vm2678_vm8 = vcmp.gt.f32.partialorder %v6289_v48, 20.0 }
 0x2a1   :  { %v2361_v3 = vmin.f32 %v6311_v23, 20.0  ;;  %v6316_v28 = vadd.f32 %v2297_v37, %v2185_v18  ;;  %v2400_v34 = vmul.f32 1.442695, %v2360_v2  ;;  %v3679_v37 = vadd.f32 -1.0, %v2483_v13 }
 0x2a2   :  { %v2299_v22 = vpop.f32.mrf.mxu1  ;;  %v2230_v29 = vpop.f32.mrf.mxu0  ;;  %vm2681_vm9 = vcmp.gt.f32.partialorder %v6311_v23, 20.0  ;;  %vm2680_vm12 = vcmp.gt.f32.partialorder %v6303_v63, 20.0 }
 0x2a3   :  { %v6322_v38 = vadd.f32 %v2299_v22, %v2187_v15  ;;  %v2402_v7 = vmul.f32 1.442695, %v2361_v3  ;;  %v2362_v21 = vmin.f32 %v6316_v28, 20.0  ;;  %4349 = vpow2.f32 %v2400_v34 }
 0x2a4   :  { %v2303_v32 = vpop.f32.mrf.mxu1  ;;  %v4336_v16 = vpop.eup %4335  ;;  %v2546_v34 = vmul.f32 %v3678_v52, %v6258_v10  ;;  %v6401_v52 = vadd.f32 %v6335_v9, %v6243_v41  ;;  %vm2682_vm11 = vcmp.gt.f32.partialorder %v6316_v28, 20.0 }
 0x2a5   :  { %v6327_v0 = vadd.f32 %v2303_v32, %v2191_v43  ;;  %v2363_v17 = vmin.f32 %v6322_v38, 20.0  ;;  %4351 = vpow2.f32 %v2402_v7  ;;  %v2404_v14 = vmul.f32 1.442695, %v2362_v21 }
 0x2a6   :  { %v2305_v62 = vpop.f32.mrf.mxu1  ;;  %v4338_v25 = vpop.eup %4337  ;;  %v2452_v33 = vadd.f32 1.0, %v4336_v16  ;;  %v6385_v32 = vadd.f32 %v6306_v42, %v6243_v41  ;;  %vm2683_vm10 = vcmp.gt.f32.partialorder %v6322_v38, 20.0 }
 0x2a7   :  { %v2364_v11 = vmin.f32 %v6327_v0, 20.0  ;;  %v6351_v58 = vadd.f32 %v2305_v62, %v2193_v55  ;;  %v2406_v53 = vmul.f32 1.442695, %v2363_v17  ;;  %v4340_v39 = vpop.eup %4339  ;;  %v2453_v5 = vadd.f32 1.0, %v4338_v25  ;;  %v2232_v55 = vpop.f32.mrf.mxu0 }
 0x2a8   :  { %v2307_v8 = vpop.f32.mrf.mxu1  ;;  %v4342_v3 = vpop.eup %4341  ;;  %4353 = vpow2.f32 %v2404_v14  ;;  %v2484_v50 = vmul.f32 %v2452_v33, %v2452_v33  ;;  %v2640_v17 = vmul.f32 %v4340_v39, %v2544_v24  ;;  %vm2684_vm13 = vcmp.gt.f32.partialorder %v6327_v0, 20.0 }
 0x2a9   :  { %v2408_v18 = vmul.f32 1.442695, %v2364_v11  ;;  %v2365_v2 = vmin.f32 %v6351_v58, 20.0  ;;  %v6380_v22 = vadd.f32 %v2307_v8, %v2195_v12  ;;  %v4344_v43 = vpop.eup %4343  ;;  %4355 = vpow2.f32 %v2406_v53  ;;  %v2234_v33 = vpop.f32.mrf.mxu0 }
 0x2aa   :  { %v2309_v31 = vpop.f32.mrf.mxu1  ;;  %v4346_v21 = vpop.eup %4345  ;;  %v6390_v12 = vmul.f32 %v3679_v37, %v6266_v35  ;;  %v2485_v16 = vmul.f32 %v2453_v5, %v2453_v5  ;;  %v2454_v42 = vadd.f32 1.0, %v4344_v43  ;;  %v6396_v8 = vadd.f32 %v6318_v6, %v6237_v60 }
 0x2ab   :  { %4357 = vpow2.f32 %v2408_v18  ;;  %v2410_v62 = vmul.f32 1.442695, %v2365_v2  ;;  %v6387_v40 = vadd.f32 %v2309_v31, %v2197_v57  ;;  %v4348_v13 = vpop.eup %4347  ;;  %v2366_v25 = vmin.f32 %v6380_v22, 20.0 }
 0x2ac   :  { %v2313_v15 = vpop.f32.mrf.mxu1  ;;  %4359 = vrcp.f32 %v2579_v45  ;;  %v2641_v61 = vmul.f32 %v4342_v3, %v2545_v51  ;;  %v2642_v14 = vmul.f32 %v4346_v21, %v2546_v34  ;;  %v2580_v57 = vadd.f32 1.0, %v2484_v50 }
 0x2ad   :  { %v6392_v11 = vadd.f32 %v2313_v15, %v2201_v46  ;;  %v2367_v46 = vmin.f32 %v6387_v40, 20.0  ;;  %v6407_v31 = vsel %vm2672_vm1, %v6249_v56, %v2640_v17  ;;  %v6410_v6 = vadd.f32 %v2230_v29, %v6237_v60 }
 0x2ae   :  { %v2315_v7 = vpop.f32.mrf.mxu1  ;;  %v6413_v18 = vadd.f32 %v2232_v55, %v6243_v41  ;;  %4361 = vpow2.f32 %v2410_v62  ;;  %v2581_v39 = vadd.f32 1.0, %v2485_v16  ;;  %v2455_v9 = vadd.f32 1.0, %v4348_v13 }
 0x2af   :  { %v2368_v24 = vmin.f32 %v6392_v11, 20.0  ;;  %v6417_v37 = vadd.f32 %v2315_v7, %v6340_v30  ;;  %v2486_v5 = vmul.f32 %v2454_v42, %v2454_v42  ;;  %v6420_v56 = vadd.f32 %v2234_v33, %v6237_v60  ;;  %v2236_v30 = vpop.f32.mrf.mxu0 }
 0x2b0   :  { %v2317_v36 = vpop.f32.mrf.mxu1  ;;  %v4350_v2 = vpop.eup %4349  ;;  %v2412_v15 = vmul.f32 1.442695, %v2366_v25  ;;  %v6425_v29 = vsel %vm2673_vm2, %v6253_v44, %v2641_v61  ;;  %v6430_v51 = vsel %vm2674_vm3, %v6258_v10, %v2642_v14  ;;  %v3680_v43 = vadd.f32 -1.0, %v2484_v50 }
 0x2b1   :  { %4363 = vrcp.f32 %v2580_v57  ;;  %v2414_v34 = vmul.f32 1.442695, %v2367_v46  ;;  %v3681_v7 = vadd.f32 -1.0, %v2485_v16  ;;  %v2456_v60 = vadd.f32 1.0, %v4350_v2 }
 0x2b2   :  { %v2319_v53 = vpop.f32.mrf.mxu1  ;;  %v4352_v3 = vpop.eup %4351  ;;  %v2369_v21 = vmin.f32 %v6417_v37, 20.0  ;;  %4365 = vrcp.f32 %v2581_v39  ;;  %v2487_v44 = vmul.f32 %v2455_v9, %v2455_v9  ;;  %v2416_v62 = vmul.f32 1.442695, %v2368_v24 }
 0x2b3   :  { %v6434_v17 = vadd.f32 %v2319_v53, %v6349_v54  ;;  %v6437_v13 = vadd.f32 %v2317_v36, %v6344_v26  ;;  %v3682_v42 = vadd.f32 -1.0, %v2486_v5  ;;  %v2457_v50 = vadd.f32 1.0, %v4352_v3 }
 0x2b4   :  { %v2323_v45 = vpop.f32.mrf.mxu1  ;;  %4367 = vpow2.f32 %v2412_v15  ;;  %v6440_v25 = vadd.f32 %v2236_v30, %v6243_v41  ;;  %v6445_v54 = vmul.f32 %v3680_v43, %v6276_v49  ;;  %v2582_v14 = vadd.f32 1.0, %v2486_v5 }
 0x2b5   :  { %7322 = vst [vmem:[#allocation47_spill] sm:$0xff] %v6434_v17  ;;  %v4354_v16 = vpop.eup %4353  ;;  %4369 = vpow2.f32 %v2414_v34  ;;  %v2488_v26 = vmul.f32 %v2456_v60, %v2456_v60  ;;  %v2418_v36 = vmul.f32 1.442695, %v2369_v21  ;;  %v2371_v46 = vmin.f32 %v6434_v17, 20.0 }
 0x2b6   :  { %v2325_v55 = vpop.f32.mrf.mxu1  ;;  %v4356_v33 = vpop.eup %4355  ;;  %v6449_v53 = vadd.f32 %v2323_v45, %v6355_v19  ;;  %v6452_v2 = vmul.f32 %v3681_v7, %v6282_v27  ;;  %v3683_v39 = vadd.f32 -1.0, %v2487_v44  ;;  %4371 = vpow2.f32 %v2416_v62 }
 0x2b7   :  { %v2370_v9 = vmin.f32 %v6437_v13, 20.0  ;;  %v6458_v15 = vmul.f32 %v3682_v42, %v6289_v48  ;;  %v2583_v3 = vadd.f32 1.0, %v2487_v44  ;;  %v2489_v43 = vmul.f32 %v2457_v50, %v2457_v50 }
 0x2b8   :  { %v2327_v10 = vpop.f32.mrf.mxu1  ;;  %7323 = vst [vmem:[#allocation41_spill] sm:$0xff] %v6449_v53  ;;  %v4358_v41 = vpop.eup %4357  ;;  %v2422_v30 = vmul.f32 1.442695, %v2371_v46  ;;  %4373 = vrcp.f32 %v2582_v14  ;;  %v2458_v19 = vadd.f32 1.0, %v4354_v16  ;;  %v2459_v45 = vadd.f32 1.0, %v4356_v33 }
 0x2b9   :  { %v6455_v5 = vpop.eup %4359  ;;  %v6461_v34 = vadd.f32 %v2325_v55, %v6361_v4  ;;  %v2584_v60 = vadd.f32 1.0, %v2488_v26  ;;  %v2460_v21 = vadd.f32 1.0, %v4358_v41  ;;  %4375 = vpow2.f32 %v2418_v36 }
 0x2ba   :  { %v2329_v57 = vpop.f32.mrf.mxu1  ;;  %v2372_v62 = vmin.f32 %v6449_v53, 20.0  ;;  %v2420_v17 = vmul.f32 1.442695, %v2370_v9  ;;  %4377 = vpow2.f32 %v2422_v30  ;;  %v6466_v44 = vadd.f32 %v2327_v10, %v6365_v20 }
 0x2bb   :  { %7324 = vst [vmem:[#allocation66_spill] sm:$0xff] %v6461_v34  ;;  %v4362_v61 = vpop.eup %4361  ;;  %v2373_v42 = vmin.f32 %v6461_v34, 20.0  ;;  %4379 = vrcp.f32 %v2583_v3  ;;  %v3684_v16 = vadd.f32 -1.0, %v2488_v26  ;;  %v3685_v14 = vadd.f32 -1.0, %v2489_v43 }
 0x2bc   :  { %v2333_v24 = vpop.f32.mrf.mxu1  ;;  %7325 = vst [vmem:[#allocation75_spill] sm:$0xff] %v6466_v44  ;;  %v6469_v4 = vadd.f32 %v2329_v57, %v6369_v59  ;;  %v2490_v55 = vmul.f32 %v2458_v19, %v2458_v19  ;;  %v2491_v33 = vmul.f32 %v2459_v45, %v2459_v45  ;;  %v2374_v46 = vmin.f32 %v6466_v44, 20.0 }
 0x2bd   :  { %v2426_v36 = vmul.f32 1.442695, %v2373_v42  ;;  %v6475_v9 = vmul.f32 %v3683_v39, %v6291_v1  ;;  %4381 = vrcp.f32 %v2584_v60  ;;  %v2461_v20 = vadd.f32 1.0, %v4362_v61 }
 0x2be   :  { %v2335_v7 = vpop.f32.mrf.mxu1  ;;  %7326 = vst [vmem:[#allocation71_spill] sm:$0xff] %v6469_v4  ;;  %v6472_v41 = vpop.eup %4363  ;;  %v2424_v10 = vmul.f32 1.442695, %v2372_v62  ;;  %v2492_v3 = vmul.f32 %v2460_v21, %v2460_v21  ;;  %4383 = vpow2.f32 %v2420_v17  ;;  %v2428_v26 = vmul.f32 1.442695, %v2374_v46 }
 0x2bf   :  { %v2375_v59 = vmin.f32 %v6469_v4, 20.0  ;;  %v6478_v57 = vpop.eup %4365  ;;  %v6481_v19 = vmul.f32 %v3684_v16, %v6303_v63  ;;  %v6484_v45 = vmul.f32 %v3685_v14, %v6311_v23  ;;  %v2585_v42 = vadd.f32 1.0, %v2489_v43 }
 0x2c0   :  { %v2337_v50 = vpop.f32.mrf.mxu1  ;;  %4385 = vpow2.f32 %v2426_v36  ;;  %v3686_v39 = vadd.f32 -1.0, %v2490_v55  ;;  %v2586_v60 = vadd.f32 1.0, %v2490_v55  ;;  %v3687_v21 = vadd.f32 -1.0, %v2491_v33 }
 0x2c1   :  { %v4368_v61 = vpop.eup %4367  ;;  %v2430_v17 = vmul.f32 1.442695, %v2375_v59  ;;  %v2493_v46 = vmul.f32 %v2461_v20, %v2461_v20  ;;  %4387 = vpow2.f32 %v2424_v10  ;;  %v6488_v53 = vadd.f32 %v2335_v7, %v6385_v32 }
 0x2c2   :  { %v2339_v30 = vpop.f32.mrf.mxu1  ;;  %v4370_v62 = vpop.eup %4369  ;;  %v6491_v16 = vadd.f32 %v2337_v50, %v6396_v8  ;;  %v2587_v44 = vadd.f32 1.0, %v2491_v33  ;;  %v3688_v43 = vadd.f32 -1.0, %v2492_v3  ;;  %4389 = vpow2.f32 %v2428_v26 }
 0x2c3   :  { %v6494_v36 = vadd.f32 %v2333_v24, %v6378_v47  ;;  %v4372_v4 = vpop.eup %4371  ;;  %v2588_v55 = vadd.f32 1.0, %v2492_v3  ;;  %v2462_v34 = vadd.f32 1.0, %v4368_v61  ;;  %4391 = vpow2.f32 %v2430_v17 }
 0x2c4   :  { %7327 = vst [vmem:[#allocation79_spill] sm:$0xff] %v6491_v16  ;;  %v2343_v14 = vpop.f32.mrf.mxu1  ;;  %v2377_v20 = vmin.f32 %v6488_v53, 20.0  ;;  %4393 = vrcp.f32 %v2585_v42  ;;  %v6498_v32 = vmul.f32 %v3686_v39, %v6316_v28  ;;  %v2463_v7 = vadd.f32 1.0, %v4370_v62 }
 0x2c5   :  { %7328 = vst [vmem:[#allocation38_spill] sm:$0xff] %v6494_v36  ;;  %v2643_v8 = vmul.f32 %v6455_v5, %v6390_v12  ;;  %v6502_v50 = vpop.eup %4373  ;;  %4395 = vrcp.f32 %v2586_v60  ;;  %v3689_v33 = vadd.f32 -1.0, %v2493_v46  ;;  %v2378_v24 = vmin.f32 %v6491_v16, 20.0 }
 0x2c6   :  { %v2434_v47 = vmul.f32 1.442695, %v2377_v20  ;;  %v2345_v10 = vpop.f32.mrf.mxu1  ;;  %v4376_v3 = vpop.eup %4375  ;;  %v6506_v26 = vmul.f32 %v3687_v21, %v6322_v38  ;;  %4397 = vrcp.f32 %v2587_v44  ;;  %v2464_v59 = vadd.f32 1.0, %v4372_v4 }
 0x2c7   :  { %v2376_v42 = vmin.f32 %v6494_v36, 20.0  ;;  %v4378_v61 = vpop.eup %4377  ;;  %v6510_v39 = vmul.f32 %v3688_v43, %v6327_v0  ;;  %4399 = vrcp.f32 %v2588_v55  ;;  %v2589_v12 = vadd.f32 1.0, %v2493_v46 }
 0x2c8   :  { %v2494_v5 = vmul.f32 %v2462_v34, %v2462_v34  ;;  %v6512_v60 = vpop.eup %4379  ;;  %v2495_v17 = vmul.f32 %v2463_v7, %v2463_v7  ;;  %4401 = vpow2.f32 %v2434_v47  ;;  %v2707_v21 = vsel %vm2675_vm4, %v6266_v35, %v2643_v8  ;;  %v2347_v46 = vpop.f32.mrf.mxu1 }
 0x2c9   :  { %v6518_v44 = vadd.f32 %v2339_v30, %v6401_v52  ;;  %v6521_v4 = vmul.f32 %v3689_v33, %v6351_v58  ;;  %v2465_v62 = vadd.f32 1.0, %v4376_v3  ;;  %v2436_v43 = vmul.f32 1.442695, %v2378_v24 }
 0x2ca   :  { %v2737_v55 = vpack.c.bf16 %v2707_v21, %v6425_v29  ;;  %v6524_v34 = vpop.eup %4381  ;;  %v2496_v20 = vmul.f32 %v2464_v59, %v2464_v59  ;;  %v2467_v7 = vadd.f32 1.0, %v4378_v61  ;;  %v2432_v47 = vmul.f32 1.442695, %v2376_v42 }
 0x2cb   :  { %v2379_v36 = vmin.f32 %v6518_v44, 20.0  ;;  %v4384_v16 = vpop.eup %4383  ;;  %4403 = vrcp.f32 %v2589_v12  ;;  %v3690_v35 = vadd.f32 -1.0, %v2494_v5  ;;  %v2590_v52 = vadd.f32 1.0, %v2494_v5 }
 0x2cc   :  { %2919 = vmatprep.mubr.bf16.mxu0 %v2737_v55  ;;  %v6528_v30 = vadd.f32 %v2345_v10, %v6413_v18  ;;  %v3691_v33 = vadd.f32 -1.0, %v2495_v17  ;;  %v2591_v24 = vadd.f32 1.0, %v2495_v17  ;;  %v7329_v29 = vpack.c.bf16 %v6430_v51, %v6407_v31 }
 0x2cd   :  { %v4386_v8 = vpop.eup %4385  ;;  %v6534_v3 = vadd.f32 %v2343_v14, %v6410_v6  ;;  %v6537_v59 = vadd.f32 %v2347_v46, %v6420_v56  ;;  %v2497_v42 = vmul.f32 %v2465_v62, %v2465_v62  ;;  %4405 = vpow2.f32 %v2436_v43 }
 0x2ce   :  { %2920 = vmatmul.mubr.bf16.vlgmr.msra.gmra.mxu0 %v7329_v29  ;;  %v2438_v61 = vmul.f32 1.442695, %v2379_v36  ;;  %v2381_v12 = vmin.f32 %v6528_v30, 20.0  ;;  %v4388_v18 = vpop.eup %4387  ;;  %v3692_v10 = vadd.f32 -1.0, %v2496_v20  ;;  %v2466_v5 = vadd.f32 1.0, %v4384_v16 }
 0x2cf   :  { %7330 = vst [vmem:[#allocation43_spill] sm:$0xff] %v6534_v3  ;;  %v6540_v21 = vmul.f32 %v2467_v7, %v2467_v7  ;;  %4407 = vpow2.f32 %v2432_v47  ;;  %v4390_v31 = vpop.eup %4389  ;;  %v6544_v6 = vmul.f32 %v3690_v35, %v6380_v22  ;;  %v2592_v51 = vadd.f32 1.0, %v2496_v20 }
 0x2d0   :  { %v2469_v56 = vadd.f32 1.0, %v4386_v8  ;;  %4409 = vpow2.f32 %v2438_v61  ;;  %v4392_v14 = vpop.eup %4391  ;;  %v2380_v36 = vmin.f32 %v6534_v3, 20.0  ;;  %v2442_v17 = vmul.f32 1.442695, %v2381_v12 }
 0x2d1   :  { %4411 = vrcp.f32 %v2590_v52  ;;  %v2382_v16 = vmin.f32 %v6537_v59, 20.0  ;;  %v4394_v62 = vpop.eup %4393  ;;  %v6552_v43 = vmul.f32 %v3691_v33, %v6387_v40  ;;  %v2593_v55 = vadd.f32 1.0, %v2497_v42 }
 0x2d2   :  { %4413 = vrcp.f32 %v2591_v24  ;;  %v2471_v46 = vadd.f32 1.0, %v4392_v14  ;;  %v4396_v20 = vpop.eup %4395  ;;  %v6555_v7 = vmul.f32 %v3692_v10, %v6392_v11  ;;  %v2498_v47 = vmul.f32 %v2466_v5, %v2466_v5 }
 0x2d3   :  { %v2595_v35 = vadd.f32 1.0, %v6540_v21  ;;  %v2468_v52 = vadd.f32 1.0, %v4388_v18  ;;  %v4398_v8 = vpop.eup %4397  ;;  %4415 = vrcp.f32 %v2592_v51  ;;  %v6558_v29 = vmul.f32 %v2469_v56, %v2469_v56 }
 0x2d4   :  { %v2470_v61 = vadd.f32 1.0, %v4390_v31  ;;  %v2444_v12 = vmul.f32 1.442695, %v2382_v16  ;;  %v6560_v3 = vpop.eup %4399  ;;  %v2440_v33 = vmul.f32 1.442695, %v2380_v36  ;;  %4417 = vpow2.f32 %v2442_v17 }
 0x2d5   :  { %v2645_v24 = vmul.f32 %v6478_v57, %v6452_v2  ;;  %v2647_v10 = vmul.f32 %v6512_v60, %v6475_v9  ;;  %v4402_v5 = vpop.eup %4401  ;;  %v3693_v14 = vadd.f32 -1.0, %v2497_v42  ;;  %4419 = vrcp.f32 %v2593_v55  ;;  %v2349_v60 = vpop.f32.mrf.mxu1 }
 0x2d6   :  { %v6566_v18 = vmul.f32 %v2471_v46, %v2471_v46  ;;  %v2644_v51 = vmul.f32 %v6472_v41, %v6445_v54  ;;  %v3694_v31 = vadd.f32 -1.0, %v2498_v47  ;;  %v2594_v56 = vadd.f32 1.0, %v2498_v47 }
 0x2d7   :  { %4421 = vrcp.f32 %v2595_v35  ;;  %v6572_v36 = vmul.f32 %v2468_v52, %v2468_v52  ;;  %v2473_v2 = vadd.f32 1.0, %v4402_v5  ;;  %v2711_v9 = vsel %vm2679_vm5, %v6291_v1, %v2647_v10 }
 0x2d8   :  { %4423 = vpow2.f32 %v2444_v12  ;;  %v2646_v57 = vmul.f32 %v6502_v50, %v6458_v15  ;;  %v4404_v54 = vpop.eup %4403  ;;  %v2597_v41 = vadd.f32 1.0, %v6558_v29  ;;  %v6581_v42 = vmul.f32 %v2470_v61, %v2470_v61 }
 0x2d9   :  { %4425 = vpow2.f32 %v2440_v33  ;;  %v2709_v17 = vsel %vm2677_vm6, %v6282_v27, %v2645_v24  ;;  %v2599_v1 = vadd.f32 1.0, %v6566_v18  ;;  %v2708_v15 = vsel %vm2676_vm7, %v6276_v49, %v2644_v51 }
 0x2da   :  { %v2739_v16 = vpack.c.bf16 %v2711_v9, %v2709_v17  ;;  %v2710_v50 = vsel %vm2678_vm8, %v6289_v48, %v2646_v57  ;;  %v4406_v55 = vpop.eup %4405  ;;  %v6595_v46 = vmul.f32 %v3693_v14, %v6417_v37  ;;  %v6598_v47 = vmul.f32 %v3694_v31, %v6437_v13 }
 0x2db   :  { %v2738_v27 = vpack.c.bf16 %v2710_v50, %v2708_v15  ;;  %v6601_v35 = vadd.f32 %v2349_v60, %v6440_v25  ;;  %4427 = vrcp.f32 %v2594_v56  ;;  %v2596_v61 = vadd.f32 1.0, %v6572_v36 }
 0x2dc   :  { %v4408_v52 = vpop.eup %4407  ;;  %v6604_v49 = vmul.f32 %v2473_v2, %v2473_v2  ;;  %2927 = vmatprep.mubr.bf16.mxu0 %v2739_v16  ;;  %v2649_v48 = vmul.f32 %v4394_v62, %v6484_v45  ;;  %4429 = vrcp.f32 %v2597_v41  ;;  %v2651_v24 = vmul.f32 %v4398_v8, %v6506_v26 }
 0x2dd   :  { %v4410_v12 = vpop.eup %4409  ;;  %2928 = vmatmul.mubr.bf16.gmra.mxu0 %v2738_v27  ;;  %v2383_v33 = vmin.f32 %v6601_v35, 20.0  ;;  %v2650_v10 = vmul.f32 %v4396_v20, %v6498_v32  ;;  %v2598_v5 = vadd.f32 1.0, %v6581_v42  ;;  %4431 = vrcp.f32 %v2599_v1 }
 0x2de   :  { %v4412_v25 = vpop.eup %4411  ;;  %v2474_v14 = vadd.f32 1.0, %v4406_v55  ;;  %v2648_v51 = vmul.f32 %v6524_v34, %v6481_v19  ;;  %v2475_v56 = vadd.f32 1.0, %v4410_v12  ;;  %v2713_v62 = vsel %vm2681_vm9, %v6311_v23, %v2649_v48  ;;  %v7332_v12 = vld [vmem:[#allocation66_spill] sm:$0xff] }
 0x2df   :  { %v4414_v31 = vpop.eup %4413  ;;  %v2446_v45 = vmul.f32 1.442695, %v2383_v33  ;;  %v2715_v26 = vsel %vm2683_vm10, %v6322_v38, %v2651_v24  ;;  %4433 = vrcp.f32 %v2596_v61  ;;  %v2472_v32 = vadd.f32 1.0, %v4408_v52  ;;  %v7331_v52 = vld [vmem:[#allocation47_spill] sm:$0xff] }
 0x2e0   :  { %v2601_v20 = vadd.f32 1.0, %v6604_v49  ;;  %v2741_v8 = vpack.c.bf16 %v2715_v26, %v2713_v62  ;;  %v6620_v2 = vpop.eup %4415  ;;  %v3695_v19 = vadd.f32 -1.0, %v6540_v21  ;;  %v2507_v34 = vmul.f32 %v2475_v56, %v2475_v56 }
 0x2e1   :  { %4435 = vpow2.f32 %v2446_v45  ;;  %v2714_v9 = vsel %vm2682_vm11, %v6316_v28, %v2650_v10  ;;  %v4418_v23 = vpop.eup %4417  ;;  %v6627_v57 = vmul.f32 %v2474_v14, %v2474_v14  ;;  %v2712_v38 = vsel %vm2680_vm12, %v6303_v63, %v2648_v51  ;;  %v7333_v14 = vld [vmem:[#allocation71_spill] sm:$0xff] }
 0x2e2   :  { %2935 = vmatprep.mubr.bf16.mxu0 %v2741_v8  ;;  %v2653_v60 = vmul.f32 %v4404_v54, %v6521_v4  ;;  %v2655_v21 = vmul.f32 %v4414_v31, %v6552_v43  ;;  %v4420_v41 = vpop.eup %4419  ;;  %v3697_v17 = vadd.f32 -1.0, %v6558_v29  ;;  %4437 = vrcp.f32 %v2598_v5 }
 0x2e3   :  { %v2603_v1 = vadd.f32 1.0, %v2507_v34  ;;  %v2740_v28 = vpack.c.bf16 %v2714_v9, %v2712_v38  ;;  %v3699_v15 = vadd.f32 -1.0, %v6566_v18  ;;  %v6636_v50 = vmul.f32 %v2472_v32, %v2472_v32 }
 0x2e4   :  { %v4422_v16 = vpop.eup %4421  ;;  %4439 = vrcp.f32 %v2601_v20  ;;  %v2654_v55 = vmul.f32 %v4412_v25, %v6544_v6  ;;  %v2477_v63 = vadd.f32 1.0, %v4418_v23  ;;  %vm2685_vm14 = vcmp.gt.f32.partialorder %v6351_v58, 20.0 }
 0x2e5   :  { %v4424_v27 = vpop.eup %4423  ;;  %4441 = vrcp.f32 %v2603_v1  ;;  %2936 = vmatmul.mubr.bf16.gmra.mxu0 %v2740_v28  ;;  %vm2687_vm15 = vcmp.gt.f32.partialorder %v6387_v40, 20.0  ;;  %v2602_v43 = vadd.f32 1.0, %v6627_v57  ;;  %v2717_v29 = vsel %vm2685_vm14, %v6351_v58, %v2653_v60 }
 0x2e6   :  { %v4426_v4 = vpop.eup %4425  ;;  %v2719_v18 = vsel %vm2687_vm15, %v6387_v40, %v2655_v21  ;;  %v2652_v54 = vmul.f32 %v6560_v3, %v6510_v39  ;;  %v2563_v6 = vmul.f32 %v3695_v19, %v7331_v52  ;;  %v3696_v61 = vadd.f32 -1.0, %v6572_v36 }
 0x2e7   :  { %v2743_v48 = vpack.c.bf16 %v2719_v18, %v2717_v29  ;;  %vm2686_vm0 = vcmp.gt.f32.partialorder %v6380_v22, 20.0  ;;  %v2565_v33 = vmul.f32 %v3697_v17, %v7332_v12  ;;  %v3698_v24 = vadd.f32 -1.0, %v6581_v42  ;;  %v7335_v18 = vld [vmem:[#allocation41_spill] sm:$0xff] }
 0x2e8   :  { %v2478_v10 = vadd.f32 1.0, %v4424_v27  ;;  %v2718_v25 = vsel %vm2686_vm0, %v6380_v22, %v2654_v55  ;;  %v4428_v58 = vpop.eup %4427  ;;  %v2600_v40 = vadd.f32 1.0, %v6636_v50  ;;  %v6653_v5 = vmul.f32 %v2477_v63, %v2477_v63 }
 0x2e9   :  { %2943 = vmatprep.mubr.bf16.mxu0 %v2743_v48  ;;  %v2657_v39 = vmul.f32 %v4420_v41, %v6595_v46  ;;  %v2659_v3 = vmul.f32 %v4422_v16, %v2563_v6  ;;  %v4430_v36 = vpop.eup %4429  ;;  %v2567_v51 = vmul.f32 %v3699_v15, %v7333_v14  ;;  %4443 = vrcp.f32 %v2602_v43  ;;  %v7334_v16 = vld [vmem:[#allocation75_spill] sm:$0xff] }
 0x2ea   :  { %v2476_v31 = vadd.f32 1.0, %v4426_v4  ;;  %v2716_v42 = vsel %vm2684_vm13, %v6327_v0, %v2652_v54  ;;  %v4432_v56 = vpop.eup %4431  ;;  %v3703_v22 = vadd.f32 -1.0, %v2507_v34  ;;  %vm2689_vm1 = vcmp.gt.f32.partialorder %v6417_v37, 20.0 }
 0x2eb   :  { %v2742_v45 = vpack.c.bf16 %v2718_v25, %v2716_v42  ;;  %vm2691_vm2 = vcmp.gt.f32.partialorder %v7331_v52, 20.0  ;;  %v6662_v62 = vmul.f32 %v2478_v10, %v2478_v10  ;;  %v2721_v46 = vsel %vm2689_vm1, %v6417_v37, %v2657_v39  ;;  %v7336_v25 = vld [vmem:[#allocation79_spill] sm:$0xff] }
 0x2ec   :  { %v2723_v26 = vsel %vm2691_vm2, %v7331_v52, %v2659_v3  ;;  %v2658_v32 = vmul.f32 %v4428_v58, %v6598_v47  ;;  %v4434_v20 = vpop.eup %4433  ;;  %4445 = vrcp.f32 %v2600_v40  ;;  %v2605_v8 = vadd.f32 1.0, %v6653_v5 }
 0x2ed   :  { %2944 = vmatmul.mubr.bf16.gmra.mxu0 %v2742_v45  ;;  %v2745_v0 = vpack.c.bf16 %v2723_v26, %v2721_v46  ;;  %v2661_v19 = vmul.f32 %v4430_v36, %v2565_v33  ;;  %v3701_v9 = vadd.f32 -1.0, %v6604_v49  ;;  %v2508_v23 = vmul.f32 %v2476_v31, %v2476_v31 }
 0x2ee   :  { %v4436_v34 = vpop.eup %4435  ;;  %v2656_v38 = vmul.f32 %v6620_v2, %v6555_v7  ;;  %v2663_v60 = vmul.f32 %v4432_v56, %v2567_v51  ;;  %v2571_v37 = vmul.f32 %v3703_v22, %v6518_v44  ;;  %vm2690_vm3 = vcmp.gt.f32.partialorder %v6437_v13, 20.0 }
 0x2ef   :  { %v2479_v21 = vadd.f32 1.0, %v4436_v34  ;;  %2951 = vmatprep.mubr.bf16.mxu0 %v2745_v0  ;;  %vm2695_vm4 = vcmp.gt.f32.partialorder %v7333_v14, 20.0  ;;  %v4438_v47 = vpop.eup %4437  ;;  %v2606_v41 = vadd.f32 1.0, %v6662_v62  ;;  %v2722_v17 = vsel %vm2690_vm3, %v6437_v13, %v2658_v32  ;;  %v7338_v34 = vld [vmem:[#allocation43_spill] sm:$0xff] }
 0x2f0   :  { %vm2693_vm5 = vcmp.gt.f32.partialorder %v7332_v12, 20.0  ;;  %v2727_v49 = vsel %vm2695_vm4, %v7333_v14, %v2663_v60  ;;  %4447 = vrcp.f32 %v2605_v8  ;;  %vm2688_vm6 = vcmp.gt.f32.partialorder %v6392_v11, 20.0 }
 0x2f1   :  { %v4440_v1 = vpop.eup %4439  ;;  %v2511_v7 = vmul.f32 %v2479_v21, %v2479_v21  ;;  %v2725_v2 = vsel %vm2693_vm5, %v7332_v12, %v2661_v19  ;;  %v2566_v15 = vmul.f32 %v3698_v24, %v7334_v16  ;;  %v2604_v55 = vadd.f32 1.0, %v2508_v23 }
 0x2f2   :  { %v4442_v28 = vpop.eup %4441  ;;  %v2720_v27 = vsel %vm2688_vm6, %v6392_v11, %v2656_v38  ;;  %v2747_v63 = vpack.c.bf16 %v2727_v49, %v2725_v2  ;;  %v2569_v13 = vmul.f32 %v3701_v9, %v6488_v53  ;;  %v2564_v54 = vmul.f32 %v3696_v61, %v7335_v18  ;;  %v4063_v49 = vld [vmem:[%s6936_s9 + $0x38] sm:$0xff]   ;;  %v4069_v2 = vld [vmem:[%s6936_s9 + $0x8] sm:$0xff]  }
 0x2f3   :  { %v2607_v4 = vadd.f32 1.0, %v2511_v7  ;;  %v2744_v43 = vpack.c.bf16 %v2722_v17, %v2720_v27  ;;  %v2667_v29 = vmul.f32 %v4442_v28, %v2571_v37  ;;  %4449 = vrcp.f32 %v2606_v41  ;;  %3846 = vmatprep.subr.bf16.mxu1 %v4063_v49  ;;  %v4070_v28 = vld [vmem:[%s6936_s9] sm:$0xff]  }
 0x2f4   :  { %v2662_v52 = vmul.f32 %v4438_v47, %v2566_v15  ;;  %v2665_v6 = vmul.f32 %v4440_v1, %v2569_v13  ;;  %v3702_v48 = vadd.f32 -1.0, %v6627_v57  ;;  %v2660_v12 = vmul.f32 %v4434_v20, %v2564_v54  ;;  %3847 = vmatpush3.bf16.msra.mxu1 %v4063_v49  ;;  %v4067_v1 = vld [vmem:[%s6936_s9 + $0x18] sm:$0xff]   ;;  %v6741_v15 = vld [vmem:[%s6937_s8] ss:$0 sm:$0xff] }
 0x2f5   :  { %4451 = vrcp.f32 %v2607_v4  ;;  %2952 = vmatmul.mubr.bf16.gmra.mxu0 %v2744_v43  ;;  %vm2699_vm7 = vcmp.gt.f32.partialorder %v6518_v44, 20.0  ;;  %vm2694_vm8 = vcmp.gt.f32.partialorder %v7334_v16, 20.0  ;;  %v3700_v24 = vadd.f32 -1.0, %v6636_v50 }
 0x2f6   :  { %4453 = vrcp.f32 %v2604_v55  ;;  %2959 = vmatprep.mubr.bf16.mxu0 %v2747_v63  ;;  %v4444_v11 = vpop.eup %4443  ;;  %v2731_v33 = vsel %vm2699_vm7, %v6518_v44, %v2667_v29  ;;  %v2726_v61 = vsel %vm2694_vm8, %v7334_v16, %v2662_v52  ;;  %vm2697_vm9 = vcmp.gt.f32.partialorder %v6488_v53, 20.0  ;;  %v7337_v44 = vld [vmem:[#allocation38_spill] sm:$0xff] }
 0x2f7   :  { %vm2692_vm10 = vcmp.gt.f32.partialorder %v7335_v18, 20.0  ;;  %v2729_v57 = vsel %vm2697_vm9, %v6488_v53, %v2665_v6  ;;  %v2570_v58 = vmul.f32 %v3702_v48, %v7336_v25  ;;  %v3705_v3 = vadd.f32 -1.0, %v6653_v5 }
 0x2f8   :  { %v2724_v40 = vsel %vm2692_vm10, %v7335_v18, %v2660_v12  ;;  %v2749_v39 = vpack.c.bf16 %v2731_v33, %v2729_v57  ;;  %v2568_v14 = vmul.f32 %v3700_v24, %v7337_v44  ;;  %v3707_v51 = vadd.f32 -1.0, %v2511_v7  ;;  %v4068_v7 = vld [vmem:[%s6936_s9 + $0x10] sm:$0xff]  }
 0x2f9   :  { %v4446_v10 = vpop.eup %4445  ;;  %v2746_v36 = vpack.c.bf16 %v2726_v61, %v2724_v40  ;;  %v2666_v50 = vmul.f32 %v4444_v11, %v2570_v58  ;;  %v3706_v56 = vadd.f32 -1.0, %v6662_v62  ;;  %vm2698_vm11 = vcmp.gt.f32.partialorder %v7336_v25, 20.0 }
 0x2fa   :  { %v2664_v42 = vmul.f32 %v4446_v10, %v2568_v14  ;;  %v2573_v53 = vmul.f32 %v3705_v3, %v6528_v30  ;;  %v3704_v22 = vadd.f32 -1.0, %v2508_v23  ;;  %vm2696_vm12 = vcmp.gt.f32.partialorder %v7337_v44, 20.0 }
 0x2fb   :  { %v2730_v45 = vsel %vm2698_vm11, %v7336_v25, %v2666_v50  ;;  %v2575_v5 = vmul.f32 %v3707_v51, %v6601_v35  ;;  %v2574_v20 = vmul.f32 %v3706_v56, %v6537_v59  ;;  %vm2701_vm13 = vcmp.gt.f32.partialorder %v6528_v30, 20.0 }
 0x2fc   :  { %v2728_v8 = vsel %vm2696_vm12, %v7337_v44, %v2664_v42  ;;  %v2572_v9 = vmul.f32 %v3704_v22, %v7338_v34  ;;  %vm2703_vm14 = vcmp.gt.f32.partialorder %v6601_v35, 20.0  ;;  %vm2702_vm15 = vcmp.gt.f32.partialorder %v6537_v59, 20.0 }
 0x2fd   :  { %2960 = vmatmul.mubr.bf16.gmra.mxu0 %v2746_v36  ;;  %v4448_v31 = vpop.eup %4447  ;;  %v2748_v0 = vpack.c.bf16 %v2730_v45, %v2728_v8  ;;  %vm2700_vm0 = vcmp.gt.f32.partialorder %v7338_v34, 20.0 }
 0x2fe   :  { %2967 = vmatprep.mubr.bf16.mxu0 %v2749_v39  ;;  %v2669_v26 = vmul.f32 %v4448_v31, %v2573_v53 }
 0x300   :  { %v4450_v46 = vpop.eup %4449  ;;  %v2733_v23 = vsel %vm2701_vm13, %v6528_v30, %v2669_v26  ;;  %v4064_v30 = vld [vmem:[%s6936_s9 + $0x30] sm:$0xff]  }
 0x301   :  { %v2670_v38 = vmul.f32 %v4450_v46, %v2574_v20  ;;  %3848 = vmatprep.subr.bf16.mxu1 %v4064_v30 }
 0x302   :  { %v4452_v32 = vpop.eup %4451  ;;  %3849 = vmatpush3.bf16.msra.mxu1 %v4064_v30 }
 0x303   :  { %v4454_v62 = vpop.eup %4453  ;;  %v2671_v19 = vmul.f32 %v4452_v32, %v2575_v5  ;;  %v2734_v47 = vsel %vm2702_vm15, %v6537_v59, %v2670_v38  ;;  %v4065_v59 = vld [vmem:[%s6936_s9 + $0x28] sm:$0xff]  }
 0x304   :  { %v2668_v37 = vmul.f32 %v4454_v62, %v2572_v9  ;;  %3850 = vmatprep.subr.bf16.mxu1 %v4065_v59 }
 0x305   :  { %2968 = vmatmul.mubr.bf16.gmra.mxu0 %v2748_v0  ;;  %v2735_v60 = vsel %vm2703_vm14, %v6601_v35, %v2671_v19  ;;  %v4066_v35 = vld [vmem:[%s6936_s9 + $0x20] sm:$0xff]  }
 0x306   :  { %v2751_v21 = vpack.c.bf16 %v2735_v60, %v2733_v23  ;;  %v2732_v41 = vsel %vm2700_vm0, %v7338_v34, %v2668_v37  ;;  %3851 = vmatpush3.bf16.msra.mxu1 %v4065_v59 }
 0x307   :  { %v2750_v17 = vpack.c.bf16 %v2734_v47, %v2732_v41  ;;  %3852 = vmatprep.subr.bf16.mxu1 %v4066_v35 }
 0x308   :  { %2975 = vmatprep.mubr.bf16.mxu0 %v2751_v21 }
 0x30a   :  { %3853 = vmatpush3.bf16.msra.mxu1 %v4066_v35 }
 0x30b   :  { %3854 = vmatprep.subr.bf16.mxu1 %v4067_v1 }
 0x30d   :  { %2976 = vmatmul.mubr.bf16.gmra.mxu0 %v2750_v17 }
 0x30e   :  { %3855 = vmatpush3.bf16.msra.mxu1 %v4067_v1 }
 0x30f   :  { %3856 = vmatprep.subr.bf16.mxu1 %v4068_v7 }
 0x312   :  { %3857 = vmatpush3.bf16.msra.mxu1 %v4068_v7 }
 0x313   :  { %3858 = vmatprep.subr.bf16.mxu1 %v4069_v2 }
 0x316   :  { %3859 = vmatpush3.bf16.msra.mxu1 %v4069_v2 }
 0x317   :  { %3860 = vmatprep.subr.bf16.mxu1 %v4070_v28 }
 0x31a   :  { %3861 = vmatpush3.bf16.msra.mxu1 %v4070_v28 }
 0x38e   :  { %v3782_v16 = vpop.f32.mrf.mxu0 }
 0x390   :  { %v3783_v55 = vpop.f32.mrf.mxu0 }
 0x391   :  { %v3784_v27 = vadd.f32 %v3783_v55, %v3782_v16 }
 0x392   :  { %v3785_v63 = vpop.f32.mrf.mxu0 }
 0x393   :  { %v6744_v13 = vadd.f32 %v3784_v27, %v6741_v15 }
 0x394   :  { %v3786_v4 = vpop.f32.mrf.mxu0 }
 0x395   :  { %v2984_v43 = vmin.f32 %v6744_v13, 20.0  ;;  %v3787_v29 = vadd.f32 %v3786_v4, %v3785_v63  ;;  %vm3144_vm1 = vcmp.gt.f32.partialorder %v6744_v13, 20.0 }
 0x397   :  { %v3000_v18 = vmul.f32 1.442695, %v2984_v43  ;;  %v6748_v54 = vadd.f32 %v3787_v29, %v6741_v15 }
 0x399   :  { %4455 = vpow2.f32 %v3000_v18  ;;  %v2985_v52 = vmin.f32 %v6748_v54, 20.0  ;;  %vm3145_vm2 = vcmp.gt.f32.partialorder %v6748_v54, 20.0 }
 0x39b   :  { %v3002_v6 = vmul.f32 1.442695, %v2985_v52 }
 0x39d   :  { %4457 = vpow2.f32 %v3002_v6  ;;  %v3788_v48 = vpop.f32.mrf.mxu0 }
 0x39f   :  { %v3789_v12 = vpop.f32.mrf.mxu0 }
 0x3a0   :  { %v3790_v11 = vadd.f32 %v3789_v12, %v3788_v48 }
 0x3a1   :  { %v3791_v33 = vpop.f32.mrf.mxu0 }
 0x3a2   :  { %v6752_v24 = vadd.f32 %v3790_v11, %v6741_v15 }
 0x3a3   :  { %v3792_v61 = vpop.f32.mrf.mxu0 }
 0x3a4   :  { %v2986_v57 = vmin.f32 %v6752_v24, 20.0  ;;  %v3793_v10 = vadd.f32 %v3792_v61, %v3791_v33  ;;  %vm3146_vm3 = vcmp.gt.f32.partialorder %v6752_v24, 20.0 }
 0x3a5   :  { %v3794_v58 = vpop.f32.mrf.mxu0 }
 0x3a6   :  { %v4456_v25 = vpop.eup %4455  ;;  %v3004_v39 = vmul.f32 1.442695, %v2986_v57  ;;  %v6756_v3 = vadd.f32 %v3793_v10, %v6741_v15 }
 0x3a7   :  { %v3032_v40 = vadd.f32 1.0, %v4456_v25  ;;  %v3795_v36 = vpop.f32.mrf.mxu0 }
 0x3a8   :  { %4459 = vpow2.f32 %v3004_v39  ;;  %v2987_v14 = vmin.f32 %v6756_v3, 20.0  ;;  %v3796_v51 = vadd.f32 %v3795_v36, %v3794_v58  ;;  %vm3147_vm4 = vcmp.gt.f32.partialorder %v6756_v3, 20.0 }
 0x3a9   :  { %v3048_v44 = vmul.f32 %v3032_v40, %v3032_v40  ;;  %v3797_v31 = vpop.f32.mrf.mxu0 }
 0x3aa   :  { %v4458_v50 = vpop.eup %4457  ;;  %v3006_v53 = vmul.f32 1.442695, %v2987_v14  ;;  %v6760_v22 = vadd.f32 %v3796_v51, %v6741_v15 }
 0x3ab   :  { %v3096_v42 = vadd.f32 1.0, %v3048_v44  ;;  %v3033_v56 = vadd.f32 1.0, %v4458_v50  ;;  %v3798_v45 = vpop.f32.mrf.mxu0  ;;  %v3725_v41 = vadd.f32 -1.0, %v3048_v44 }
 0x3ac   :  { %v3799_v5 = vadd.f32 %v3798_v45, %v3797_v31  ;;  %v2988_v26 = vmin.f32 %v6760_v22, 20.0  ;;  %vm3148_vm5 = vcmp.gt.f32.partialorder %v6760_v22, 20.0 }
 0x3ad   :  { %4461 = vrcp.f32 %v3096_v42  ;;  %v3049_v46 = vmul.f32 %v3033_v56, %v3033_v56  ;;  %v3800_v32 = vpop.f32.mrf.mxu0  ;;  %v3080_v55 = vmul.f32 %v3725_v41, %v6744_v13 }
 0x3ae   :  { %4463 = vpow2.f32 %v3006_v53  ;;  %v6764_v8 = vadd.f32 %v3799_v5, %v6741_v15  ;;  %v3008_v62 = vmul.f32 1.442695, %v2988_v26 }
 0x3af   :  { %v3097_v20 = vadd.f32 1.0, %v3049_v46  ;;  %v3801_v0 = vpop.f32.mrf.mxu0  ;;  %v3726_v35 = vadd.f32 -1.0, %v3049_v46 }
 0x3b0   :  { %v2989_v19 = vmin.f32 %v6764_v8, 20.0  ;;  %v3802_v34 = vadd.f32 %v3801_v0, %v3800_v32  ;;  %vm3149_vm6 = vcmp.gt.f32.partialorder %v6764_v8, 20.0 }
 0x3b1   :  { %4465 = vrcp.f32 %v3097_v20  ;;  %v3803_v9 = vpop.f32.mrf.mxu0  ;;  %v3081_v48 = vmul.f32 %v3726_v35, %v6748_v54 }
 0x3b2   :  { %4467 = vpow2.f32 %v3008_v62  ;;  %v3010_v38 = vmul.f32 1.442695, %v2989_v19  ;;  %v6768_v23 = vadd.f32 %v3802_v34, %v6741_v15 }
 0x3b3   :  { %v3804_v60 = vpop.f32.mrf.mxu0 }
 0x3b4   :  { %4469 = vpow2.f32 %v3010_v38  ;;  %v2990_v37 = vmin.f32 %v6768_v23, 20.0  ;;  %v3805_v21 = vadd.f32 %v3804_v60, %v3803_v9  ;;  %vm3150_vm7 = vcmp.gt.f32.partialorder %v6768_v23, 20.0 }
 0x3b5   :  { %v4460_v47 = vpop.eup %4459  ;;  %v3806_v17 = vpop.f32.mrf.mxu0 }
 0x3b6   :  { %v3034_v49 = vadd.f32 1.0, %v4460_v47  ;;  %v3012_v30 = vmul.f32 1.442695, %v2990_v37  ;;  %v6772_v59 = vadd.f32 %v3805_v21, %v6741_v15 }
 0x3b7   :  { %v3807_v1 = vpop.f32.mrf.mxu0 }
 0x3b8   :  { %v3050_v7 = vmul.f32 %v3034_v49, %v3034_v49  ;;  %4471 = vpow2.f32 %v3012_v30  ;;  %v2991_v2 = vmin.f32 %v6772_v59, 20.0  ;;  %v3808_v28 = vadd.f32 %v3807_v1, %v3806_v17 }
 0x3b9   :  { %v3809_v27 = vpop.f32.mrf.mxu0  ;;  %vm3151_vm8 = vcmp.gt.f32.partialorder %v6772_v59, 20.0 }
 0x3ba   :  { %v4462_v16 = vpop.eup %4461  ;;  %v3098_v4 = vadd.f32 1.0, %v3050_v7  ;;  %v3014_v43 = vmul.f32 1.442695, %v2991_v2  ;;  %v6777_v29 = vadd.f32 %v3808_v28, %v6741_v15  ;;  %v3727_v60 = vadd.f32 -1.0, %v3050_v7 }
 0x3bb   :  { %v4464_v63 = vpop.eup %4463  ;;  %v3810_v52 = vpop.f32.mrf.mxu0  ;;  %v3128_v6 = vmul.f32 %v4462_v16, %v3080_v55 }
 0x3bc   :  { %v3035_v18 = vadd.f32 1.0, %v4464_v63  ;;  %4473 = vrcp.f32 %v3098_v4  ;;  %v2992_v12 = vmin.f32 %v6777_v29, 20.0  ;;  %v3811_v11 = vadd.f32 %v3810_v52, %v3809_v27 }
 0x3bd   :  { %4475 = vpow2.f32 %v3014_v43  ;;  %v3812_v57 = vpop.f32.mrf.mxu0  ;;  %v3160_v14 = vsel %vm3144_vm1, %v6744_v13, %v3128_v6  ;;  %v3082_v7 = vmul.f32 %v3727_v60, %v6752_v24  ;;  %vm3152_vm9 = vcmp.gt.f32.partialorder %v6777_v29, 20.0 }
 0x3be   :  { %v4466_v33 = vpop.eup %4465  ;;  %v3051_v61 = vmul.f32 %v3035_v18, %v3035_v18  ;;  %v3016_v25 = vmul.f32 1.442695, %v2992_v12  ;;  %v6782_v58 = vadd.f32 %v3811_v11, %v6741_v15 }
 0x3bf   :  { %v4468_v10 = vpop.eup %4467  ;;  %v3129_v40 = vmul.f32 %v4466_v33, %v3081_v48  ;;  %v3813_v44 = vpop.f32.mrf.mxu0 }
 0x3c0   :  { %v3099_v39 = vadd.f32 1.0, %v3051_v61  ;;  %v3036_v36 = vadd.f32 1.0, %v4468_v10  ;;  %4477 = vpow2.f32 %v3016_v25  ;;  %v2993_v50 = vmin.f32 %v6782_v58, 20.0 }
 0x3c1   :  { %v3814_v51 = vadd.f32 %v3813_v44, %v3812_v57  ;;  %v3161_v31 = vsel %vm3145_vm2, %v6748_v54, %v3129_v40  ;;  %v4470_v42 = vpop.eup %4469  ;;  %v3815_v53 = vpop.f32.mrf.mxu0  ;;  %v3728_v47 = vadd.f32 -1.0, %v3051_v61  ;;  %vm3153_vm10 = vcmp.gt.f32.partialorder %v6782_v58, 20.0 }
 0x3c2   :  { %4479 = vrcp.f32 %v3099_v39  ;;  %v3052_v56 = vmul.f32 %v3036_v36, %v3036_v36  ;;  %v3176_v45 = vpack.c.bf16 %v3161_v31, %v3160_v14  ;;  %v3037_v46 = vadd.f32 1.0, %v4470_v42 }
 0x3c3   :  { %v3018_v5 = vmul.f32 1.442695, %v2993_v50  ;;  %v6790_v26 = vadd.f32 %v3814_v51, %v6741_v15  ;;  %v3816_v20 = vpop.f32.mrf.mxu0  ;;  %v3083_v63 = vmul.f32 %v3728_v47, %v6756_v3 }
 0x3c4   :  { %v3100_v32 = vadd.f32 1.0, %v3052_v56  ;;  %3862 = vmatprep.mubr.bf16.mxu1 %v3176_v45  ;;  %v3053_v13 = vmul.f32 %v3037_v46, %v3037_v46  ;;  %v3817_v54 = vadd.f32 %v3816_v20, %v3815_v53  ;;  %v3729_v57 = vadd.f32 -1.0, %v3052_v56 }
 0x3c5   :  { %4481 = vpow2.f32 %v3018_v5  ;;  %v2994_v62 = vmin.f32 %v6790_v26, 20.0  ;;  %v4472_v0 = vpop.eup %4471  ;;  %v3818_v19 = vpop.f32.mrf.mxu0  ;;  %vm3154_vm11 = vcmp.gt.f32.partialorder %v6790_v26, 20.0 }
 0x3c6   :  { %4483 = vrcp.f32 %v3100_v32  ;;  %v3101_v34 = vadd.f32 1.0, %v3053_v13  ;;  %v3038_v9 = vadd.f32 1.0, %v4472_v0  ;;  %v6794_v37 = vadd.f32 %v3817_v54, %v6741_v15 }
 0x3c7   :  { %v3020_v38 = vmul.f32 1.442695, %v2994_v62  ;;  %v3819_v21 = vpop.f32.mrf.mxu0  ;;  %v3730_v39 = vadd.f32 -1.0, %v3053_v13  ;;  %v3084_v5 = vmul.f32 %v3729_v57, %v6760_v22 }
 0x3c8   :  { %4485 = vrcp.f32 %v3101_v34  ;;  %v6796_v41 = vmul.f32 %v3038_v9, %v3038_v9  ;;  %v3820_v17 = vadd.f32 %v3819_v21, %v3818_v19  ;;  %v2995_v30 = vmin.f32 %v6794_v37, 20.0 }
 0x3c9   :  { %v4474_v49 = vpop.eup %4473  ;;  %4487 = vpow2.f32 %v3020_v38  ;;  %v3821_v35 = vpop.f32.mrf.mxu0  ;;  %v3085_v62 = vmul.f32 %v3730_v39, %v6764_v8  ;;  %vm3155_vm12 = vcmp.gt.f32.partialorder %v6794_v37, 20.0 }
 0x3ca   :  { %v4476_v1 = vpop.eup %4475  ;;  %v3102_v2 = vadd.f32 1.0, %v6796_v41  ;;  %v6801_v28 = vadd.f32 %v3820_v17, %v6741_v15  ;;  %v3022_v55 = vmul.f32 1.442695, %v2995_v30  ;;  %v3130_v18 = vmul.f32 %v4474_v49, %v3082_v7 }
 0x3cb   :  { %v3039_v16 = vadd.f32 1.0, %v4476_v1  ;;  %v3822_v27 = vpop.f32.mrf.mxu0  ;;  %v3731_v21 = vadd.f32 -1.0, %v6796_v41 }
 0x3cc   :  { %4489 = vrcp.f32 %v3102_v2  ;;  %v2996_v4 = vmin.f32 %v6801_v28, 20.0  ;;  %v3823_v6 = vadd.f32 %v3822_v27, %v3821_v35  ;;  %v3162_v50 = vsel %vm3146_vm3, %v6752_v24, %v3130_v18 }
 0x3cd   :  { %v4478_v43 = vpop.eup %4477  ;;  %v3055_v52 = vmul.f32 %v3039_v16, %v3039_v16  ;;  %4491 = vpow2.f32 %v3022_v55  ;;  %v3824_v48 = vpop.f32.mrf.mxu0  ;;  %v3086_v55 = vmul.f32 %v3731_v21, %v6768_v23  ;;  %vm3156_vm13 = vcmp.gt.f32.partialorder %v6801_v28, 20.0 }
 0x3ce   :  { %v3040_v11 = vadd.f32 1.0, %v4478_v43  ;;  %v3024_v33 = vmul.f32 1.442695, %v2996_v4  ;;  %v6809_v25 = vadd.f32 %v3823_v6, %v6741_v15 }
 0x3cf   :  { %v4480_v12 = vpop.eup %4479  ;;  %v3103_v10 = vadd.f32 1.0, %v3055_v52  ;;  %v3825_v40 = vpop.f32.mrf.mxu0  ;;  %v3732_v49 = vadd.f32 -1.0, %v3055_v52 }
 0x3d0   :  { %v3131_v61 = vmul.f32 %v4480_v12, %v3083_v63  ;;  %v3056_v36 = vmul.f32 %v3040_v11, %v3040_v11  ;;  %4493 = vpow2.f32 %v3024_v33  ;;  %v3826_v44 = vadd.f32 %v3825_v40, %v3824_v48 }
 0x3d1   :  { %4495 = vrcp.f32 %v3103_v10  ;;  %v2997_v31 = vmin.f32 %v6809_v25, 20.0  ;;  %v3827_v42 = vpop.f32.mrf.mxu0  ;;  %v3087_v43 = vmul.f32 %v3732_v49, %v6772_v59  ;;  %vm3157_vm14 = vcmp.gt.f32.partialorder %v6809_v25, 20.0 }
 0x3d2   :  { %v4482_v14 = vpop.eup %4481  ;;  %v3163_v51 = vsel %vm3147_vm4, %v6756_v3, %v3131_v61  ;;  %v3104_v45 = vadd.f32 1.0, %v3056_v36  ;;  %v6816_v20 = vadd.f32 %v3826_v44, %v6741_v15  ;;  %v3733_v48 = vadd.f32 -1.0, %v3056_v36 }
 0x3d3   :  { %v4484_v53 = vpop.eup %4483  ;;  %v3177_v56 = vpack.c.bf16 %v3163_v51, %v3162_v50  ;;  %v3041_v46 = vadd.f32 1.0, %v4482_v14  ;;  %v3026_v32 = vmul.f32 1.442695, %v2997_v31  ;;  %v3828_v13 = vpop.f32.mrf.mxu0 }
 0x3d4   :  { %4497 = vrcp.f32 %v3104_v45  ;;  %v3829_v3 = vadd.f32 %v3828_v13, %v3827_v42  ;;  %v2998_v54 = vmin.f32 %v6816_v20, 20.0  ;;  %v3132_v19 = vmul.f32 %v4484_v53, %v3084_v5 }
 0x3d5   :  { %v3057_v24 = vmul.f32 %v3041_v46, %v3041_v46  ;;  %3863 = vmatmul.mubr.bf16.vlgmr.msra.gmra.mxu1 %v3177_v56  ;;  %v4486_v0 = vpop.eup %4485  ;;  %4499 = vpow2.f32 %v3026_v32  ;;  %v3088_v39 = vmul.f32 %v3733_v48, %v6777_v29  ;;  %vm3158_vm15 = vcmp.gt.f32.partialorder %v6816_v20, 20.0 }
 0x3d6   :  { %v4488_v34 = vpop.eup %4487  ;;  %v6821_v38 = vadd.f32 %v3829_v3, %v6741_v15  ;;  %v3133_v60 = vmul.f32 %v4486_v0, %v3085_v62  ;;  %v3028_v17 = vmul.f32 1.442695, %v2998_v54  ;;  %v3164_v2 = vsel %vm3148_vm5, %v6760_v22, %v3132_v19 }
 0x3d7   :  { %v3105_v9 = vadd.f32 1.0, %v3057_v24  ;;  %v3042_v47 = vadd.f32 1.0, %v4488_v34  ;;  %v3734_v11 = vadd.f32 -1.0, %v3057_v24 }
 0x3d8   :  { %v2999_v30 = vmin.f32 %v6821_v38, 20.0  ;;  %v3165_v15 = vsel %vm3149_vm6, %v6764_v8, %v3133_v60  ;;  %vm3159_vm0 = vcmp.gt.f32.partialorder %v6821_v38, 20.0 }
 0x3d9   :  { %4501 = vrcp.f32 %v3105_v9  ;;  %v4490_v35 = vpop.eup %4489  ;;  %v3058_v1 = vmul.f32 %v3042_v47, %v3042_v47  ;;  %v3178_v41 = vpack.c.bf16 %v3165_v15, %v3164_v2  ;;  %v3089_v50 = vmul.f32 %v3734_v11, %v6782_v58 }
 0x3da   :  { %4503 = vpow2.f32 %v3028_v17  ;;  %v4492_v7 = vpop.eup %4491  ;;  %v3030_v16 = vmul.f32 1.442695, %v2999_v30  ;;  %v3134_v52 = vmul.f32 %v4490_v35, %v3086_v55 }
 0x3db   :  { %v3106_v27 = vadd.f32 1.0, %v3058_v1  ;;  %v3043_v63 = vadd.f32 1.0, %v4492_v7  ;;  %3866 = vmatprep.mubr.bf16.mxu1 %v3178_v41 }
 0x3dc   :  { %4505 = vpow2.f32 %v3030_v16  ;;  %v3166_v57 = vsel %vm3150_vm7, %v6768_v23, %v3134_v52  ;;  %v3735_v23 = vadd.f32 -1.0, %v3058_v1 }
 0x3dd   :  { %v4494_v4 = vpop.eup %4493  ;;  %4507 = vrcp.f32 %v3106_v27  ;;  %v3059_v18 = vmul.f32 %v3043_v63, %v3043_v63 }
 0x3de   :  { %v4496_v6 = vpop.eup %4495  ;;  %v3044_v22 = vadd.f32 1.0, %v4494_v4  ;;  %v3090_v54 = vmul.f32 %v3735_v23, %v6790_v26 }
 0x3df   :  { %v3107_v12 = vadd.f32 1.0, %v3059_v18  ;;  %v3135_v8 = vmul.f32 %v4496_v6, %v3087_v43  ;;  %v3736_v13 = vadd.f32 -1.0, %v3059_v18 }
 0x3e0   :  { %v3060_v33 = vmul.f32 %v3044_v22, %v3044_v22 }
 0x3e1   :  { %v4498_v61 = vpop.eup %4497  ;;  %4509 = vrcp.f32 %v3107_v12  ;;  %v3167_v10 = vsel %vm3151_vm8, %v6772_v59, %v3135_v8  ;;  %v3091_v60 = vmul.f32 %v3736_v13, %v6794_v37 }
 0x3e2   :  { %v4500_v40 = vpop.eup %4499  ;;  %v3108_v44 = vadd.f32 1.0, %v3060_v33  ;;  %v3179_v36 = vpack.c.bf16 %v3167_v10, %v3166_v57  ;;  %v3136_v51 = vmul.f32 %v4498_v61, %v3088_v39 }
 0x3e3   :  { %v3045_v14 = vadd.f32 1.0, %v4500_v40 }
 0x3e4   :  { %3867 = vmatmul.mubr.bf16.gmra.mxu1 %v3179_v36  ;;  %4511 = vrcp.f32 %v3108_v44  ;;  %v3168_v46 = vsel %vm3152_vm9, %v6777_v29, %v3136_v51 }
 0x3e5   :  { %v3061_v42 = vmul.f32 %v3045_v14, %v3045_v14 }
 0x3e6   :  { %v4502_v31 = vpop.eup %4501 }
 0x3e7   :  { %v4504_v53 = vpop.eup %4503  ;;  %v3137_v56 = vmul.f32 %v4502_v31, %v3089_v50  ;;  %v3109_v45 = vadd.f32 1.0, %v3061_v42  ;;  %v3738_v17 = vadd.f32 -1.0, %v3061_v42 }
 0x3e8   :  { %v3046_v59 = vadd.f32 1.0, %v4504_v53 }
 0x3e9   :  { %v3169_v5 = vsel %vm3153_vm10, %v6782_v58, %v3137_v56  ;;  %v4506_v32 = vpop.eup %4505  ;;  %4513 = vrcp.f32 %v3109_v45  ;;  %v3737_v58 = vadd.f32 -1.0, %v3060_v33  ;;  %v3093_v15 = vmul.f32 %v3738_v17, %v6809_v25 }
 0x3ea   :  { %v3062_v62 = vmul.f32 %v3046_v59, %v3046_v59  ;;  %v3180_v24 = vpack.c.bf16 %v3169_v5, %v3168_v46  ;;  %v4508_v3 = vpop.eup %4507  ;;  %v3047_v0 = vadd.f32 1.0, %v4506_v32 }
 0x3eb   :  { %v3138_v9 = vmul.f32 %v4508_v3, %v3090_v54  ;;  %v3092_v2 = vmul.f32 %v3737_v58, %v6801_v28 }
 0x3ec   :  { %v3110_v19 = vadd.f32 1.0, %v3062_v62  ;;  %3870 = vmatprep.mubr.bf16.mxu1 %v3180_v24  ;;  %v3063_v34 = vmul.f32 %v3047_v0, %v3047_v0  ;;  %v3739_v41 = vadd.f32 -1.0, %v3062_v62 }
 0x3ed   :  { %v3170_v49 = vsel %vm3154_vm11, %v6790_v26, %v3138_v9 }
 0x3ee   :  { %4515 = vrcp.f32 %v3110_v19  ;;  %v4510_v21 = vpop.eup %4509  ;;  %v3111_v29 = vadd.f32 1.0, %v3063_v34  ;;  %v3740_v27 = vadd.f32 -1.0, %v3063_v34  ;;  %v3094_v4 = vmul.f32 %v3739_v41, %v6816_v20 }
 0x3ef   :  { %v3139_v47 = vmul.f32 %v4510_v21, %v3091_v60 }
 0x3f0   :  { %4517 = vrcp.f32 %v3111_v29  ;;  %v3095_v52 = vmul.f32 %v3740_v27, %v6821_v38 }
 0x3f1   :  { %v3171_v30 = vsel %vm3155_vm12, %v6794_v37, %v3139_v47  ;;  %v4512_v35 = vpop.eup %4511 }
 0x3f2   :  { %v3181_v1 = vpack.c.bf16 %v3171_v30, %v3170_v49  ;;  %v3140_v7 = vmul.f32 %v4512_v35, %v3092_v2 }
 0x3f4   :  { %3871 = vmatmul.mubr.bf16.gmra.mxu1 %v3181_v1  ;;  %v3172_v26 = vsel %vm3156_vm13, %v6801_v28, %v3140_v7 }
 0x3f6   :  { %v4514_v16 = vpop.eup %4513 }
 0x3f7   :  { %v3141_v55 = vmul.f32 %v4514_v16, %v3093_v15 }
 0x3f9   :  { %v3173_v37 = vsel %vm3157_vm14, %v6809_v25, %v3141_v55  ;;  %v6862_v25 = vld [vmem:[%s6938_s10] ss:$0 sm:$0xff] }
 0x3fa   :  { %v3182_v43 = vpack.c.bf16 %v3173_v37, %v3172_v26 }
 0x3fb   :  { %v4516_v63 = vpop.eup %4515 }
 0x3fc   :  { %v3142_v18 = vmul.f32 %v4516_v63, %v3094_v4  ;;  %3874 = vmatprep.mubr.bf16.mxu1 %v3182_v43 }
 0x3fd   :  { %v4518_v6 = vpop.eup %4517 }
 0x3fe   :  { %v3143_v48 = vmul.f32 %v4518_v6, %v3095_v52  ;;  %v3174_v22 = vsel %vm3158_vm15, %v6816_v20, %v3142_v18 }
 0x400   :  { %v3175_v28 = vsel %vm3159_vm0, %v6821_v38, %v3143_v48 }
 0x401   :  { %v3183_v12 = vpack.c.bf16 %v3175_v28, %v3174_v22 }
 0x403   :  { %3875 = vmatmul.mubr.bf16.gmra.mxu1 %v3183_v12 }
 0x495   :  { %v3864_v8 = vpop.f32.mrf.mxu1 }
 0x496   :  { %v3298_v11 = vadd.f32 %v3864_v8, %v6862_v25 }
 0x497   :  { %v3289_v33 = vpop.f32.mrf.mxu1 }
 0x498   :  { %v3752_v61 = vmul.f32 -1.442695, %v3298_v11  ;;  %v3290_v57 = vadd.f32 %v6862_v25, %v3289_v33 }
 0x499   :  { %v3865_v10 = vpop.f32.mrf.mxu1 }
 0x49a   :  { %4519 = vpow2.f32 %v3752_v61  ;;  %v3750_v40 = vmul.f32 -1.442695, %v3290_v57  ;;  %v3301_v20 = vadd.f32 %v3865_v10, %v6862_v25 }
 0x49b   :  { %v3292_v38 = vpop.f32.mrf.mxu1 }
 0x49c   :  { %4521 = vpow2.f32 %v3750_v40  ;;  %v3753_v39 = vmul.f32 -1.442695, %v3301_v20  ;;  %v3293_v44 = vadd.f32 %v6862_v25, %v3292_v38 }
 0x49e   :  { %4523 = vpow2.f32 %v3753_v39  ;;  %v3751_v36 = vmul.f32 -1.442695, %v3293_v44 }
 0x4a0   :  { %4525 = vpow2.f32 %v3751_v36 }
 0x4a4   :  { %v3868_v14 = vpop.f32.mrf.mxu1 }
 0x4a5   :  { %v3314_v50 = vadd.f32 %v3868_v14, %v6862_v25 }
 0x4a6   :  { %v3305_v31 = vpop.f32.mrf.mxu1 }
 0x4a7   :  { %v4520_v51 = vpop.eup %4519  ;;  %v3756_v53 = vmul.f32 -1.442695, %v3314_v50  ;;  %v3306_v56 = vadd.f32 %v6862_v25, %v3305_v31 }
 0x4a8   :  { %v3402_v42 = vadd.f32 1.0, %v4520_v51  ;;  %v3869_v45 = vpop.f32.mrf.mxu1 }
 0x4a9   :  { %v4522_v23 = vpop.eup %4521  ;;  %v3754_v46 = vmul.f32 -1.442695, %v3306_v56  ;;  %v3317_v5 = vadd.f32 %v3869_v45, %v6862_v25 }
 0x4aa   :  { %4527 = vrcp.f32 %v3402_v42  ;;  %v3400_v59 = vadd.f32 1.0, %v4522_v23  ;;  %v3308_v13 = vpop.f32.mrf.mxu1 }
 0x4ab   :  { %v4524_v32 = vpop.eup %4523  ;;  %4529 = vpow2.f32 %v3756_v53  ;;  %v3757_v24 = vmul.f32 -1.442695, %v3317_v5  ;;  %v3309_v3 = vadd.f32 %v6862_v25, %v3308_v13 }
 0x4ac   :  { %4531 = vrcp.f32 %v3400_v59  ;;  %v3403_v62 = vadd.f32 1.0, %v4524_v32 }
 0x4ad   :  { %v4526_v0 = vpop.eup %4525  ;;  %4533 = vpow2.f32 %v3754_v46  ;;  %v3755_v19 = vmul.f32 -1.442695, %v3309_v3 }
 0x4ae   :  { %4535 = vrcp.f32 %v3403_v62  ;;  %v3401_v54 = vadd.f32 1.0, %v4526_v0 }
 0x4af   :  { %4537 = vpow2.f32 %v3757_v24 }
 0x4b0   :  { %4539 = vrcp.f32 %v3401_v54 }
 0x4b1   :  { %4541 = vpow2.f32 %v3755_v19 }
 0x4b4   :  { %v3872_v34 = vpop.f32.mrf.mxu1 }
 0x4b5   :  { %v3330_v9 = vadd.f32 %v3872_v34, %v6862_v25 }
 0x4b6   :  { %v3321_v21 = vpop.f32.mrf.mxu1 }
 0x4b7   :  { %v4528_v60 = vpop.eup %4527  ;;  %v3760_v47 = vmul.f32 -1.442695, %v3330_v9  ;;  %v3322_v58 = vadd.f32 %v6862_v25, %v3321_v21 }
 0x4b8   :  { %v4530_v29 = vpop.eup %4529  ;;  %3450 = vst [vmem:[%s6939_s11 + $0x10] sm:$0xff] %v4528_v60  ;;  %v3873_v30 = vpop.f32.mrf.mxu1 }
 0x4b9   :  { %v4532_v17 = vpop.eup %4531  ;;  %v3406_v49 = vadd.f32 1.0, %v4530_v29  ;;  %4543 = vpow2.f32 %v3760_v47  ;;  %v3758_v1 = vmul.f32 -1.442695, %v3322_v58  ;;  %v3333_v2 = vadd.f32 %v3873_v30, %v6862_v25 }
 0x4ba   :  { %v4534_v35 = vpop.eup %4533  ;;  %3448 = vst [vmem:[%s6939_s11] sm:$0xff] %v4532_v17  ;;  %v3324_v16 = vpop.f32.mrf.mxu1 }
 0x4bb   :  { %v4536_v15 = vpop.eup %4535  ;;  %4545 = vrcp.f32 %v3406_v49  ;;  %v3404_v7 = vadd.f32 1.0, %v4534_v35  ;;  %v3761_v55 = vmul.f32 -1.442695, %v3333_v2  ;;  %v3325_v27 = vadd.f32 %v6862_v25, %v3324_v16 }
 0x4bc   :  { %v4538_v41 = vpop.eup %4537  ;;  %3451 = vst [vmem:[%s6939_s11 + $0x18] sm:$0xff] %v4536_v15  ;;  %4547 = vpow2.f32 %v3758_v1 }
 0x4bd   :  { %v4540_v26 = vpop.eup %4539  ;;  %4549 = vrcp.f32 %v3404_v7  ;;  %v3407_v37 = vadd.f32 1.0, %v4538_v41  ;;  %v3759_v4 = vmul.f32 -1.442695, %v3325_v27 }
 0x4be   :  { %v4542_v63 = vpop.eup %4541  ;;  %3449 = vst [vmem:[%s6939_s11 + $0x8] sm:$0xff] %v4540_v26  ;;  %4551 = vpow2.f32 %v3761_v55 }
 0x4bf   :  { %4553 = vrcp.f32 %v3407_v37  ;;  %v3405_v43 = vadd.f32 1.0, %v4542_v63 }
 0x4c0   :  { %4555 = vpow2.f32 %v3759_v4 }
 0x4c1   :  { %4557 = vrcp.f32 %v3405_v43 }
 0x4c3   :  { %v3876_v18 = vpop.f32.mrf.mxu1 }
 0x4c4   :  { %v3346_v52 = vadd.f32 %v3876_v18, %v6862_v25 }
 0x4c5   :  { %v3337_v6 = vpop.f32.mrf.mxu1 }
 0x4c6   :  { %v4544_v48 = vpop.eup %4543  ;;  %v3764_v22 = vmul.f32 -1.442695, %v3346_v52  ;;  %v3338_v28 = vadd.f32 %v6862_v25, %v3337_v6 }
 0x4c7   :  { %v3410_v8 = vadd.f32 1.0, %v4544_v48  ;;  %v3877_v11 = vpop.f32.mrf.mxu1 }
 0x4c8   :  { %v4546_v12 = vpop.eup %4545  ;;  %4559 = vpow2.f32 %v3764_v22  ;;  %v3762_v61 = vmul.f32 -1.442695, %v3338_v28  ;;  %v3349_v57 = vadd.f32 %v3877_v11, %v6862_v25 }
 0x4c9   :  { %v4548_v33 = vpop.eup %4547  ;;  %3454 = vst [vmem:[%s6939_s11 + $0x30] sm:$0xff] %v4546_v12  ;;  %4561 = vrcp.f32 %v3410_v8  ;;  %v3340_v20 = vpop.f32.mrf.mxu1 }
 0x4ca   :  { %v4550_v10 = vpop.eup %4549  ;;  %v3408_v40 = vadd.f32 1.0, %v4548_v33  ;;  %4563 = vpow2.f32 %v3762_v61  ;;  %v3765_v39 = vmul.f32 -1.442695, %v3349_v57  ;;  %v3341_v44 = vadd.f32 %v6862_v25, %v3340_v20 }
 0x4cb   :  { %v4552_v38 = vpop.eup %4551  ;;  %3452 = vst [vmem:[%s6939_s11 + $0x20] sm:$0xff] %v4550_v10 }
 0x4cc   :  { %v4554_v36 = vpop.eup %4553  ;;  %4565 = vrcp.f32 %v3408_v40  ;;  %v3411_v14 = vadd.f32 1.0, %v4552_v38  ;;  %v3763_v51 = vmul.f32 -1.442695, %v3341_v44 }
 0x4cd   :  { %v4556_v50 = vpop.eup %4555  ;;  %3455 = vst [vmem:[%s6939_s11 + $0x38] sm:$0xff] %v4554_v36  ;;  %4567 = vpow2.f32 %v3765_v39 }
 0x4ce   :  { %v4558_v31 = vpop.eup %4557  ;;  %4569 = vrcp.f32 %v3411_v14  ;;  %v3409_v42 = vadd.f32 1.0, %v4556_v50 }
 0x4cf   :  { %3453 = vst [vmem:[%s6939_s11 + $0x28] sm:$0xff] %v4558_v31  ;;  %4571 = vpow2.f32 %v3763_v51 }
 0x4d0   :  { %4573 = vrcp.f32 %v3409_v42 }
 0x4d5   :  { %v4560_v25 = vpop.eup %4559 }
 0x4d6   :  { %v4562_v53 = vpop.eup %4561  ;;  %v3414_v56 = vadd.f32 1.0, %v4560_v25 }
 0x4d7   :  { %v4564_v23 = vpop.eup %4563  ;;  %3458 = vst [vmem:[%s6939_s11 + $0x50] sm:$0xff] %v4562_v53 }
 0x4d8   :  { %4575 = vrcp.f32 %v3414_v56  ;;  %v3412_v59 = vadd.f32 1.0, %v4564_v23 }
 0x4d9   :  { %v4566_v45 = vpop.eup %4565 }
 0x4da   :  { %v4568_v46 = vpop.eup %4567  ;;  %3456 = vst [vmem:[%s6939_s11 + $0x40] sm:$0xff] %v4566_v45  ;;  %4577 = vrcp.f32 %v3412_v59 }
 0x4db   :  { %v4570_v5 = vpop.eup %4569  ;;  %v3415_v32 = vadd.f32 1.0, %v4568_v46 }
 0x4dc   :  { %v4572_v13 = vpop.eup %4571  ;;  %3459 = vst [vmem:[%s6939_s11 + $0x58] sm:$0xff] %v4570_v5 }
 0x4dd   :  { %v4574_v62 = vpop.eup %4573  ;;  %4579 = vrcp.f32 %v3415_v32  ;;  %v3413_v24 = vadd.f32 1.0, %v4572_v13 }
 0x4de   :  { %3457 = vst [vmem:[%s6939_s11 + $0x48] sm:$0xff] %v4574_v62 }
 0x4df   :  { %4581 = vrcp.f32 %v3413_v24 }
 0x4e5   :  { %v4576_v3 = vpop.eup %4575 }
 0x4e6   :  { %3462 = vst [vmem:[%s6939_s11 + $0x70] sm:$0xff] %v4576_v3 }
 0x4e7   :  { %v4578_v0 = vpop.eup %4577 }
 0x4e8   :  { %3460 = vst [vmem:[%s6939_s11 + $0x60] sm:$0xff] %v4578_v0 }
 0x4ea   :  { %v4580_v54 = vpop.eup %4579 }
 0x4eb   :  { %3463 = vst [vmem:[%s6939_s11 + $0x78] sm:$0xff] %v4580_v54 }
 0x4ec   :  { %v4582_v19 = vpop.eup %4581 }
 0x4ed   :  { %3461 = vst [vmem:[%s6939_s11 + $0x68] sm:$0xff] %v4582_v19 }

</bundles_post_ra>
